<compile_context>
chip_gen: v6e
topology: v6e:2x2x1
jax: 0.10.0
libtpu: 0.0.40
codegen_flags: <defaults>
</compile_context>

<pallas_src>
import functools

import jax
import jax.numpy as jnp
from jax.experimental import pallas as pl
from jax.experimental.pallas import tpu as pltpu

_EPS = 1e-5
_LANE = 128


# ----------------------------------------------------------------------------
# Fused Pallas kernel
# ----------------------------------------------------------------------------
def _bn_train_fold(acc, gamma, beta, inv_m):
    """Train-mode BN on an (M, C) f32 accumulator.

    One-pass stats (sum / sum-of-squares) over the row axis (== N*Ho*Wo),
    folded into a per-channel scale/shift so the elementwise epilogue is a
    single fused multiply-add.  rsqrt runs on the EUP (free slot)."""
    s1 = jnp.sum(acc, axis=0, keepdims=True)
    s2 = jnp.sum(acc * acc, axis=0, keepdims=True)
    mean = s1 * inv_m
    var = jnp.maximum(s2 * inv_m - mean * mean, 0.0)
    scale = gamma * jax.lax.rsqrt(var + _EPS)
    shift = beta - mean * scale
    return acc * scale + shift


def _residual_block_kernel(stride, n, ho, wo, has_down, *refs):
    if has_down:
        (xph_ref, w1_ref, g1_ref, b1_ref, w2_ref, g2_ref, b2_ref,
         wd_ref, gd_ref, bd_ref, o_ref, tpad_ref) = refs
    else:
        (xph_ref, w1_ref, g1_ref, b1_ref, w2_ref, g2_ref, b2_ref,
         o_ref, tpad_ref) = refs

    s = stride
    cp = o_ref.shape[-1]
    m = n * ho * wo
    inv_m = 1.0 / float(m)

    def conv1_tap(kh, kw):
        # Output (i, j), tap (kh, kw) reads padded input at (s*i+kh, s*j+kw);
        # with the phase decomposition this is a contiguous static window.
        pidx = (kh % s) * s + (kw % s)
        h0, w0 = kh // s, kw // s
        win = xph_ref[pidx * n:pidx * n + n, h0:h0 + ho, w0:w0 + wo, :]
        return win.reshape(m, cp)

    # ---- conv1 (3x3, stride) as 9 accumulated bf16 MXU matmuls, f32 acc ----
    acc1 = None
    for kh in range(3):
        for kw in range(3):
            d = jnp.dot(conv1_tap(kh, kw), w1_ref[kh * 3 + kw],
                        preferred_element_type=jnp.float32)
            acc1 = d if acc1 is None else acc1 + d
    t = jnp.maximum(_bn_train_fold(acc1, g1_ref[...], b1_ref[...], inv_m), 0.0)

    # Stage t (spatially zero-padded for conv2's pad=1) in VMEM as bf16.
    tpad_ref[...] = jnp.zeros(tpad_ref.shape, tpad_ref.dtype)
    tpad_ref[:, 1:1 + ho, 1:1 + wo, :] = (
        t.reshape(n, ho, wo, cp).astype(tpad_ref.dtype))

    # ---- conv2 (3x3, stride 1, pad 1) ----
    acc2 = None
    for kh in range(3):
        for kw in range(3):
            pt = tpad_ref[:, kh:kh + ho, kw:kw + wo, :].reshape(m, cp)
            d = jnp.dot(pt, w2_ref[kh * 3 + kw],
                        preferred_element_type=jnp.float32)
            acc2 = d if acc2 is None else acc2 + d
    y = _bn_train_fold(acc2, g2_ref[...], b2_ref[...], inv_m)

    # ---- residual branch: x[s*i, s*j] == padded_x[s*i+1, s*j+1] ----
    pidx = (1 % s) * s + (1 % s)
    off = 1 // s
    rx = xph_ref[pidx * n:pidx * n + n, off:off + ho, off:off + wo, :]
    rx = rx.reshape(m, cp)
    if has_down:
        accd = jnp.dot(rx, wd_ref[...], preferred_element_type=jnp.float32)
        res = _bn_train_fold(accd, gd_ref[...], bd_ref[...], inv_m)
    else:
        res = rx.astype(jnp.float32)

    o_ref[...] = jnp.maximum(y + res, 0.0).astype(o_ref.dtype)


# ----------------------------------------------------------------------------
# Glue: lane padding, phase decomposition, weight repacking (cheap, small)
# ----------------------------------------------------------------------------
def _cp_for(*channels):
    return max(_LANE, -(-max(channels) // _LANE) * _LANE)


def _pad_last(x, cp):
    pad = cp - x.shape[-1]
    if pad == 0:
        return x
    return jnp.pad(x, [(0, 0)] * (x.ndim - 1) + [(0, pad)])


def _vec_param(v, cp):
    return _pad_last(v.reshape(1, -1).astype(jnp.float32), cp)


def _conv_w_taps(w_oihw, cp):
    """(Cout, Cin, kh, kw) -> (kh*kw, cp, cp), zero padded, bf16 for the MXU."""
    cout, cin, kh, kw = w_oihw.shape
    wt = jnp.transpose(w_oihw, (2, 3, 1, 0)).reshape(kh * kw, cin, cout)
    wt = jnp.pad(wt, ((0, 0), (0, cp - cin), (0, cp - cout)))
    return wt.astype(jnp.bfloat16)


def _phase_decompose(xp, stride, ho, wo):
    """Space-to-batch of the padded NHWC input so every conv tap is a
    contiguous in-kernel window.  Output: (s*s*N, 2//s+ho, 2//s+wo, CP)."""
    s = stride
    hph = 2 // s + ho
    wph = 2 // s + wo
    phases = []
    for p in range(s):
        for q in range(s):
            ph = xp[:, p::s, q::s, :][:, :hph, :wph, :]
            ph = jnp.pad(ph, ((0, 0), (0, hph - ph.shape[1]),
                              (0, wph - ph.shape[2]), (0, 0)))
            phases.append(ph)
    return jnp.concatenate(phases, axis=0)


# ----------------------------------------------------------------------------
# ResidualBlock forward (NCHW in / NCHW out, PyTorch train-mode semantics)
# ----------------------------------------------------------------------------
def residual_block_forward(x_nchw, params, in_channel, out_channel, stride):
    n, _, h, w = x_nchw.shape
    s = stride
    ho = (h + 2 - 3) // s + 1
    wo = (w + 2 - 3) // s + 1
    m = n * ho * wo
    cp = _cp_for(in_channel, out_channel)
    has_down = (in_channel != out_channel) or (s != 1)

    x = jnp.transpose(x_nchw, (0, 2, 3, 1))                 # NCHW -> NHWC
    xp = jnp.pad(x, ((0, 0), (1, 1), (1, 1), (0, 0)))       # conv1 spatial pad
    xp = _pad_last(xp, cp).astype(jnp.bfloat16)             # lane-dense channels
    xph = _phase_decompose(xp, s, ho, wo)

    inputs = [
        xph,
        _conv_w_taps(params["w1"], cp),
        _vec_param(params["g1"], cp), _vec_param(params["beta1"], cp),
        _conv_w_taps(params["w2"], cp),
        _vec_param(params["g2"], cp), _vec_param(params["beta2"], cp),
    ]
    if has_down:
        inputs += [
            _conv_w_taps(params["wd"], cp)[0],
            _vec_param(params["gd"], cp), _vec_param(params["betad"], cp),
        ]
    # NOTE: conv biases (params["b*"]) are intentionally not passed: a bias
    # before train-mode BatchNorm is exactly cancelled by the mean subtraction.

    kernel = functools.partial(_residual_block_kernel, s, n, ho, wo, has_down)
    vmem = pl.BlockSpec(memory_space=pltpu.MemorySpace.VMEM)

    flops = 2 * m * cp * cp * (18 + (1 if has_down else 0))
    bytes_accessed = int(sum(a.size * a.dtype.itemsize for a in inputs)
                         + m * cp * 4)

    out = pl.pallas_call(
        kernel,
        out_shape=jax.ShapeDtypeStruct((m, cp), jnp.float32),
        in_specs=[vmem] * len(inputs),
        out_specs=vmem,
        scratch_shapes=[pltpu.VMEM((n, ho + 2, wo + 2, cp), jnp.bfloat16)],
        compiler_params=pltpu.CompilerParams(
            vmem_limit_bytes=32 * 1024 * 1024),
        cost_estimate=pl.CostEstimate(flops=flops, transcendentals=3 * cp,
                                      bytes_accessed=bytes_accessed),
    )(*inputs)

    out = out[:, :out_channel].reshape(n, ho, wo, out_channel)
    return jnp.transpose(out, (0, 3, 1, 2))                 # NHWC -> NCHW


# ----------------------------------------------------------------------------
# Pure-JAX reference (f32 lax conv, WITH the conv bias) for correctness check
# ----------------------------------------------------------------------------
def _conv_nchw(x, w, b, stride, padding):
    y = jax.lax.conv_general_dilated(
        x, w, (stride, stride), [(padding, padding), (padding, padding)],
        dimension_numbers=("NCHW", "OIHW", "NCHW"))
    return y + b.reshape(1, -1, 1, 1)


def _bn_train(x, gamma, beta):
    mean = x.mean(axis=(0, 2, 3), keepdims=True)
    var = jnp.square(x - mean).mean(axis=(0, 2, 3), keepdims=True)
    return (x - mean) * jax.lax.rsqrt(var + _EPS) * gamma.reshape(1, -1, 1, 1) \
        + beta.reshape(1, -1, 1, 1)


def residual_block_ref(x, p, in_c, out_c, stride):
    t = _bn_train(_conv_nchw(x, p["w1"], p["b1"], stride, 1), p["g1"], p["beta1"])
    t = jnp.maximum(t, 0.0)
    t = _bn_train(_conv_nchw(t, p["w2"], p["b2"], 1, 1), p["g2"], p["beta2"])
    if in_c != out_c or stride != 1:
        b = _bn_train(_conv_nchw(x, p["wd"], p["bd"], stride, 0), p["gd"], p["betad"])
    else:
        b = x
    return jnp.maximum(t + b, 0.0)


# ----------------------------------------------------------------------------
def make_params(key, in_c, out_c, has_down):
    ks = jax.random.split(key, 6)
    params = {
        "w1": 0.1 * jax.random.normal(ks[0], (out_c, in_c, 3, 3), jnp.float32),
        "b1": 0.1 * jax.random.normal(ks[1], (out_c,), jnp.float32),
        "g1": jnp.ones((out_c,), jnp.float32),
        "beta1": jnp.zeros((out_c,), jnp.float32),
        "w2": 0.1 * jax.random.normal(ks[2], (out_c, out_c, 3, 3), jnp.float32),
        "b2": 0.1 * jax.random.normal(ks[3], (out_c,), jnp.float32),
        "g2": jnp.ones((out_c,), jnp.float32),
        "beta2": jnp.zeros((out_c,), jnp.float32),
    }
    if has_down:
        params.update({
            "wd": 0.1 * jax.random.normal(ks[4], (out_c, in_c, 1, 1), jnp.float32),
            "bd": 0.1 * jax.random.normal(ks[5], (out_c,), jnp.float32),
            "gd": jnp.ones((out_c,), jnp.float32),
            "betad": jnp.zeros((out_c,), jnp.float32),
        })
    return params


if __name__ == "__main__":
    key = jax.random.PRNGKey(0)
    kx, kp1, kp2 = jax.random.split(key, 3)

    # Case 1: downsampling block (in_channel != out_channel, stride 2)
    x = jax.random.normal(kx, (2, 4, 16, 16), jnp.float32)  # NCHW
    params1 = make_params(kp1, 4, 8, has_down=True)
    out1 = residual_block_forward(x, params1, in_channel=4, out_channel=8, stride=2)
    jax.block_until_ready(out1)
    ref1 = residual_block_ref(x, params1, 4, 8, 2)
    assert out1.shape == (2, 8, 8, 8)
    # bf16 MXU inputs vs f32 reference -> widened tolerance (per review).
    assert jnp.allclose(out1, ref1, rtol=5e-2, atol=5e-2), (
        "downsample block mismatch, max abs err "
        f"{float(jnp.max(jnp.abs(out1 - ref1))):.3e}")

    # Case 2: identity block (in_channel == out_channel, stride 1)
    params2 = make_params(kp2, 8, 8, has_down=False)
    out2 = residual_block_forward(out1, params2, in_channel=8, out_channel=8, stride=1)
    jax.block_until_ready(out2)
    ref2 = residual_block_ref(out1, params2, 8, 8, 1)  # same input isolates per-block error
    assert out2.shape == (2, 8, 8, 8)
    assert jnp.allclose(out2, ref2, rtol=5e-2, atol=5e-2), (
        "identity block mismatch, max abs err "
        f"{float(jnp.max(jnp.abs(out2 - ref2))):.3e}")

    print("KERNEL_OK")
</pallas_src>

<mosaic_0001>
module attributes {stable_mosaic.version = 11 : i64} {
  func.func @_residual_block_kernel(%arg0: memref<8x9x9x128xbf16, #tpu.memory_space<vmem>>, %arg1: memref<9x128x128xbf16, #tpu.memory_space<vmem>>, %arg2: memref<1x128xf32, #tpu.memory_space<vmem>>, %arg3: memref<1x128xf32, #tpu.memory_space<vmem>>, %arg4: memref<9x128x128xbf16, #tpu.memory_space<vmem>>, %arg5: memref<1x128xf32, #tpu.memory_space<vmem>>, %arg6: memref<1x128xf32, #tpu.memory_space<vmem>>, %arg7: memref<128x128xbf16, #tpu.memory_space<vmem>>, %arg8: memref<1x128xf32, #tpu.memory_space<vmem>>, %arg9: memref<1x128xf32, #tpu.memory_space<vmem>>, %arg10: memref<128x128xf32, #tpu.memory_space<vmem>>, %arg11: memref<2x10x10x128xbf16, #tpu.memory_space<vmem>>) attributes {dimension_semantics = [], scalar_prefetch = 0 : i64, scratch_operands = 1 : i64, tpu.core_type = #tpu.core_type<tc>} {
    %c0 = arith.constant 0 : index
    %c0_0 = arith.constant 0 : index
    %c0_1 = arith.constant 0 : index
    %c0_2 = arith.constant 0 : index
    %0 = vector.load %arg0[%c0, %c0_0, %c0_1, %c0_2] : memref<8x9x9x128xbf16, #tpu.memory_space<vmem>>, vector<2x8x8x128xbf16>
    %1 = vector.shape_cast %0 : vector<2x8x8x128xbf16> to vector<128x128xbf16>
    %c0_3 = arith.constant 0 : index
    %c0_4 = arith.constant 0 : index
    %c0_5 = arith.constant 0 : index
    %2 = vector.load %arg1[%c0_3, %c0_4, %c0_5] : memref<9x128x128xbf16, #tpu.memory_space<vmem>>, vector<1x128x128xbf16>
    %3 = vector.shape_cast %2 : vector<1x128x128xbf16> to vector<128x128xbf16>
    %cst = arith.constant dense<0.000000e+00> : vector<128x128xf32>
    %4 = tpu.matmul %1, %3, %cst {dimension_numbers = #tpu.dot_dimension_numbers<[1], [0], [0], [1], [0, 0, 1, 1], [], []>} : vector<128x128xbf16>, vector<128x128xbf16>, vector<128x128xf32> -> vector<128x128xf32>
    %c2 = arith.constant 2 : index
    %c0_6 = arith.constant 0 : index
    %c0_7 = arith.constant 0 : index
    %c0_8 = arith.constant 0 : index
    %5 = vector.load %arg0[%c2, %c0_6, %c0_7, %c0_8] : memref<8x9x9x128xbf16, #tpu.memory_space<vmem>>, vector<2x8x8x128xbf16>
    %6 = vector.shape_cast %5 : vector<2x8x8x128xbf16> to vector<128x128xbf16>
    %c1 = arith.constant 1 : index
    %c0_9 = arith.constant 0 : index
    %c0_10 = arith.constant 0 : index
    %7 = vector.load %arg1[%c1, %c0_9, %c0_10] : memref<9x128x128xbf16, #tpu.memory_space<vmem>>, vector<1x128x128xbf16>
    %8 = vector.shape_cast %7 : vector<1x128x128xbf16> to vector<128x128xbf16>
    %cst_11 = arith.constant dense<0.000000e+00> : vector<128x128xf32>
    %9 = tpu.matmul %6, %8, %cst_11 {dimension_numbers = #tpu.dot_dimension_numbers<[1], [0], [0], [1], [0, 0, 1, 1], [], []>} : vector<128x128xbf16>, vector<128x128xbf16>, vector<128x128xf32> -> vector<128x128xf32>
    %10 = arith.addf %4, %9 : vector<128x128xf32>
    %c0_12 = arith.constant 0 : index
    %c0_13 = arith.constant 0 : index
    %c1_14 = arith.constant 1 : index
    %c0_15 = arith.constant 0 : index
    %11 = vector.load %arg0[%c0_12, %c0_13, %c1_14, %c0_15] : memref<8x9x9x128xbf16, #tpu.memory_space<vmem>>, vector<2x8x8x128xbf16>
    %12 = vector.shape_cast %11 : vector<2x8x8x128xbf16> to vector<128x128xbf16>
    %c2_16 = arith.constant 2 : index
    %c0_17 = arith.constant 0 : index
    %c0_18 = arith.constant 0 : index
    %13 = vector.load %arg1[%c2_16, %c0_17, %c0_18] : memref<9x128x128xbf16, #tpu.memory_space<vmem>>, vector<1x128x128xbf16>
    %14 = vector.shape_cast %13 : vector<1x128x128xbf16> to vector<128x128xbf16>
    %cst_19 = arith.constant dense<0.000000e+00> : vector<128x128xf32>
    %15 = tpu.matmul %12, %14, %cst_19 {dimension_numbers = #tpu.dot_dimension_numbers<[1], [0], [0], [1], [0, 0, 1, 1], [], []>} : vector<128x128xbf16>, vector<128x128xbf16>, vector<128x128xf32> -> vector<128x128xf32>
    %16 = arith.addf %10, %15 : vector<128x128xf32>
    %c4 = arith.constant 4 : index
    %c0_20 = arith.constant 0 : index
    %c0_21 = arith.constant 0 : index
    %c0_22 = arith.constant 0 : index
    %17 = vector.load %arg0[%c4, %c0_20, %c0_21, %c0_22] : memref<8x9x9x128xbf16, #tpu.memory_space<vmem>>, vector<2x8x8x128xbf16>
    %18 = vector.shape_cast %17 : vector<2x8x8x128xbf16> to vector<128x128xbf16>
    %c3 = arith.constant 3 : index
    %c0_23 = arith.constant 0 : index
    %c0_24 = arith.constant 0 : index
    %19 = vector.load %arg1[%c3, %c0_23, %c0_24] : memref<9x128x128xbf16, #tpu.memory_space<vmem>>, vector<1x128x128xbf16>
    %20 = vector.shape_cast %19 : vector<1x128x128xbf16> to vector<128x128xbf16>
    %cst_25 = arith.constant dense<0.000000e+00> : vector<128x128xf32>
    %21 = tpu.matmul %18, %20, %cst_25 {dimension_numbers = #tpu.dot_dimension_numbers<[1], [0], [0], [1], [0, 0, 1, 1], [], []>} : vector<128x128xbf16>, vector<128x128xbf16>, vector<128x128xf32> -> vector<128x128xf32>
    %22 = arith.addf %16, %21 : vector<128x128xf32>
    %c6 = arith.constant 6 : index
    %c0_26 = arith.constant 0 : index
    %c0_27 = arith.constant 0 : index
    %c0_28 = arith.constant 0 : index
    %23 = vector.load %arg0[%c6, %c0_26, %c0_27, %c0_28] : memref<8x9x9x128xbf16, #tpu.memory_space<vmem>>, vector<2x8x8x128xbf16>
    %24 = vector.shape_cast %23 : vector<2x8x8x128xbf16> to vector<128x128xbf16>
    %c4_29 = arith.constant 4 : index
    %c0_30 = arith.constant 0 : index
    %c0_31 = arith.constant 0 : index
    %25 = vector.load %arg1[%c4_29, %c0_30, %c0_31] : memref<9x128x128xbf16, #tpu.memory_space<vmem>>, vector<1x128x128xbf16>
    %26 = vector.shape_cast %25 : vector<1x128x128xbf16> to vector<128x128xbf16>
    %cst_32 = arith.constant dense<0.000000e+00> : vector<128x128xf32>
    %27 = tpu.matmul %24, %26, %cst_32 {dimension_numbers = #tpu.dot_dimension_numbers<[1], [0], [0], [1], [0, 0, 1, 1], [], []>} : vector<128x128xbf16>, vector<128x128xbf16>, vector<128x128xf32> -> vector<128x128xf32>
    %28 = arith.addf %22, %27 : vector<128x128xf32>
    %c4_33 = arith.constant 4 : index
    %c0_34 = arith.constant 0 : index
    %c1_35 = arith.constant 1 : index
    %c0_36 = arith.constant 0 : index
    %29 = vector.load %arg0[%c4_33, %c0_34, %c1_35, %c0_36] : memref<8x9x9x128xbf16, #tpu.memory_space<vmem>>, vector<2x8x8x128xbf16>
    %30 = vector.shape_cast %29 : vector<2x8x8x128xbf16> to vector<128x128xbf16>
    %c5 = arith.constant 5 : index
    %c0_37 = arith.constant 0 : index
    %c0_38 = arith.constant 0 : index
    %31 = vector.load %arg1[%c5, %c0_37, %c0_38] : memref<9x128x128xbf16, #tpu.memory_space<vmem>>, vector<1x128x128xbf16>
    %32 = vector.shape_cast %31 : vector<1x128x128xbf16> to vector<128x128xbf16>
    %cst_39 = arith.constant dense<0.000000e+00> : vector<128x128xf32>
    %33 = tpu.matmul %30, %32, %cst_39 {dimension_numbers = #tpu.dot_dimension_numbers<[1], [0], [0], [1], [0, 0, 1, 1], [], []>} : vector<128x128xbf16>, vector<128x128xbf16>, vector<128x128xf32> -> vector<128x128xf32>
    %34 = arith.addf %28, %33 : vector<128x128xf32>
    %c0_40 = arith.constant 0 : index
    %c1_41 = arith.constant 1 : index
    %c0_42 = arith.constant 0 : index
    %c0_43 = arith.constant 0 : index
    %35 = vector.load %arg0[%c0_40, %c1_41, %c0_42, %c0_43] : memref<8x9x9x128xbf16, #tpu.memory_space<vmem>>, vector<2x8x8x128xbf16>
    %36 = vector.shape_cast %35 : vector<2x8x8x128xbf16> to vector<128x128xbf16>
    %c6_44 = arith.constant 6 : index
    %c0_45 = arith.constant 0 : index
    %c0_46 = arith.constant 0 : index
    %37 = vector.load %arg1[%c6_44, %c0_45, %c0_46] : memref<9x128x128xbf16, #tpu.memory_space<vmem>>, vector<1x128x128xbf16>
    %38 = vector.shape_cast %37 : vector<1x128x128xbf16> to vector<128x128xbf16>
    %cst_47 = arith.constant dense<0.000000e+00> : vector<128x128xf32>
    %39 = tpu.matmul %36, %38, %cst_47 {dimension_numbers = #tpu.dot_dimension_numbers<[1], [0], [0], [1], [0, 0, 1, 1], [], []>} : vector<128x128xbf16>, vector<128x128xbf16>, vector<128x128xf32> -> vector<128x128xf32>
    %40 = arith.addf %34, %39 : vector<128x128xf32>
    %c2_48 = arith.constant 2 : index
    %c1_49 = arith.constant 1 : index
    %c0_50 = arith.constant 0 : index
    %c0_51 = arith.constant 0 : index
    %41 = vector.load %arg0[%c2_48, %c1_49, %c0_50, %c0_51] : memref<8x9x9x128xbf16, #tpu.memory_space<vmem>>, vector<2x8x8x128xbf16>
    %42 = vector.shape_cast %41 : vector<2x8x8x128xbf16> to vector<128x128xbf16>
    %c7 = arith.constant 7 : index
    %c0_52 = arith.constant 0 : index
    %c0_53 = arith.constant 0 : index
    %43 = vector.load %arg1[%c7, %c0_52, %c0_53] : memref<9x128x128xbf16, #tpu.memory_space<vmem>>, vector<1x128x128xbf16>
    %44 = vector.shape_cast %43 : vector<1x128x128xbf16> to vector<128x128xbf16>
    %cst_54 = arith.constant dense<0.000000e+00> : vector<128x128xf32>
    %45 = tpu.matmul %42, %44, %cst_54 {dimension_numbers = #tpu.dot_dimension_numbers<[1], [0], [0], [1], [0, 0, 1, 1], [], []>} : vector<128x128xbf16>, vector<128x128xbf16>, vector<128x128xf32> -> vector<128x128xf32>
    %46 = arith.addf %40, %45 : vector<128x128xf32>
    %c0_55 = arith.constant 0 : index
    %c1_56 = arith.constant 1 : index
    %c1_57 = arith.constant 1 : index
    %c0_58 = arith.constant 0 : index
    %47 = vector.load %arg0[%c0_55, %c1_56, %c1_57, %c0_58] : memref<8x9x9x128xbf16, #tpu.memory_space<vmem>>, vector<2x8x8x128xbf16>
    %48 = vector.shape_cast %47 : vector<2x8x8x128xbf16> to vector<128x128xbf16>
    %c8 = arith.constant 8 : index
    %c0_59 = arith.constant 0 : index
    %c0_60 = arith.constant 0 : index
    %49 = vector.load %arg1[%c8, %c0_59, %c0_60] : memref<9x128x128xbf16, #tpu.memory_space<vmem>>, vector<1x128x128xbf16>
    %50 = vector.shape_cast %49 : vector<1x128x128xbf16> to vector<128x128xbf16>
    %cst_61 = arith.constant dense<0.000000e+00> : vector<128x128xf32>
    %51 = tpu.matmul %48, %50, %cst_61 {dimension_numbers = #tpu.dot_dimension_numbers<[1], [0], [0], [1], [0, 0, 1, 1], [], []>} : vector<128x128xbf16>, vector<128x128xbf16>, vector<128x128xf32> -> vector<128x128xf32>
    %52 = arith.addf %46, %51 : vector<128x128xf32>
    %c0_62 = arith.constant 0 : index
    %c0_63 = arith.constant 0 : index
    %53 = vector.load %arg2[%c0_62, %c0_63] : memref<1x128xf32, #tpu.memory_space<vmem>>, vector<1x128xf32>
    %c0_64 = arith.constant 0 : index
    %c0_65 = arith.constant 0 : index
    %54 = vector.load %arg3[%c0_64, %c0_65] : memref<1x128xf32, #tpu.memory_space<vmem>>, vector<1x128xf32>
    %cst_66 = arith.constant dense<0.000000e+00> : vector<128xf32>
    %55 = vector.multi_reduction <add>, %52, %cst_66 [0] : vector<128x128xf32> to vector<128xf32>
    %56 = vector.shape_cast %55 : vector<128xf32> to vector<1x128xf32>
    %57 = arith.mulf %52, %52 : vector<128x128xf32>
    %cst_67 = arith.constant dense<0.000000e+00> : vector<128xf32>
    %58 = vector.multi_reduction <add>, %57, %cst_67 [0] : vector<128x128xf32> to vector<128xf32>
    %59 = vector.shape_cast %58 : vector<128xf32> to vector<1x128xf32>
    %cst_68 = arith.constant 7.812500e-03 : f32
    %60 = vector.broadcast %cst_68 : f32 to vector<1x128xf32>
    %61 = arith.mulf %56, %60 : vector<1x128xf32>
    %cst_69 = arith.constant 7.812500e-03 : f32
    %62 = vector.broadcast %cst_69 : f32 to vector<1x128xf32>
    %63 = arith.mulf %59, %62 : vector<1x128xf32>
    %64 = arith.mulf %61, %61 : vector<1x128xf32>
    %65 = arith.subf %63, %64 : vector<1x128xf32>
    %cst_70 = arith.constant 0.000000e+00 : f32
    %66 = vector.broadcast %cst_70 : f32 to vector<1x128xf32>
    %67 = arith.maximumf %65, %66 : vector<1x128xf32>
    %cst_71 = arith.constant 9.99999974E-6 : f32
    %68 = vector.broadcast %cst_71 : f32 to vector<1x128xf32>
    %69 = arith.addf %67, %68 : vector<1x128xf32>
    %70 = math.rsqrt %69 : vector<1x128xf32>
    %71 = arith.mulf %53, %70 : vector<1x128xf32>
    %72 = arith.mulf %61, %71 : vector<1x128xf32>
    %73 = arith.subf %54, %72 : vector<1x128xf32>
    %74 = vector.broadcast %71 : vector<1x128xf32> to vector<128x128xf32>
    %75 = arith.mulf %52, %74 : vector<128x128xf32>
    %76 = vector.broadcast %73 : vector<1x128xf32> to vector<128x128xf32>
    %77 = arith.addf %75, %76 : vector<128x128xf32>
    %cst_72 = arith.constant 0.000000e+00 : f32
    %78 = vector.broadcast %cst_72 : f32 to vector<128x128xf32>
    %79 = arith.maximumf %77, %78 : vector<128x128xf32>
    %cst_73 = arith.constant 0.000000e+00 : bf16
    %80 = vector.broadcast %cst_73 : bf16 to vector<2x10x10x128xbf16>
    %c0_74 = arith.constant 0 : index
    %c0_75 = arith.constant 0 : index
    %c0_76 = arith.constant 0 : index
    %c0_77 = arith.constant 0 : index
    %81 = vector.load %arg11[%c0_74, %c0_75, %c0_76, %c0_77] : memref<2x10x10x128xbf16, #tpu.memory_space<vmem>>, vector<2x10x10x128xbf16>
    tpu.vector_store %arg11[%c0_74, %c0_75, %c0_76, %c0_77], %80 {strides = array<i32>} : memref<2x10x10x128xbf16, #tpu.memory_space<vmem>>, vector<2x10x10x128xbf16>,
    %82 = vector.shape_cast %79 : vector<128x128xf32> to vector<2x8x8x128xf32>
    %83 = arith.truncf %82 : vector<2x8x8x128xf32> to vector<2x8x8x128xbf16>
    %c0_78 = arith.constant 0 : index
    %c1_79 = arith.constant 1 : index
    %c1_80 = arith.constant 1 : index
    %c0_81 = arith.constant 0 : index
    %84 = vector.load %arg11[%c0_78, %c1_79, %c1_80, %c0_81] : memref<2x10x10x128xbf16, #tpu.memory_space<vmem>>, vector<2x8x8x128xbf16>
    tpu.vector_store %arg11[%c0_78, %c1_79, %c1_80, %c0_81], %83 {strides = array<i32>} : memref<2x10x10x128xbf16, #tpu.memory_space<vmem>>, vector<2x8x8x128xbf16>,
    %c0_82 = arith.constant 0 : index
    %c0_83 = arith.constant 0 : index
    %c0_84 = arith.constant 0 : index
    %c0_85 = arith.constant 0 : index
    %85 = vector.load %arg11[%c0_82, %c0_83, %c0_84, %c0_85] : memref<2x10x10x128xbf16, #tpu.memory_space<vmem>>, vector<2x8x8x128xbf16>
    %86 = vector.shape_cast %85 : vector<2x8x8x128xbf16> to vector<128x128xbf16>
    %c0_86 = arith.constant 0 : index
    %c0_87 = arith.constant 0 : index
    %c0_88 = arith.constant 0 : index
    %87 = vector.load %arg4[%c0_86, %c0_87, %c0_88] : memref<9x128x128xbf16, #tpu.memory_space<vmem>>, vector<1x128x128xbf16>
    %88 = vector.shape_cast %87 : vector<1x128x128xbf16> to vector<128x128xbf16>
    %cst_89 = arith.constant dense<0.000000e+00> : vector<128x128xf32>
    %89 = tpu.matmul %86, %88, %cst_89 {dimension_numbers = #tpu.dot_dimension_numbers<[1], [0], [0], [1], [0, 0, 1, 1], [], []>} : vector<128x128xbf16>, vector<128x128xbf16>, vector<128x128xf32> -> vector<128x128xf32>
    %c0_90 = arith.constant 0 : index
    %c0_91 = arith.constant 0 : index
    %c1_92 = arith.constant 1 : index
    %c0_93 = arith.constant 0 : index
    %90 = vector.load %arg11[%c0_90, %c0_91, %c1_92, %c0_93] : memref<2x10x10x128xbf16, #tpu.memory_space<vmem>>, vector<2x8x8x128xbf16>
    %91 = vector.shape_cast %90 : vector<2x8x8x128xbf16> to vector<128x128xbf16>
    %c1_94 = arith.constant 1 : index
    %c0_95 = arith.constant 0 : index
    %c0_96 = arith.constant 0 : index
    %92 = vector.load %arg4[%c1_94, %c0_95, %c0_96] : memref<9x128x128xbf16, #tpu.memory_space<vmem>>, vector<1x128x128xbf16>
    %93 = vector.shape_cast %92 : vector<1x128x128xbf16> to vector<128x128xbf16>
    %cst_97 = arith.constant dense<0.000000e+00> : vector<128x128xf32>
    %94 = tpu.matmul %91, %93, %cst_97 {dimension_numbers = #tpu.dot_dimension_numbers<[1], [0], [0], [1], [0, 0, 1, 1], [], []>} : vector<128x128xbf16>, vector<128x128xbf16>, vector<128x128xf32> -> vector<128x128xf32>
    %95 = arith.addf %89, %94 : vector<128x128xf32>
    %c0_98 = arith.constant 0 : index
    %c0_99 = arith.constant 0 : index
    %c2_100 = arith.constant 2 : index
    %c0_101 = arith.constant 0 : index
    %96 = vector.load %arg11[%c0_98, %c0_99, %c2_100, %c0_101] : memref<2x10x10x128xbf16, #tpu.memory_space<vmem>>, vector<2x8x8x128xbf16>
    %97 = vector.shape_cast %96 : vector<2x8x8x128xbf16> to vector<128x128xbf16>
    %c2_102 = arith.constant 2 : index
    %c0_103 = arith.constant 0 : index
    %c0_104 = arith.constant 0 : index
    %98 = vector.load %arg4[%c2_102, %c0_103, %c0_104] : memref<9x128x128xbf16, #tpu.memory_space<vmem>>, vector<1x128x128xbf16>
    %99 = vector.shape_cast %98 : vector<1x128x128xbf16> to vector<128x128xbf16>
    %cst_105 = arith.constant dense<0.000000e+00> : vector<128x128xf32>
    %100 = tpu.matmul %97, %99, %cst_105 {dimension_numbers = #tpu.dot_dimension_numbers<[1], [0], [0], [1], [0, 0, 1, 1], [], []>} : vector<128x128xbf16>, vector<128x128xbf16>, vector<128x128xf32> -> vector<128x128xf32>
    %101 = arith.addf %95, %100 : vector<128x128xf32>
    %c0_106 = arith.constant 0 : index
    %c1_107 = arith.constant 1 : index
    %c0_108 = arith.constant 0 : index
    %c0_109 = arith.constant 0 : index
    %102 = vector.load %arg11[%c0_106, %c1_107, %c0_108, %c0_109] : memref<2x10x10x128xbf16, #tpu.memory_space<vmem>>, vector<2x8x8x128xbf16>
    %103 = vector.shape_cast %102 : vector<2x8x8x128xbf16> to vector<128x128xbf16>
    %c3_110 = arith.constant 3 : index
    %c0_111 = arith.constant 0 : index
    %c0_112 = arith.constant 0 : index
    %104 = vector.load %arg4[%c3_110, %c0_111, %c0_112] : memref<9x128x128xbf16, #tpu.memory_space<vmem>>, vector<1x128x128xbf16>
    %105 = vector.shape_cast %104 : vector<1x128x128xbf16> to vector<128x128xbf16>
    %cst_113 = arith.constant dense<0.000000e+00> : vector<128x128xf32>
    %106 = tpu.matmul %103, %105, %cst_113 {dimension_numbers = #tpu.dot_dimension_numbers<[1], [0], [0], [1], [0, 0, 1, 1], [], []>} : vector<128x128xbf16>, vector<128x128xbf16>, vector<128x128xf32> -> vector<128x128xf32>
    %107 = arith.addf %101, %106 : vector<128x128xf32>
    %c0_114 = arith.constant 0 : index
    %c1_115 = arith.constant 1 : index
    %c1_116 = arith.constant 1 : index
    %c0_117 = arith.constant 0 : index
    %108 = vector.load %arg11[%c0_114, %c1_115, %c1_116, %c0_117] : memref<2x10x10x128xbf16, #tpu.memory_space<vmem>>, vector<2x8x8x128xbf16>
    %109 = vector.shape_cast %108 : vector<2x8x8x128xbf16> to vector<128x128xbf16>
    %c4_118 = arith.constant 4 : index
    %c0_119 = arith.constant 0 : index
    %c0_120 = arith.constant 0 : index
    %110 = vector.load %arg4[%c4_118, %c0_119, %c0_120] : memref<9x128x128xbf16, #tpu.memory_space<vmem>>, vector<1x128x128xbf16>
    %111 = vector.shape_cast %110 : vector<1x128x128xbf16> to vector<128x128xbf16>
    %cst_121 = arith.constant dense<0.000000e+00> : vector<128x128xf32>
    %112 = tpu.matmul %109, %111, %cst_121 {dimension_numbers = #tpu.dot_dimension_numbers<[1], [0], [0], [1], [0, 0, 1, 1], [], []>} : vector<128x128xbf16>, vector<128x128xbf16>, vector<128x128xf32> -> vector<128x128xf32>
    %113 = arith.addf %107, %112 : vector<128x128xf32>
    %c0_122 = arith.constant 0 : index
    %c1_123 = arith.constant 1 : index
    %c2_124 = arith.constant 2 : index
    %c0_125 = arith.constant 0 : index
    %114 = vector.load %arg11[%c0_122, %c1_123, %c2_124, %c0_125] : memref<2x10x10x128xbf16, #tpu.memory_space<vmem>>, vector<2x8x8x128xbf16>
    %115 = vector.shape_cast %114 : vector<2x8x8x128xbf16> to vector<128x128xbf16>
    %c5_126 = arith.constant 5 : index
    %c0_127 = arith.constant 0 : index
    %c0_128 = arith.constant 0 : index
    %116 = vector.load %arg4[%c5_126, %c0_127, %c0_128] : memref<9x128x128xbf16, #tpu.memory_space<vmem>>, vector<1x128x128xbf16>
    %117 = vector.shape_cast %116 : vector<1x128x128xbf16> to vector<128x128xbf16>
    %cst_129 = arith.constant dense<0.000000e+00> : vector<128x128xf32>
    %118 = tpu.matmul %115, %117, %cst_129 {dimension_numbers = #tpu.dot_dimension_numbers<[1], [0], [0], [1], [0, 0, 1, 1], [], []>} : vector<128x128xbf16>, vector<128x128xbf16>, vector<128x128xf32> -> vector<128x128xf32>
    %119 = arith.addf %113, %118 : vector<128x128xf32>
    %c0_130 = arith.constant 0 : index
    %c2_131 = arith.constant 2 : index
    %c0_132 = arith.constant 0 : index
    %c0_133 = arith.constant 0 : index
    %120 = vector.load %arg11[%c0_130, %c2_131, %c0_132, %c0_133] : memref<2x10x10x128xbf16, #tpu.memory_space<vmem>>, vector<2x8x8x128xbf16>
    %121 = vector.shape_cast %120 : vector<2x8x8x128xbf16> to vector<128x128xbf16>
    %c6_134 = arith.constant 6 : index
    %c0_135 = arith.constant 0 : index
    %c0_136 = arith.constant 0 : index
    %122 = vector.load %arg4[%c6_134, %c0_135, %c0_136] : memref<9x128x128xbf16, #tpu.memory_space<vmem>>, vector<1x128x128xbf16>
    %123 = vector.shape_cast %122 : vector<1x128x128xbf16> to vector<128x128xbf16>
    %cst_137 = arith.constant dense<0.000000e+00> : vector<128x128xf32>
    %124 = tpu.matmul %121, %123, %cst_137 {dimension_numbers = #tpu.dot_dimension_numbers<[1], [0], [0], [1], [0, 0, 1, 1], [], []>} : vector<128x128xbf16>, vector<128x128xbf16>, vector<128x128xf32> -> vector<128x128xf32>
    %125 = arith.addf %119, %124 : vector<128x128xf32>
    %c0_138 = arith.constant 0 : index
    %c2_139 = arith.constant 2 : index
    %c1_140 = arith.constant 1 : index
    %c0_141 = arith.constant 0 : index
    %126 = vector.load %arg11[%c0_138, %c2_139, %c1_140, %c0_141] : memref<2x10x10x128xbf16, #tpu.memory_space<vmem>>, vector<2x8x8x128xbf16>
    %127 = vector.shape_cast %126 : vector<2x8x8x128xbf16> to vector<128x128xbf16>
    %c7_142 = arith.constant 7 : index
    %c0_143 = arith.constant 0 : index
    %c0_144 = arith.constant 0 : index
    %128 = vector.load %arg4[%c7_142, %c0_143, %c0_144] : memref<9x128x128xbf16, #tpu.memory_space<vmem>>, vector<1x128x128xbf16>
    %129 = vector.shape_cast %128 : vector<1x128x128xbf16> to vector<128x128xbf16>
    %cst_145 = arith.constant dense<0.000000e+00> : vector<128x128xf32>
    %130 = tpu.matmul %127, %129, %cst_145 {dimension_numbers = #tpu.dot_dimension_numbers<[1], [0], [0], [1], [0, 0, 1, 1], [], []>} : vector<128x128xbf16>, vector<128x128xbf16>, vector<128x128xf32> -> vector<128x128xf32>
    %131 = arith.addf %125, %130 : vector<128x128xf32>
    %c0_146 = arith.constant 0 : index
    %c2_147 = arith.constant 2 : index
    %c2_148 = arith.constant 2 : index
    %c0_149 = arith.constant 0 : index
    %132 = vector.load %arg11[%c0_146, %c2_147, %c2_148, %c0_149] : memref<2x10x10x128xbf16, #tpu.memory_space<vmem>>, vector<2x8x8x128xbf16>
    %133 = vector.shape_cast %132 : vector<2x8x8x128xbf16> to vector<128x128xbf16>
    %c8_150 = arith.constant 8 : index
    %c0_151 = arith.constant 0 : index
    %c0_152 = arith.constant 0 : index
    %134 = vector.load %arg4[%c8_150, %c0_151, %c0_152] : memref<9x128x128xbf16, #tpu.memory_space<vmem>>, vector<1x128x128xbf16>
    %135 = vector.shape_cast %134 : vector<1x128x128xbf16> to vector<128x128xbf16>
    %cst_153 = arith.constant dense<0.000000e+00> : vector<128x128xf32>
    %136 = tpu.matmul %133, %135, %cst_153 {dimension_numbers = #tpu.dot_dimension_numbers<[1], [0], [0], [1], [0, 0, 1, 1], [], []>} : vector<128x128xbf16>, vector<128x128xbf16>, vector<128x128xf32> -> vector<128x128xf32>
    %137 = arith.addf %131, %136 : vector<128x128xf32>
    %c0_154 = arith.constant 0 : index
    %c0_155 = arith.constant 0 : index
    %138 = vector.load %arg5[%c0_154, %c0_155] : memref<1x128xf32, #tpu.memory_space<vmem>>, vector<1x128xf32>
    %c0_156 = arith.constant 0 : index
    %c0_157 = arith.constant 0 : index
    %139 = vector.load %arg6[%c0_156, %c0_157] : memref<1x128xf32, #tpu.memory_space<vmem>>, vector<1x128xf32>
    %cst_158 = arith.constant dense<0.000000e+00> : vector<128xf32>
    %140 = vector.multi_reduction <add>, %137, %cst_158 [0] : vector<128x128xf32> to vector<128xf32>
    %141 = vector.shape_cast %140 : vector<128xf32> to vector<1x128xf32>
    %142 = arith.mulf %137, %137 : vector<128x128xf32>
    %cst_159 = arith.constant dense<0.000000e+00> : vector<128xf32>
    %143 = vector.multi_reduction <add>, %142, %cst_159 [0] : vector<128x128xf32> to vector<128xf32>
    %144 = vector.shape_cast %143 : vector<128xf32> to vector<1x128xf32>
    %cst_160 = arith.constant 7.812500e-03 : f32
    %145 = vector.broadcast %cst_160 : f32 to vector<1x128xf32>
    %146 = arith.mulf %141, %145 : vector<1x128xf32>
    %cst_161 = arith.constant 7.812500e-03 : f32
    %147 = vector.broadcast %cst_161 : f32 to vector<1x128xf32>
    %148 = arith.mulf %144, %147 : vector<1x128xf32>
    %149 = arith.mulf %146, %146 : vector<1x128xf32>
    %150 = arith.subf %148, %149 : vector<1x128xf32>
    %cst_162 = arith.constant 0.000000e+00 : f32
    %151 = vector.broadcast %cst_162 : f32 to vector<1x128xf32>
    %152 = arith.maximumf %150, %151 : vector<1x128xf32>
    %cst_163 = arith.constant 9.99999974E-6 : f32
    %153 = vector.broadcast %cst_163 : f32 to vector<1x128xf32>
    %154 = arith.addf %152, %153 : vector<1x128xf32>
    %155 = math.rsqrt %154 : vector<1x128xf32>
    %156 = arith.mulf %138, %155 : vector<1x128xf32>
    %157 = arith.mulf %146, %156 : vector<1x128xf32>
    %158 = arith.subf %139, %157 : vector<1x128xf32>
    %159 = vector.broadcast %156 : vector<1x128xf32> to vector<128x128xf32>
    %160 = arith.mulf %137, %159 : vector<128x128xf32>
    %161 = vector.broadcast %158 : vector<1x128xf32> to vector<128x128xf32>
    %162 = arith.addf %160, %161 : vector<128x128xf32>
    %c6_164 = arith.constant 6 : index
    %c0_165 = arith.constant 0 : index
    %c0_166 = arith.constant 0 : index
    %c0_167 = arith.constant 0 : index
    %163 = vector.load %arg0[%c6_164, %c0_165, %c0_166, %c0_167] : memref<8x9x9x128xbf16, #tpu.memory_space<vmem>>, vector<2x8x8x128xbf16>
    %164 = vector.shape_cast %163 : vector<2x8x8x128xbf16> to vector<128x128xbf16>
    %c0_168 = arith.constant 0 : index
    %c0_169 = arith.constant 0 : index
    %165 = vector.load %arg7[%c0_168, %c0_169] : memref<128x128xbf16, #tpu.memory_space<vmem>>, vector<128x128xbf16>
    %cst_170 = arith.constant dense<0.000000e+00> : vector<128x128xf32>
    %166 = tpu.matmul %164, %165, %cst_170 {dimension_numbers = #tpu.dot_dimension_numbers<[1], [0], [0], [1], [0, 0, 1, 1], [], []>} : vector<128x128xbf16>, vector<128x128xbf16>, vector<128x128xf32> -> vector<128x128xf32>
    %c0_171 = arith.constant 0 : index
    %c0_172 = arith.constant 0 : index
    %167 = vector.load %arg8[%c0_171, %c0_172] : memref<1x128xf32, #tpu.memory_space<vmem>>, vector<1x128xf32>
    %c0_173 = arith.constant 0 : index
    %c0_174 = arith.constant 0 : index
    %168 = vector.load %arg9[%c0_173, %c0_174] : memref<1x128xf32, #tpu.memory_space<vmem>>, vector<1x128xf32>
    %cst_175 = arith.constant dense<0.000000e+00> : vector<128xf32>
    %169 = vector.multi_reduction <add>, %166, %cst_175 [0] : vector<128x128xf32> to vector<128xf32>
    %170 = vector.shape_cast %169 : vector<128xf32> to vector<1x128xf32>
    %171 = arith.mulf %166, %166 : vector<128x128xf32>
    %cst_176 = arith.constant dense<0.000000e+00> : vector<128xf32>
    %172 = vector.multi_reduction <add>, %171, %cst_176 [0] : vector<128x128xf32> to vector<128xf32>
    %173 = vector.shape_cast %172 : vector<128xf32> to vector<1x128xf32>
    %cst_177 = arith.constant 7.812500e-03 : f32
    %174 = vector.broadcast %cst_177 : f32 to vector<1x128xf32>
    %175 = arith.mulf %170, %174 : vector<1x128xf32>
    %cst_178 = arith.constant 7.812500e-03 : f32
    %176 = vector.broadcast %cst_178 : f32 to vector<1x128xf32>
    %177 = arith.mulf %173, %176 : vector<1x128xf32>
    %178 = arith.mulf %175, %175 : vector<1x128xf32>
    %179 = arith.subf %177, %178 : vector<1x128xf32>
    %cst_179 = arith.constant 0.000000e+00 : f32
    %180 = vector.broadcast %cst_179 : f32 to vector<1x128xf32>
    %181 = arith.maximumf %179, %180 : vector<1x128xf32>
    %cst_180 = arith.constant 9.99999974E-6 : f32
    %182 = vector.broadcast %cst_180 : f32 to vector<1x128xf32>
    %183 = arith.addf %181, %182 : vector<1x128xf32>
    %184 = math.rsqrt %183 : vector<1x128xf32>
    %185 = arith.mulf %167, %184 : vector<1x128xf32>
    %186 = arith.mulf %175, %185 : vector<1x128xf32>
    %187 = arith.subf %168, %186 : vector<1x128xf32>
    %188 = vector.broadcast %185 : vector<1x128xf32> to vector<128x128xf32>
    %189 = arith.mulf %166, %188 : vector<128x128xf32>
    %190 = vector.broadcast %187 : vector<1x128xf32> to vector<128x128xf32>
    %191 = arith.addf %189, %190 : vector<128x128xf32>
    %192 = arith.addf %162, %191 : vector<128x128xf32>
    %cst_181 = arith.constant 0.000000e+00 : f32
    %193 = vector.broadcast %cst_181 : f32 to vector<128x128xf32>
    %194 = arith.maximumf %192, %193 : vector<128x128xf32>
    %c0_182 = arith.constant 0 : index
    %c0_183 = arith.constant 0 : index
    %195 = vector.load %arg10[%c0_182, %c0_183] : memref<128x128xf32, #tpu.memory_space<vmem>>, vector<128x128xf32>
    tpu.vector_store %arg10[%c0_182, %c0_183], %194 {strides = array<i32>} : memref<128x128xf32, #tpu.memory_space<vmem>>, vector<128x128xf32>,
    return
  }
}

</mosaic_0001>

<bundles_post_ra>
// kernel: tpu_custom_call.1
= control target key start
LH: loop header
LB: loop body
LE: loop exit
PB: predicated region body
PF: predicated region fallthrough
CT: control target
= control target key end

     0   :  { %15 = vsyncpa [#allocation4], 0  ;;  %s11285_s0 = inlined_call_operand.vmem [shape: bf16[8,9,9,128], index: 0, kind: input, shape index: {}]   ;;  %s11286_s1 = inlined_call_operand.vmem [shape: bf16[9,128,128], index: 1, kind: input, shape index: {}]   ;;  %s11287_s2 = inlined_call_operand.vmem [shape: f32[1,128], index: 2, kind: input, shape index: {}]   ;;  %s11288_s3 = inlined_call_operand.vmem [shape: f32[1,128], index: 3, kind: input, shape index: {}]   ;;  %s11289_s4 = inlined_call_operand.hbm [shape: bf16[9,128,128], index: 4, kind: input, shape index: {}]   ;;  %s11290_s5 = inlined_call_operand.vmem [shape: f32[1,128], index: 5, kind: input, shape index: {}]   ;;  %s11291_s6 = inlined_call_operand.vmem [shape: f32[1,128], index: 6, kind: input, shape index: {}]   ;;  %s11292_s7 = inlined_call_operand.vmem [shape: bf16[128,128], index: 7, kind: input, shape index: {}]   ;;  %s11293_s8 = inlined_call_operand.vmem [shape: f32[1,128], index: 8, kind: input, shape index: {}]   ;;  %s11294_s9 = inlined_call_operand.vmem [shape: f32[1,128], index: 9, kind: input, shape index: {}]   ;;  %s11295_s10 = inlined_call_operand.hbm [shape: f32[128,128], index: 10, kind: output, shape index: {}]  }
   0x1   :  { %16 = vsyncpa [#allocation5], 0  ;;  %s8825_s13 = smov [#allocation3]  }
   0x2   :  { %s30_s14 = sshll.u32 %s8825_s13, 4  ;;  %s31_s14 = int_to_ptr.vmem [resolvable:$true] %s30_s14 }
   0x3   :  { %s8789_s15 = scalar_lea.vmem %s31_s14, 9216  ;;  %p8794_p1 = scmp.lt.s32.totalorder %s31_s14, %s31_s14 }
   0x4   :  { %p8790_p0 = scmp.ne.s32.totalorder %s31_s14, %s8789_s15  ;;  %p8795_p2 = scmp.lt.s32.totalorder %s8789_s15, %s8789_s15 }
   0x6   :  { %p8796_p3 = por %p8795_p2, %p8794_p1 }
   0x8   :  { %p8797_p4 = pnand %p8796_p3, %p8790_p0 }
   0xa   :  { %8800 = shalt.err (!%p8797_p4)
}
   0xb   :  { %s8826_s16 = smov 64   ;;  %s8827_s17 = smov 4  }
   0xc   :  { %36 = dma.hbm_to_vmem [thread:$0]  %s11289_s4, 9216, %s31_s14, [#allocation4], %s8826_s16, %s8826_s16, %s8827_s17  }
   0xd   :  { %8821 = dma.done.wait [#allocation4], 9216  }
   0xe   :  { %8822 = vsyncadd [#allocation4], 4294958080  ;;  %v8543_v0 = vld [vmem:[%s11286_s1 + $0x78] sm:$0xff]   ;;  %v8545_v2 = vld [vmem:[%s11286_s1 + $0x70] sm:$0xff]   ;;  %vm535_vm0 = vsmask.f32 3328 }
   0xf   :  { %v8544_v1 = vld [vmem:[%s11286_s1 + $0x38] sm:$0xff]   ;;  %7912 = vmatprep.subr.bf16.mxu0 %v8543_v0  ;;  %v8546_v3 = vld [vmem:[%s11286_s1 + $0x30] sm:$0xff]   ;;  %v8547_v4 = vld [vmem:[%s11286_s1 + $0x68] sm:$0xff]   ;;  %vm536_vm1 = vsmask.f32 7440  ;;  %vm4080_vm3 = vcmask 1042432  }
  0x10   :  { %7944 = vmatprep.subr.bf16.mxu1 %v8544_v1  ;;  %7913 = vmatpush3.bf16.msra.mxu0 %v8543_v0  ;;  %v8548_v5 = vld [vmem:[%s11286_s1 + $0x28] sm:$0xff]   ;;  %v8549_v6 = vld [vmem:[%s11286_s1 + $0x60] sm:$0xff]   ;;  %v8551_v8 = vld [vmem:[%s11286_s1 + $0x58] sm:$0xff]   ;;  %vm4081_vm4 = vcmask 1046532   ;;  %vm3271_vm6 = vcmask 1043456   ;;  %vm3277_vm8 = vcmask 1040384  }
  0x11   :  { %7945 = vmatpush3.bf16.msra.mxu1 %v8544_v1  ;;  %7914 = vmatprep.subr.bf16.mxu0 %v8545_v2  ;;  %v8550_v7 = vld [vmem:[%s11286_s1 + $0x20] sm:$0xff]   ;;  %v8552_v9 = vld [vmem:[%s11286_s1 + $0x18] sm:$0xff]   ;;  %v8553_v10 = vld [vmem:[%s11286_s1 + $0x50] sm:$0xff]   ;;  %vm3272_vm7 = vsmask.f32 7938 }
  0x12   :  { %7946 = vmatprep.subr.bf16.mxu1 %v8546_v3  ;;  %v8554_v11 = vld [vmem:[%s11286_s1 + $0x10] sm:$0xff]   ;;  %v8560_v13 = vld [vmem:[%s11285_s0] ss:$8 sps:$4 sm:$0xff]   ;;  %v8563_v19 = vld [vmem:[%s11286_s1 + $0xb8] sm:$0xff]   ;;  %vm3278_vm9 = vsmask.f32 256 }
  0x13   :  { %v8559_v12 = vld [vmem:[%s11285_s0 + $0x90] ss:$8 sps:$4 sm:$0xff]   ;;  %7960 = vmatprep.mubr.bf16.mxu1 %v8560_v13  ;;  %v8555_v14 = vld [vmem:[%s11286_s1 + $0x48] sm:$0xff]   ;;  %v8557_v16 = vld [vmem:[%s11286_s1 + $0x40] sm:$0xff]  }
  0x14   :  { %7915 = vmatpush3.bf16.msra.mxu0 %v8545_v2  ;;  %7928 = vmatprep.mubr.bf16.mxu0 %v8559_v12  ;;  %v8556_v15 = vld [vmem:[%s11286_s1 + $0x8] sm:$0xff]   ;;  %v8558_v17 = vld [vmem:[%s11286_s1] sm:$0xff]   ;;  %v8564_v20 = vld [vmem:[%s11286_s1 + $0xf8] sm:$0xff]  }
  0x15   :  { %7947 = vmatpush3.bf16.msra.mxu1 %v8546_v3  ;;  %7916 = vmatprep.subr.bf16.mxu0 %v8547_v4  ;;  %v8561_v18 = vld [vmem:[%s11285_s0 + $0xa0] ss:$8 sps:$4 sm:$0xff]   ;;  %v8562_v21 = vld [vmem:[%s11285_s0 + $0x10] ss:$8 sps:$4 sm:$0xff]   ;;  %v504_v43 = vld [vmem:[%s11285_s0 + $0x4] sm:$0x1] }
  0x16   :  { %7948 = vmatprep.subr.bf16.mxu1 %v8548_v5  ;;  %v8565_v22 = vld [vmem:[%s11286_s1 + $0xb0] sm:$0xff]   ;;  %v8568_v25 = vld [vmem:[%s11285_s0 + $0x20] ss:$8 sps:$4 sm:$0xff]   ;;  %v8579_v35 = vld [vmem:[%s11286_s1 + $0x98] sm:$0xff]   ;;  %v548_v48 = vshll.u32 %v504_v43, 16 }
  0x17   :  { %v8566_v23 = vld [vmem:[%s11286_s1 + $0xf0] sm:$0xff]   ;;  %v8569_v26 = vld [vmem:[%s11285_s0 + $0xc0] ss:$8 sps:$4 sm:$0xff]   ;;  %v8580_v37 = vld [vmem:[%s11286_s1 + $0xd8] sm:$0xff]  }
  0x18   :  { %7917 = vmatpush3.bf16.msra.mxu0 %v8547_v4  ;;  %v8567_v24 = vld [vmem:[%s11285_s0 + $0xb0] ss:$8 sps:$4 sm:$0xff]   ;;  %v8571_v27 = vld [vmem:[%s11286_s1 + $0xa8] sm:$0xff]   ;;  %v8573_v30 = vld [vmem:[%s11286_s1 + $0xa0] sm:$0xff]   ;;  %v550_v57 = vrot.slane %v548_v48, 5 }
  0x19   :  { %7949 = vmatpush3.bf16.msra.mxu1 %v8548_v5  ;;  %7918 = vmatprep.subr.bf16.mxu0 %v8549_v6  ;;  %v8572_v28 = vld [vmem:[%s11286_s1 + $0xe8] sm:$0xff]   ;;  %v8570_v29 = vld [vmem:[%s11285_s0 + $0x30] ss:$8 sps:$4 sm:$0xff]   ;;  %v8574_v31 = vld [vmem:[%s11286_s1 + $0xe0] sm:$0xff]  }
  0x1a   :  { %7950 = vmatprep.subr.bf16.mxu1 %v8550_v7  ;;  %v8575_v32 = vld [vmem:[%s11285_s0 + $0xd8] ss:$8 sps:$4 sm:$0xff]   ;;  %v8576_v33 = vld [vmem:[%s11285_s0 + $0x48] ss:$8 sps:$4 sm:$0xff]   ;;  %v506_v45 = vld [vmem:[%s11285_s0 + $0xc] sm:$0x1] }
  0x1b   :  { %v8577_v34 = vld [vmem:[%s11285_s0 + $0xe8] ss:$8 sps:$4 sm:$0xff]   ;;  %v8578_v36 = vld [vmem:[%s11285_s0 + $0x58] ss:$8 sps:$4 sm:$0xff]   ;;  %v562_v52 = vshll.u32 %v506_v45, 16  ;;  %vm9054_vm2 = vmor %vm535_vm0, %vm536_vm1 }
  0x1c   :  { %7919 = vmatpush3.bf16.msra.mxu0 %v8549_v6  ;;  %v8581_v38 = vld [vmem:[%s11286_s1 + $0x90] sm:$0xff]   ;;  %v8583_v40 = vld [vmem:[%s11285_s0 + $0xf8] ss:$8 sps:$4 sm:$0xff]   ;;  %v505_v44 = vld [vmem:[%s11285_s0 + $0x8] sm:$0xf] }
  0x1d   :  { %7951 = vmatpush3.bf16.msra.mxu1 %v8550_v7  ;;  %7920 = vmatprep.subr.bf16.mxu0 %v8551_v8  ;;  %v8582_v39 = vld [vmem:[%s11286_s1 + $0xd0] sm:$0xff]   ;;  %v503_v42 = vld [vmem:[%s11285_s0] sm:$0xf]  ;;  %v553_v49 = vshrl.u32 %v505_v44, 16  ;;  %v8587_v50 = vld [vmem:[%s11286_s1 + $0x88] sm:$0xff]   ;;  %v556_v51 = vshll.u32 %v505_v44, 16 }
  0x1e   :  { %7952 = vmatprep.subr.bf16.mxu1 %v8552_v9  ;;  %v8584_v41 = vld [vmem:[%s11285_s0 + $0x68] ss:$8 sps:$4 sm:$0xff]   ;;  %v539_v46 = vshrl.u32 %v503_v42, 16  ;;  %v542_v47 = vshll.u32 %v503_v42, 16  ;;  %v508_v54 = vld [vmem:[%s11285_s0 + $0x14] sm:$0x1]  ;;  %vm10014_vm5 = vmor %vm4080_vm3, %vm4081_vm4 }
  0x1f   :  { %v507_v53 = vld [vmem:[%s11285_s0 + $0x10] sm:$0xf]  ;;  %v555_v58 = vrot.slane %v553_v49, 4  ;;  %v509_v59 = vld [vmem:[%s11285_s0 + $0x18] sm:$0xf]  ;;  %v558_v61 = vrot.slane %v556_v51, 5  ;;  %vm10097_vm10 = vmand %vm3271_vm6, %vm3272_vm7 }
  0x20   :  { %7921 = vmatpush3.bf16.msra.mxu0 %v8551_v8  ;;  %v541_v55 = vrot.slane %v539_v46, 4  ;;  %v544_v56 = vrot.slane %v542_v47, 5  ;;  %v8585_v60 = vld [vmem:[%s11285_s0 + $0x108] ss:$8 sps:$4 sm:$0xff]   ;;  %v564_v62 = vrot.slane %v562_v52, 5  ;;  %v567_v0 = vshrl.u32 %v507_v53, 16  ;;  %vm10103_vm11 = vmand %vm3277_vm8, %vm3278_vm9 }
  0x21   :  { %7953 = vmatpush3.bf16.msra.mxu1 %v8552_v9  ;;  %7922 = vmatprep.subr.bf16.mxu0 %v8553_v10  ;;  %v510_v63 = vld [vmem:[%s11285_s0 + $0x1c] sm:$0x1]  ;;  %v570_v1 = vshll.u32 %v507_v53, 16  ;;  %v8586_v2 = vld [vmem:[%s11285_s0 + $0x78] ss:$8 sps:$4 sm:$0xff]   ;;  %v8588_v3 = vld [vmem:[%s11286_s1 + $0xc8] sm:$0xff]   ;;  %v559_v9 = vor.u32 %v558_v61, %v555_v58 }
  0x22   :  { %7954 = vmatprep.subr.bf16.mxu1 %v8554_v11  ;;  %v545_v4 = vor.u32 %v544_v56, %v541_v55  ;;  %v576_v5 = vshll.u32 %v508_v54, 16  ;;  %v581_v6 = vshrl.u32 %v509_v59, 16  ;;  %v584_v7 = vshll.u32 %v509_v59, 16  ;;  %v8589_v13 = vld [vmem:[%s11286_s1 + $0x80] sm:$0xff]   ;;  %v515_v43 = vld [vmem:[%s11285_s0 + $0x30] sm:$0xf] }
  0x23   :  { %v11301_v8 = vmov 0  ;;  %v590_v12 = vshll.u32 %v510_v63, 16  ;;  %v8596_v44 = vld [vmem:[%s11286_s1 + $0x170] sm:$0xff]   ;;  %v623_v49 = vshrl.u32 %v515_v43, 16  ;;  %v517_v53 = vld [vmem:[%s11285_s0 + $0x38] sm:$0xf] }
  0x24   :  { %7923 = vmatpush3.bf16.msra.mxu0 %v8553_v10  ;;  %v11302_v8 = vsel %vm9054_vm2, 4294967295, %v11301_v8  ;;  %v569_v10 = vrot.slane %v567_v0, 4  ;;  %v516_v48 = vld [vmem:[%s11285_s0 + $0x34] sm:$0x1]  ;;  %v626_v54 = vshll.u32 %v515_v43, 16  ;;  %v637_v63 = vshrl.u32 %v517_v53, 16 }
  0x25   :  { %7955 = vmatpush3.bf16.msra.mxu1 %v8554_v11  ;;  %7924 = vmatprep.subr.bf16.mxu0 %v8555_v14  ;;  %11303 = vst [vmem:[#allocation9_spill] sm:$0xff] %v11302_v8  ;;  %v572_v11 = vrot.slane %v570_v1, 5  ;;  %v518_v58 = vld [vmem:[%s11285_s0 + $0x3c] sm:$0x1]  ;;  %v625_v59 = vrot.slane %v623_v49, 4  ;;  %v640_v1 = vshll.u32 %v517_v53, 16 }
  0x26   :  { %7956 = vmatprep.subr.bf16.mxu1 %v8556_v15  ;;  %v628_v61 = vrot.slane %v626_v54, 5  ;;  %v525_v43 = vld [vmem:[%s11285_s0 + $0x60] sm:$0xf]  ;;  %v8666_v8 = vld [vmem:[#allocation3 + $0x78] sm:$0xff]  }
  0x27   :  { %v693_v53 = vshrl.u32 %v525_v43, 16 }
  0x28   :  { %7925 = vmatpush3.bf16.msra.mxu0 %v8555_v14  ;;  %v546_v14 = vrot.slane %v545_v4, 4  ;;  %v629_v4 = vor.u32 %v628_v61, %v625_v59  ;;  %v8608_v61 = vld [vmem:[%s11286_s1 + $0x150] sm:$0xff]  }
  0x29   :  { %7957 = vmatpush3.bf16.msra.mxu1 %v8556_v15  ;;  %7926 = vmatprep.subr.bf16.mxu0 %v8557_v16  ;;  %v583_v15 = vrot.slane %v581_v6, 4  ;;  %v8597_v6 = vld [vmem:[%s11286_s1 + $0x128] sm:$0xff]  }
  0x2a   :  { %7958 = vmatprep.subr.bf16.mxu1 %v8558_v17 }
  0x2c   :  { %7927 = vmatpush3.bf16.msra.mxu0 %v8557_v16  ;;  %v586_v16 = vrot.slane %v584_v7, 5 }
  0x2d   :  { %7959 = vmatpush3.bf16.msra.mxu1 %v8558_v17  ;;  %7976 = vmatprep.subr.bf16.mxu0 %v8563_v19  ;;  %v8590_v17 = vld [vmem:[%s11286_s1 + $0xc0] sm:$0xff]  }
  0x2e   :  { %8008 = vmatprep.subr.bf16.mxu1 %v8564_v20 }
  0x2f   :  { %7929 = vmatmul.mubr.bf16.vlgmr.msra.gmra.mxu0 %v8561_v18  ;;  %v560_v18 = vrot.slane %v559_v9, 4 }
  0x30   :  { %7961 = vmatmul.mubr.bf16.vlgmr.msra.gmra.mxu1 %v8562_v21  ;;  %7977 = vmatpush3.bf16.msra.mxu0 %v8563_v19  ;;  %v573_v19 = vor.u32 %v572_v11, %v569_v10  ;;  %v592_v21 = vrot.slane %v590_v12, 5  ;;  %v642_v10 = vrot.slane %v640_v1, 5  ;;  %v8598_v11 = vld [vmem:[%s11285_s0 + $0x140] ss:$8 sps:$4 sm:$0xff]  }
  0x31   :  { %8009 = vmatpush3.bf16.msra.mxu1 %v8564_v20  ;;  %7978 = vmatprep.subr.bf16.mxu0 %v8565_v22  ;;  %v578_v20 = vrot.slane %v576_v5, 5  ;;  %v639_v5 = vrot.slane %v637_v63, 4  ;;  %v8600_v12 = vld [vmem:[%s11286_s1 + $0x168] sm:$0xff]  }
  0x32   :  { %8010 = vmatprep.subr.bf16.mxu1 %v8566_v23  ;;  %7932 = vmatprep.mubr.bf16.mxu0 %v8567_v24  ;;  %v8592_v24 = vld [vmem:[%s11285_s0 + $0x120] ss:$8 sps:$4 sm:$0xff]  }
  0x33   :  { %7964 = vmatprep.mubr.bf16.mxu1 %v8568_v25  ;;  %v565_v25 = vsel %vm9054_vm2, %v560_v18, %v564_v62  ;;  %v632_v62 = vshll.u32 %v516_v48, 16  ;;  %v643_v18 = vor.u32 %v642_v10, %v639_v5  ;;  %v526_v48 = vld [vmem:[%s11285_s0 + $0x64] sm:$0x1]  ;;  %v8612_v5 = vld [vmem:[%s11286_s1 + $0x148] sm:$0xff]  }
  0x34   :  { %7979 = vmatpush3.bf16.msra.mxu0 %v8565_v22  ;;  %v551_v22 = vsel %vm9054_vm2, %v546_v14, %v550_v57  ;;  %v630_v14 = vrot.slane %v629_v4, 4  ;;  %v8604_v4 = vld [vmem:[%s11285_s0 + $0x168] ss:$8 sps:$4 sm:$0xff]  }
  0x35   :  { %8011 = vmatpush3.bf16.msra.mxu1 %v8566_v23  ;;  %7980 = vmatprep.subr.bf16.mxu0 %v8571_v27  ;;  %v587_v23 = vor.u32 %v586_v16, %v583_v15  ;;  %v634_v9 = vrot.slane %v632_v62, 5  ;;  %v8601_v16 = vld [vmem:[%s11286_s1 + $0x120] sm:$0xff]  }
  0x36   :  { %8012 = vmatprep.subr.bf16.mxu1 %v8572_v28 }
  0x37   :  { %7933 = vmatmul.mubr.bf16.gmra.mxu0 %v8569_v26  ;;  %v574_v26 = vrot.slane %v573_v19, 4  ;;  %v8599_v19 = vld [vmem:[%s11285_s0 + $0x150] ss:$8 sps:$4 sm:$0xff]  }
  0x38   :  { %7965 = vmatmul.mubr.bf16.gmra.mxu1 %v8570_v29  ;;  %7981 = vmatpush3.bf16.msra.mxu0 %v8571_v27  ;;  %v8591_v27 = vld [vmem:[%s11286_s1 + $0x138] sm:$0xff]   ;;  %v588_v29 = vrot.slane %v587_v23, 4  ;;  %v8602_v23 = vld [vmem:[%s11286_s1 + $0x160] sm:$0xff]  }
  0x39   :  { %8013 = vmatpush3.bf16.msra.mxu1 %v8572_v28  ;;  %7982 = vmatprep.subr.bf16.mxu0 %v8573_v30  ;;  %v7016_v28 = vcombine.low %v551_v22, %v565_v25  ;;  %v644_v22 = vrot.slane %v643_v18, 4  ;;  %v520_v25 = vld [vmem:[%s11285_s0 + $0x4c] sm:$0x1] }
  0x3a   :  { %8014 = vmatprep.subr.bf16.mxu1 %v8574_v31  ;;  %7936 = vmatprep.mubr.bf16.mxu0 %v8575_v32  ;;  %v511_v32 = vld [vmem:[%s11285_s0 + $0x20] sm:$0xf] }
  0x3b   :  { %7968 = vmatprep.mubr.bf16.mxu1 %v8576_v33  ;;  %v593_v33 = vsel %vm9054_vm2, %v588_v29, %v592_v21  ;;  %v635_v21 = vsel %vm9054_vm2, %v630_v14, %v634_v9 }
  0x3c   :  { %7983 = vmatpush3.bf16.msra.mxu0 %v8573_v30  ;;  %v8594_v30 = vld [vmem:[%s11286_s1 + $0x178] sm:$0xff]  }
  0x3d   :  { %8015 = vmatpush3.bf16.msra.mxu1 %v8574_v31  ;;  %7984 = vmatprep.subr.bf16.mxu0 %v8579_v35  ;;  %v579_v31 = vsel %vm9054_vm2, %v574_v26, %v578_v20  ;;  %v521_v26 = vld [vmem:[%s11285_s0 + $0x50] sm:$0xf] }
  0x3e   :  { %8016 = vmatprep.subr.bf16.mxu1 %v8580_v37 }
  0x3f   :  { %7937 = vmatmul.mubr.bf16.gmra.mxu0 %v8577_v34  ;;  %v8593_v34 = vld [vmem:[%s11285_s0 + $0x130] ss:$8 sps:$4 sm:$0xff]  }
  0x40   :  { %7969 = vmatmul.mubr.bf16.gmra.mxu1 %v8578_v36  ;;  %7985 = vmatpush3.bf16.msra.mxu0 %v8579_v35  ;;  %v512_v35 = vld [vmem:[%s11285_s0 + $0x24] sm:$0x1]  ;;  %v513_v36 = vld [vmem:[%s11285_s0 + $0x28] sm:$0xf] }
  0x41   :  { %8017 = vmatpush3.bf16.msra.mxu1 %v8580_v37  ;;  %7986 = vmatprep.subr.bf16.mxu0 %v8581_v38  ;;  %v514_v37 = vld [vmem:[%s11285_s0 + $0x2c] sm:$0x1]  ;;  %v604_v42 = vshll.u32 %v512_v35, 16  ;;  %v609_v45 = vshrl.u32 %v513_v36, 16  ;;  %v612_v46 = vshll.u32 %v513_v36, 16  ;;  %v665_v35 = vshrl.u32 %v521_v26, 16 }
  0x42   :  { %8018 = vmatprep.subr.bf16.mxu1 %v8582_v39  ;;  %7940 = vmatprep.mubr.bf16.mxu0 %v8583_v40  ;;  %v595_v40 = vshrl.u32 %v511_v32, 16  ;;  %v618_v47 = vshll.u32 %v514_v37, 16  ;;  %v668_v36 = vshll.u32 %v521_v26, 16 }
  0x43   :  { %7972 = vmatprep.mubr.bf16.mxu1 %v8584_v41  ;;  %v598_v41 = vshll.u32 %v511_v32, 16  ;;  %v606_v52 = vrot.slane %v604_v42, 5  ;;  %v611_v55 = vrot.slane %v609_v45, 4  ;;  %v614_v56 = vrot.slane %v612_v46, 5  ;;  %v523_v32 = vld [vmem:[%s11285_s0 + $0x58] sm:$0xf] }
  0x44   :  { %7987 = vmatpush3.bf16.msra.mxu0 %v8581_v38  ;;  %v7017_v38 = vcombine.low %v579_v31, %v593_v33  ;;  %v620_v57 = vrot.slane %v618_v47, 5  ;;  %v660_v31 = vshll.u32 %v520_v25, 16  ;;  %v8603_v33 = vld [vmem:[%s11286_s1 + $0x118] sm:$0xff]   ;;  %v667_v45 = vrot.slane %v665_v35, 4 }
  0x45   :  { %8019 = vmatpush3.bf16.msra.mxu1 %v8582_v39  ;;  %7988 = vmatprep.subr.bf16.mxu0 %v8587_v50  ;;  %v8595_v39 = vld [vmem:[%s11286_s1 + $0x130] sm:$0xff]   ;;  %v600_v51 = vrot.slane %v598_v41, 5  ;;  %v615_v0 = vor.u32 %v614_v56, %v611_v55  ;;  %v670_v46 = vrot.slane %v668_v36, 5  ;;  %v682_v49 = vshll.u32 %v523_v32, 16 }
  0x46   :  { %8020 = vmatprep.subr.bf16.mxu1 %v8588_v3  ;;  %v662_v42 = vrot.slane %v660_v31, 5  ;;  %v696_v56 = vshll.u32 %v525_v43, 16 }
  0x47   :  { %7941 = vmatmul.mubr.bf16.gmra.mxu0 %v8585_v60  ;;  %v616_v7 = vrot.slane %v615_v0, 4  ;;  %v671_v54 = vor.u32 %v670_v46, %v667_v45  ;;  %v684_v55 = vrot.slane %v682_v49, 5  ;;  %v9229_v45 = vld [vmem:[%s11286_s1 + $0x1b8] sm:$0xff]  }
  0x48   :  { %7973 = vmatmul.mubr.bf16.gmra.mxu1 %v8586_v2  ;;  %7989 = vmatpush3.bf16.msra.mxu0 %v8587_v50  ;;  %v597_v50 = vrot.slane %v595_v40, 4  ;;  %v646_v2 = vshll.u32 %v518_v58, 16  ;;  %v8607_v58 = vld [vmem:[%s11286_s1 + $0x110] sm:$0xff]   ;;  %v698_v1 = vrot.slane %v696_v56, 5 }
  0x49   :  { %8021 = vmatpush3.bf16.msra.mxu1 %v8588_v3  ;;  %7990 = vmatprep.subr.bf16.mxu0 %v8589_v13  ;;  %v672_v62 = vrot.slane %v671_v54, 4 }
  0x4a   :  { %8022 = vmatprep.subr.bf16.mxu1 %v8590_v17  ;;  %7992 = vmatprep.mubr.bf16.mxu0 %v7016_v28  ;;  %v601_v60 = vor.u32 %v600_v51, %v597_v50  ;;  %v648_v15 = vrot.slane %v646_v2, 5  ;;  %v8609_v2 = vld [vmem:[%s11286_s1 + $0x108] sm:$0xff]  }
  0x4b   :  { %8024 = vmatprep.mubr.bf16.mxu1 %v8592_v24  ;;  %v519_v24 = vld [vmem:[%s11285_s0 + $0x48] sm:$0xf] }
  0x4c   :  { %7991 = vmatpush3.bf16.msra.mxu0 %v8589_v13  ;;  %v602_v3 = vrot.slane %v601_v60, 4  ;;  %v649_v28 = vsel %vm9054_vm2, %v644_v22, %v648_v15  ;;  %v651_v29 = vshrl.u32 %v519_v24, 16  ;;  %v695_v60 = vrot.slane %v693_v53, 4  ;;  %v527_v15 = vld [vmem:[%s11285_s0 + $0x68] sm:$0xf] }
  0x4d   :  { %8023 = vmatpush3.bf16.msra.mxu1 %v8590_v17  ;;  %8040 = vmatprep.subr.bf16.mxu0 %v8591_v27  ;;  %v621_v17 = vsel %vm9054_vm2, %v616_v7, %v620_v57  ;;  %v702_v57 = vshll.u32 %v526_v48, 16 }
  0x4e   :  { %8072 = vmatprep.subr.bf16.mxu1 %v8594_v30  ;;  %v607_v13 = vsel %vm9054_vm2, %v602_v3, %v606_v52  ;;  %v653_v40 = vrot.slane %v651_v29, 4  ;;  %v699_v9 = vor.u32 %v698_v1, %v695_v60  ;;  %v8614_v29 = vld [vmem:[%s11286_s1 + $0x140] sm:$0xff]  }
  0x4f   :  { %7993 = vmatmul.mubr.bf16.vlgmr.msra.gmra.mxu0 %v7017_v38  ;;  %v7018_v20 = vcombine.low %v607_v13, %v621_v17  ;;  %v524_v38 = vld [vmem:[%s11285_s0 + $0x5c] sm:$0x1]  ;;  %v704_v10 = vrot.slane %v702_v57, 5  ;;  %v529_v17 = vld [vmem:[%s11285_s0 + $0x70] sm:$0xf] }
  0x50   :  { %8041 = vmatpush3.bf16.msra.mxu0 %v8591_v27  ;;  %8025 = vmatmul.mubr.bf16.vlgmr.msra.gmra.mxu1 %v8593_v34  ;;  %v522_v27 = vld [vmem:[%s11285_s0 + $0x54] sm:$0x1]  ;;  %v7019_v34 = vcombine.low %v635_v21, %v649_v28  ;;  %v688_v52 = vshll.u32 %v524_v38, 16  ;;  %v700_v14 = vrot.slane %v699_v9, 4  ;;  %v710_v21 = vshll.u32 %v527_v15, 16 }
  0x51   :  { %8073 = vmatpush3.bf16.msra.mxu1 %v8594_v30  ;;  %8042 = vmatprep.subr.bf16.mxu0 %v8595_v39  ;;  %v654_v30 = vshll.u32 %v519_v24, 16  ;;  %v674_v37 = vshll.u32 %v522_v27, 16  ;;  %v721_v25 = vshrl.u32 %v529_v17, 16  ;;  %v724_v26 = vshll.u32 %v529_v17, 16  ;;  %v531_v28 = vld [vmem:[%s11285_s0 + $0x78] sm:$0xf] }
  0x52   :  { %8074 = vmatprep.subr.bf16.mxu1 %v8596_v44  ;;  %8028 = vmatprep.mubr.bf16.mxu1 %v8598_v11  ;;  %v690_v0 = vrot.slane %v688_v52, 5  ;;  %v8605_v11 = vld [vmem:[%s11285_s0 + $0x178] ss:$8 sps:$4 sm:$0xff]   ;;  %v705_v18 = vsel %vm9054_vm2, %v700_v14, %v704_v10  ;;  %v712_v31 = vrot.slane %v710_v21, 5  ;;  %v7130_v9 = vld [vmem:[%s11285_s0 + $0x128] sm:$0xf] }
  0x53   :  { %7996 = vmatprep.mubr.bf16.mxu0 %v7018_v20  ;;  %v656_v41 = vrot.slane %v654_v30, 5  ;;  %v676_v47 = vrot.slane %v674_v37, 5  ;;  %v707_v20 = vshrl.u32 %v527_v15, 16  ;;  %v723_v35 = vrot.slane %v721_v25, 4  ;;  %v533_v38 = vld [vmem:[%s11285_s0 + $0x80] sm:$0xf] }
  0x54   :  { %8043 = vmatpush3.bf16.msra.mxu0 %v8595_v39  ;;  %v8606_v39 = vld [vmem:[%s11286_s1 + $0x158] sm:$0xff]   ;;  %v726_v36 = vrot.slane %v724_v26, 5  ;;  %v752_v48 = vshll.u32 %v533_v38, 16  ;;  %v7131_v10 = vld [vmem:[%s11285_s0 + $0x12c] sm:$0x1]  ;;  %v1505_v14 = vshrl.u32 %v7130_v9, 16 }
  0x55   :  { %8075 = vmatpush3.bf16.msra.mxu1 %v8596_v44  ;;  %8044 = vmatprep.subr.bf16.mxu0 %v8597_v6  ;;  %v679_v44 = vshrl.u32 %v523_v32, 16  ;;  %v657_v50 = vor.u32 %v656_v41, %v653_v40  ;;  %v709_v30 = vrot.slane %v707_v20, 4  ;;  %v534_v41 = vld [vmem:[%s11285_s0 + $0x84] sm:$0x1]  ;;  %v1508_v15 = vshll.u32 %v7130_v9, 16 }
  0x56   :  { %8076 = vmatprep.subr.bf16.mxu1 %v8600_v12  ;;  %v727_v46 = vor.u32 %v726_v36, %v723_v35  ;;  %v758_v49 = vshll.u32 %v534_v41, 16  ;;  %v754_v56 = vrot.slane %v752_v48, 5  ;;  %v7132_v17 = vld [vmem:[%s11285_s0 + $0x130] sm:$0xf]  ;;  %v7141_v9 = vld [vmem:[%s11285_s0 + $0x154] sm:$0x1] }
  0x57   :  { %7997 = vmatmul.mubr.bf16.gmra.mxu0 %v7019_v34  ;;  %v681_v51 = vrot.slane %v679_v44, 4  ;;  %v658_v59 = vrot.slane %v657_v50, 4  ;;  %v735_v34 = vshrl.u32 %v531_v28, 16  ;;  %v713_v40 = vor.u32 %v712_v31, %v709_v30  ;;  %v9234_v50 = vld [vmem:[%s11286_s1 + $0x1f8] sm:$0xff]  }
  0x58   :  { %8045 = vmatpush3.bf16.msra.mxu0 %v8597_v6  ;;  %8029 = vmatmul.mubr.bf16.gmra.mxu1 %v8599_v19  ;;  %v677_v6 = vsel %vm9054_vm2, %v672_v62, %v676_v47  ;;  %v530_v19 = vld [vmem:[%s11285_s0 + $0x74] sm:$0x1]  ;;  %v749_v44 = vshrl.u32 %v533_v38, 16  ;;  %v728_v53 = vrot.slane %v727_v46, 4  ;;  %v760_v62 = vrot.slane %v758_v49, 5 }
  0x59   :  { %8077 = vmatpush3.bf16.msra.mxu1 %v8600_v12  ;;  %8046 = vmatprep.subr.bf16.mxu0 %v8601_v16  ;;  %v685_v63 = vor.u32 %v684_v55, %v681_v51  ;;  %v663_v3 = vsel %vm9054_vm2, %v658_v59, %v662_v42  ;;  %v730_v27 = vshll.u32 %v530_v19, 16  ;;  %v737_v42 = vrot.slane %v735_v34, 4  ;;  %v8616_v19 = vld [vmem:[%s11285_s0 + $0x1c0] ss:$8 sps:$4 sm:$0xff]   ;;  %v8619_v38 = vld [vmem:[%s11286_s1 + $0x1b0] sm:$0xff]  }
  0x5a   :  { %8078 = vmatprep.subr.bf16.mxu1 %v8602_v23  ;;  %v7020_v12 = vcombine.low %v663_v3, %v677_v6  ;;  %8032 = vmatprep.mubr.bf16.mxu1 %v8604_v4  ;;  %v714_v51 = vrot.slane %v713_v40, 4  ;;  %v751_v52 = vrot.slane %v749_v44, 4  ;;  %v8615_v4 = vld [vmem:[%s11285_s0 + $0x1b0] ss:$8 sps:$4 sm:$0xff]   ;;  %v7128_v6 = vld [vmem:[%s11285_s0 + $0x120] sm:$0xf] }
  0x5b   :  { %v686_v7 = vrot.slane %v685_v63, 4  ;;  %v732_v37 = vrot.slane %v730_v27, 5  ;;  %v8611_v63 = vld [vmem:[%s11285_s0 + $0x198] ss:$8 sps:$4 sm:$0xff]   ;;  %v1510_v25 = vrot.slane %v1508_v15, 5 }
  0x5c   :  { %8047 = vmatpush3.bf16.msra.mxu0 %v8601_v16  ;;  %8000 = vmatprep.mubr.bf16.mxu0 %v7020_v12  ;;  %v528_v16 = vld [vmem:[%s11285_s0 + $0x6c] sm:$0x1]  ;;  %v1494_v12 = vshll.u32 %v7128_v6, 16  ;;  %v7135_v27 = vld [vmem:[%s11285_s0 + $0x13c] sm:$0x1] }
  0x5d   :  { %8079 = vmatpush3.bf16.msra.mxu1 %v8602_v23  ;;  %8048 = vmatprep.subr.bf16.mxu0 %v8603_v33  ;;  %v691_v13 = vsel %vm9054_vm2, %v686_v7, %v690_v0  ;;  %v716_v22 = vshll.u32 %v528_v16, 16  ;;  %v8613_v23 = vld [vmem:[%s11286_s1 + $0x100] sm:$0xff]   ;;  %v733_v59 = vsel %vm9054_vm2, %v728_v53, %v732_v37  ;;  %v1514_v16 = vshll.u32 %v7131_v10, 16 }
  0x5e   :  { %8080 = vmatprep.subr.bf16.mxu1 %v8606_v39  ;;  %v7021_v24 = vcombine.low %v691_v13, %v705_v18  ;;  %v7129_v7 = vld [vmem:[%s11285_s0 + $0x124] sm:$0x1]  ;;  %v7133_v18 = vld [vmem:[%s11285_s0 + $0x134] sm:$0x1]  ;;  %v1496_v21 = vrot.slane %v1494_v12, 5  ;;  %v1542_v37 = vshll.u32 %v7135_v27, 16 }
  0x5f   :  { %v718_v32 = vrot.slane %v716_v22, 5  ;;  %v1500_v13 = vshll.u32 %v7129_v7, 16  ;;  %v1516_v26 = vrot.slane %v1514_v16, 5  ;;  %v1528_v31 = vshll.u32 %v7133_v18, 16  ;;  %v8624_v16 = vld [vmem:[%s11286_s1 + $0x1e8] sm:$0xff]  }
  0x60   :  { %8049 = vmatpush3.bf16.msra.mxu0 %v8603_v33  ;;  %8033 = vmatmul.mubr.bf16.gmra.mxu1 %v8605_v11  ;;  %v532_v33 = vld [vmem:[%s11285_s0 + $0x7c] sm:$0x1]  ;;  %v1491_v11 = vshrl.u32 %v7128_v6, 16  ;;  %v1544_v46 = vrot.slane %v1542_v37, 5 }
  0x61   :  { %8081 = vmatpush3.bf16.msra.mxu1 %v8606_v39  ;;  %8050 = vmatprep.subr.bf16.mxu0 %v8607_v58  ;;  %v738_v39 = vshll.u32 %v531_v28, 16  ;;  %v744_v43 = vshll.u32 %v532_v33, 16  ;;  %v719_v57 = vsel %vm9054_vm2, %v714_v51, %v718_v32  ;;  %v1502_v22 = vrot.slane %v1500_v13, 5 }
  0x62   :  { %8082 = vmatprep.subr.bf16.mxu1 %v8608_v61  ;;  %8001 = vmatmul.mubr.bf16.gmra.mxu0 %v7021_v24  ;;  %v7022_v0 = vcombine.low %v719_v57, %v733_v59  ;;  %v1493_v20 = vrot.slane %v1491_v11, 4  ;;  %v7134_v24 = vld [vmem:[%s11285_s0 + $0x138] sm:$0xf]  ;;  %v1519_v28 = vshrl.u32 %v7132_v17, 16  ;;  %v1530_v40 = vrot.slane %v1528_v31, 5 }
  0x63   :  { %v740_v47 = vrot.slane %v738_v39, 5  ;;  %v746_v55 = vrot.slane %v744_v43, 5  ;;  %v1533_v32 = vshrl.u32 %v7134_v24, 16  ;;  %v1536_v33 = vshll.u32 %v7134_v24, 16 }
  0x64   :  { %8051 = vmatpush3.bf16.msra.mxu0 %v8607_v58  ;;  %v8610_v58 = vld [vmem:[%s11285_s0 + $0x188] ss:$8 sps:$4 sm:$0xff]   ;;  %8004 = vmatprep.mubr.bf16.mxu0 %v7022_v0  ;;  %v1497_v30 = vor.u32 %v1496_v21, %v1493_v20  ;;  %v1521_v35 = vrot.slane %v1519_v28, 4  ;;  %v7143_v20 = vld [vmem:[%s11285_s0 + $0x15c] sm:$0x1]  ;;  %v1584_v24 = vshll.u32 %v7141_v9, 16 }
  0x65   :  { %8083 = vmatpush3.bf16.msra.mxu1 %v8608_v61  ;;  %8052 = vmatprep.subr.bf16.mxu0 %v8609_v2  ;;  %v741_v54 = vor.u32 %v740_v47, %v737_v42  ;;  %v755_v61 = vor.u32 %v754_v56, %v751_v52  ;;  %v1535_v41 = vrot.slane %v1533_v32, 4  ;;  %v1538_v42 = vrot.slane %v1536_v33, 5  ;;  %v8621_v52 = vld [vmem:[%s11285_s0 + $0x1d0] ss:$8 sps:$4 sm:$0xff]   ;;  %v8623_v56 = vld [vmem:[%s11286_s1 + $0x1a8] sm:$0xff]  }
  0x66   :  { %8084 = vmatprep.subr.bf16.mxu1 %v8612_v5  ;;  %8036 = vmatprep.mubr.bf16.mxu1 %v8610_v58  ;;  %v1498_v39 = vrot.slane %v1497_v30, 4  ;;  %v7136_v58 = vld [vmem:[%s11285_s0 + $0x140] sm:$0xf]  ;;  %v1598_v28 = vshll.u32 %v7143_v20, 16  ;;  %v1586_v33 = vrot.slane %v1584_v24, 5 }
  0x67   :  { %v742_v60 = vrot.slane %v741_v54, 4  ;;  %v1539_v48 = vor.u32 %v1538_v42, %v1535_v41  ;;  %v1547_v0 = vshrl.u32 %v7136_v58, 16  ;;  %v8627_v41 = vld [vmem:[%s11285_s0 + $0x1f8] ss:$8 sps:$4 sm:$0xff]  }
  0x68   :  { %8053 = vmatpush3.bf16.msra.mxu0 %v8609_v2  ;;  %v756_v2 = vrot.slane %v755_v61, 4  ;;  %8037 = vmatmul.mubr.bf16.gmra.mxu1 %v8611_v63  ;;  %v1503_v47 = vsel %vm9054_vm2, %v1498_v39, %v1502_v22  ;;  %v7138_v61 = vld [vmem:[%s11285_s0 + $0x148] sm:$0xf] }
  0x69   :  { %8085 = vmatpush3.bf16.msra.mxu1 %v8612_v5  ;;  %8054 = vmatprep.subr.bf16.mxu0 %v8613_v23  ;;  %v747_v1 = vsel %vm9054_vm2, %v742_v60, %v746_v55  ;;  %v1540_v54 = vrot.slane %v1539_v48, 4  ;;  %v8622_v55 = vld [vmem:[%s11285_s0 + $0x1e0] ss:$8 sps:$4 sm:$0xff]   ;;  %v7137_v60 = vld [vmem:[%s11285_s0 + $0x144] sm:$0x1]  ;;  %v1564_v6 = vshll.u32 %v7138_v61, 16 }
  0x6a   :  { %8086 = vmatprep.subr.bf16.mxu1 %v8614_v29  ;;  %v761_v3 = vsel %vm9054_vm2, %v756_v2, %v760_v62  ;;  %v7139_v62 = vld [vmem:[%s11285_s0 + $0x14c] sm:$0x1]  ;;  %v1556_v2 = vshll.u32 %v7137_v60, 16  ;;  %v1549_v11 = vrot.slane %v1547_v0, 4  ;;  %v7144_v48 = vld [vmem:[%s11285_s0 + $0x168] sm:$0xf] }
  0x6b   :  { %v7023_v5 = vcombine.low %v747_v1, %v761_v3  ;;  %v1545_v59 = vsel %vm9054_vm2, %v1540_v54, %v1544_v46  ;;  %v1550_v1 = vshll.u32 %v7136_v58, 16  ;;  %v7140_v3 = vld [vmem:[%s11285_s0 + $0x150] sm:$0xf]  ;;  %v1570_v7 = vshll.u32 %v7139_v62, 16  ;;  %v7149_v62 = vld [vmem:[%s11285_s0 + $0x17c] sm:$0x1] }
  0x6c   :  { %8055 = vmatpush3.bf16.msra.mxu0 %v8613_v23  ;;  %v1507_v23 = vrot.slane %v1505_v14, 4  ;;  %v1575_v10 = vshrl.u32 %v7140_v3, 16  ;;  %v1558_v13 = vrot.slane %v1556_v2, 5  ;;  %v7142_v14 = vld [vmem:[%s11285_s0 + $0x158] sm:$0xf]  ;;  %v1578_v15 = vshll.u32 %v7140_v3, 16 }
  0x6d   :  { %8087 = vmatpush3.bf16.msra.mxu1 %v8614_v29  ;;  %8104 = vmatprep.subr.bf16.mxu0 %v9229_v45  ;;  %v1522_v29 = vshll.u32 %v7132_v17, 16  ;;  %v1552_v12 = vrot.slane %v1550_v1, 5  ;;  %v1566_v18 = vrot.slane %v1564_v6, 5  ;;  %v1592_v27 = vshll.u32 %v7142_v14, 16  ;;  %v8635_v0 = vld [vmem:[%s11286_s1 + $0x188] sm:$0xff]  }
  0x6e   :  { %8136 = vmatprep.subr.bf16.mxu1 %v9234_v50  ;;  %8005 = vmatmul.mubr.bf16.gmra.mxu0 %v7023_v5  ;;  %v1511_v34 = vor.u32 %v1510_v25, %v1507_v23  ;;  %v1561_v5 = vshrl.u32 %v7138_v61, 16  ;;  %v1577_v21 = vrot.slane %v1575_v10, 4  ;;  %v1580_v23 = vrot.slane %v1578_v15, 5  ;;  %v7151_v10 = vld [vmem:[%s11285_s0 + $0x184] sm:$0x1] }
  0x6f   :  { %8056 = vmatprep.mubr.bf16.mxu0 %v8615_v4  ;;  %v1524_v36 = vrot.slane %v1522_v29, 5  ;;  %v8625_v4 = vld [vmem:[%s11286_s1 + $0x1a0] sm:$0xff]   ;;  %v1553_v22 = vor.u32 %v1552_v12, %v1549_v11  ;;  %v1589_v25 = vshrl.u32 %v7142_v14, 16  ;;  %v1640_v14 = vshll.u32 %v7149_v62, 16 }
  0x70   :  { %v1512_v43 = vrot.slane %v1511_v34, 4  ;;  %v1563_v17 = vrot.slane %v1561_v5, 4  ;;  %v1581_v30 = vor.u32 %v1580_v23, %v1577_v21  ;;  %v1594_v34 = vrot.slane %v1592_v27, 5 }
  0x71   :  { %v1525_v44 = vor.u32 %v1524_v36, %v1521_v35  ;;  %v1554_v29 = vrot.slane %v1553_v22, 4  ;;  %v1591_v31 = vrot.slane %v1589_v25, 4  ;;  %v8626_v35 = vld [vmem:[%s11286_s1 + $0x1e0] sm:$0xff]   ;;  %v1642_v25 = vrot.slane %v1640_v14, 5 }
  0x72   :  { %v1517_v49 = vsel %vm9054_vm2, %v1512_v43, %v1516_v26  ;;  %v8629_v26 = vld [vmem:[%s11286_s1 + $0x198] sm:$0xff]   ;;  %v1582_v37 = vrot.slane %v1581_v30, 4  ;;  %v8628_v43 = vld [vmem:[%s11285_s0 + $0x208] ss:$8 sps:$4 sm:$0xff]   ;;  %v8637_v22 = vld [vmem:[%s11286_s1 + $0x180] sm:$0xff]  }
  0x73   :  { %v1526_v51 = vrot.slane %v1525_v44, 4  ;;  %v7176_v53 = vcombine.low %v1503_v47, %v1517_v49  ;;  %v1559_v36 = vsel %vm9054_vm2, %v1554_v29, %v1558_v13  ;;  %v8630_v44 = vld [vmem:[%s11286_s1 + $0x1d8] sm:$0xff]   ;;  %v8631_v49 = vld [vmem:[%s11286_s1 + $0x190] sm:$0xff]  }
  0x74   :  { %v1587_v46 = vsel %vm9054_vm2, %v1582_v37, %v1586_v33  ;;  %v8633_v33 = vld [vmem:[%s11285_s0 + $0x218] ss:$8 sps:$4 sm:$0xff]  }
  0x75   :  { %v1531_v57 = vsel %vm9054_vm2, %v1526_v51, %v1530_v40  ;;  %8088 = vmatprep.mubr.bf16.mxu1 %v7176_v53  ;;  %v1595_v40 = vor.u32 %v1594_v34, %v1591_v31  ;;  %v7145_v51 = vld [vmem:[%s11285_s0 + $0x16c] sm:$0x1]  ;;  %v7147_v53 = vld [vmem:[%s11285_s0 + $0x174] sm:$0x1] }
  0x76   :  { %8057 = vmatmul.mubr.bf16.vlgmr.msra.gmra.mxu0 %v8616_v19  ;;  %v7177_v63 = vcombine.low %v1531_v57, %v1545_v59  ;;  %v1572_v19 = vrot.slane %v1570_v7, 5  ;;  %v1612_v57 = vshll.u32 %v7145_v51, 16  ;;  %v1626_v61 = vshll.u32 %v7147_v53, 16  ;;  %v7156_v53 = vld [vmem:[%s11285_s0 + $0x198] sm:$0xf] }
  0x77   :  { %8105 = vmatpush3.bf16.msra.mxu0 %v9229_v45  ;;  %v8620_v45 = vld [vmem:[%s11286_s1 + $0x1f0] sm:$0xff]   ;;  %8060 = vmatprep.mubr.bf16.mxu0 %v8621_v52  ;;  %v1596_v47 = vrot.slane %v1595_v40, 4  ;;  %v7153_v40 = vld [vmem:[%s11285_s0 + $0x18c] sm:$0x1]  ;;  %v1690_v62 = vshll.u32 %v7156_v53, 16 }
  0x78   :  { %8106 = vmatprep.subr.bf16.mxu0 %v8619_v38  ;;  %8089 = vmatmul.mubr.bf16.vlgmr.msra.gmra.mxu1 %v7177_v63  ;;  %v7146_v52 = vld [vmem:[%s11285_s0 + $0x170] sm:$0xf]  ;;  %v1614_v3 = vrot.slane %v1612_v57, 5  ;;  %v1628_v9 = vrot.slane %v1626_v61, 5  ;;  %v7157_v57 = vld [vmem:[%s11285_s0 + $0x19c] sm:$0x1] }
  0x79   :  { %8137 = vmatpush3.bf16.msra.mxu1 %v9234_v50  ;;  %v1567_v50 = vor.u32 %v1566_v18, %v1563_v17  ;;  %v1617_v59 = vshrl.u32 %v7146_v52, 16  ;;  %v1620_v60 = vshll.u32 %v7146_v52, 16  ;;  %v8632_v63 = vld [vmem:[%s11286_s1 + $0x1d0] sm:$0xff]   ;;  %v7158_v61 = vld [vmem:[%s11285_s0 + $0x1a0] sm:$0xf] }
  0x7a   :  { %8138 = vmatprep.subr.bf16.mxu1 %v8620_v45 }
  0x7b   :  { %8107 = vmatpush3.bf16.msra.mxu0 %v8619_v38  ;;  %v1568_v32 = vrot.slane %v1567_v50, 4  ;;  %v1600_v38 = vrot.slane %v1598_v28, 5  ;;  %v1619_v6 = vrot.slane %v1617_v59, 4  ;;  %v1622_v7 = vrot.slane %v1620_v60, 5  ;;  %v8636_v50 = vld [vmem:[%s11286_s1 + $0x1c8] sm:$0xff]   ;;  %v9404_v28 = vld [vmem:[%s11286_s1 + $0x238] sm:$0xff]  }
  0x7c   :  { %8108 = vmatprep.subr.bf16.mxu0 %v8623_v56 }
  0x7d   :  { %8139 = vmatpush3.bf16.msra.mxu1 %v8620_v45  ;;  %v1573_v39 = vsel %vm9054_vm2, %v1568_v32, %v1572_v19  ;;  %v1601_v54 = vsel %vm9054_vm2, %v1596_v47, %v1600_v38  ;;  %v7148_v45 = vld [vmem:[%s11285_s0 + $0x178] sm:$0xf]  ;;  %v1654_v19 = vshll.u32 %v7151_v10, 16  ;;  %v8638_v38 = vld [vmem:[%s11286_s1 + $0x1c0] sm:$0xff]   ;;  %v1668_v47 = vshll.u32 %v7153_v40, 16 }
  0x7e   :  { %8061 = vmatmul.mubr.bf16.gmra.mxu0 %v8622_v55  ;;  %8140 = vmatprep.subr.bf16.mxu1 %v8624_v16  ;;  %v7178_v42 = vcombine.low %v1559_v36, %v1573_v39  ;;  %v1603_v55 = vshrl.u32 %v7144_v48, 16  ;;  %v7179_v58 = vcombine.low %v1587_v46, %v1601_v54  ;;  %v1631_v5 = vshrl.u32 %v7148_v45, 16  ;;  %v7152_v39 = vld [vmem:[%s11285_s0 + $0x188] sm:$0xf] }
  0x7f   :  { %8109 = vmatpush3.bf16.msra.mxu0 %v8623_v56  ;;  %8064 = vmatprep.mubr.bf16.mxu0 %v8627_v41  ;;  %v1606_v56 = vshll.u32 %v7144_v48, 16  ;;  %v1634_v11 = vshll.u32 %v7148_v45, 16  ;;  %v1656_v32 = vrot.slane %v1654_v19, 5  ;;  %v7154_v41 = vld [vmem:[%s11285_s0 + $0x190] sm:$0xf]  ;;  %v1662_v46 = vshll.u32 %v7152_v39, 16 }
  0x80   :  { %8110 = vmatprep.subr.bf16.mxu0 %v8625_v4  ;;  %8092 = vmatprep.mubr.bf16.mxu1 %v7178_v42  ;;  %v1605_v1 = vrot.slane %v1603_v55, 4  ;;  %v1633_v13 = vrot.slane %v1631_v5, 4  ;;  %v1676_v51 = vshll.u32 %v7154_v41, 16  ;;  %v1687_v45 = vshrl.u32 %v7156_v53, 16  ;;  %v8654_v40 = vld [vmem:[%s11285_s0 + $0xe0] ss:$8 sps:$4 sm:$0xff]  }
  0x81   :  { %8141 = vmatpush3.bf16.msra.mxu1 %v8624_v16  ;;  %v1608_v2 = vrot.slane %v1606_v56, 5  ;;  %v1623_v16 = vor.u32 %v1622_v7, %v1619_v6  ;;  %v1636_v17 = vrot.slane %v1634_v11, 5  ;;  %v1664_v55 = vrot.slane %v1662_v46, 5  ;;  %v7290_v46 = vld [vmem:[%s11285_s0 + $0x10] sm:$0xf]  ;;  %v8662_v53 = vld [vmem:[%s11286_s1 + $0x200] sm:$0xff]  }
  0x82   :  { %8142 = vmatprep.subr.bf16.mxu1 %v8626_v35  ;;  %8093 = vmatmul.mubr.bf16.gmra.mxu1 %v7179_v58  ;;  %v1670_v56 = vrot.slane %v1668_v47, 5  ;;  %v1678_v59 = vrot.slane %v1676_v51, 5  ;;  %v1692_v5 = vrot.slane %v1690_v62, 5  ;;  %v1704_v6 = vshll.u32 %v7158_v61, 16  ;;  %v7291_v47 = vld [vmem:[%s11285_s0 + $0x14] sm:$0x1] }
  0x83   :  { %8111 = vmatpush3.bf16.msra.mxu0 %v8625_v4  ;;  %v7150_v4 = vld [vmem:[%s11285_s0 + $0x180] sm:$0xf]  ;;  %v1609_v12 = vor.u32 %v1608_v2, %v1605_v1  ;;  %v1624_v23 = vrot.slane %v1623_v16, 4  ;;  %v1637_v24 = vor.u32 %v1636_v17, %v1633_v13  ;;  %v1689_v1 = vrot.slane %v1687_v45, 4  ;;  %v8655_v45 = vld [vmem:[%s11285_s0 + $0xf0] ss:$8 sps:$4 sm:$0xff]  }
  0x84   :  { %8112 = vmatprep.subr.bf16.mxu0 %v8629_v26  ;;  %v1645_v15 = vshrl.u32 %v7150_v4, 16  ;;  %v1648_v18 = vshll.u32 %v7150_v4, 16  ;;  %v1696_v2 = vshll.u32 %v7157_v57, 16  ;;  %v1706_v14 = vrot.slane %v1704_v6, 5  ;;  %v7293_v57 = vld [vmem:[%s11285_s0 + $0x1c] sm:$0x1] }
  0x85   :  { %8143 = vmatpush3.bf16.msra.mxu1 %v8626_v35  ;;  %v1610_v20 = vrot.slane %v1609_v12, 4  ;;  %v1629_v29 = vsel %vm9054_vm2, %v1624_v23, %v1628_v9  ;;  %v1638_v30 = vrot.slane %v1637_v24, 4  ;;  %v8634_v35 = vld [vmem:[%s11285_s0 + $0x228] ss:$8 sps:$4 sm:$0xff]   ;;  %v1693_v12 = vor.u32 %v1692_v5, %v1689_v1  ;;  %v8640_v24 = vld [vmem:[%s11285_s0 + $0x18] ss:$8 sps:$4 sm:$0xff]  }
  0x86   :  { %8065 = vmatmul.mubr.bf16.gmra.mxu0 %v8628_v43  ;;  %8144 = vmatprep.subr.bf16.mxu1 %v8630_v44  ;;  %v1647_v21 = vrot.slane %v1645_v15, 4  ;;  %v7155_v43 = vld [vmem:[%s11285_s0 + $0x194] sm:$0x1]  ;;  %v1698_v13 = vrot.slane %v1696_v2, 5  ;;  %v7294_v62 = vld [vmem:[%s11285_s0 + $0x20] sm:$0xf] }
  0x87   :  { %8113 = vmatpush3.bf16.msra.mxu0 %v8629_v26  ;;  %v1650_v26 = vrot.slane %v1648_v18, 5  ;;  %v1615_v27 = vsel %vm9054_vm2, %v1610_v20, %v1614_v3  ;;  %v1643_v36 = vsel %vm9054_vm2, %v1638_v30, %v1642_v25  ;;  %8068 = vmatprep.mubr.bf16.mxu0 %v8633_v33  ;;  %v1682_v52 = vshll.u32 %v7155_v43, 16  ;;  %v8644_v25 = vld [vmem:[%s11286_s1 + $0x230] sm:$0xff]   ;;  %v8648_v33 = vld [vmem:[%s11285_s0 + $0xb8] ss:$8 sps:$4 sm:$0xff]  }
  0x88   :  { %8114 = vmatprep.subr.bf16.mxu0 %v8631_v49  ;;  %v7180_v34 = vcombine.low %v1615_v27, %v1629_v29  ;;  %v1701_v3 = vshrl.u32 %v7158_v61, 16  ;;  %v1694_v17 = vrot.slane %v1693_v12, 4  ;;  %v8647_v29 = vld [vmem:[%s11286_s1 + $0x228] sm:$0xff]   ;;  %v7295_v2 = vld [vmem:[%s11285_s0 + $0x24] sm:$0x1]  ;;  %v2480_v6 = vshll.u32 %v7293_v57, 16 }
  0x89   :  { %8145 = vmatpush3.bf16.msra.mxu1 %v8630_v44  ;;  %v1651_v31 = vor.u32 %v1650_v26, %v1647_v21  ;;  %v1659_v44 = vshrl.u32 %v7152_v39, 16  ;;  %v1684_v60 = vrot.slane %v1682_v52, 5  ;;  %v8639_v21 = vld [vmem:[%s11285_s0 + $0x8] ss:$8 sps:$4 sm:$0xff]   ;;  %v2457_v52 = vshrl.u32 %v7290_v46, 16 }
  0x8a   :  { %8146 = vmatprep.subr.bf16.mxu1 %v8632_v63  ;;  %8096 = vmatprep.mubr.bf16.mxu1 %v7180_v34  ;;  %v1703_v10 = vrot.slane %v1701_v3, 4  ;;  %v8645_v30 = vld [vmem:[%s11285_s0 + $0x28] ss:$8 sps:$4 sm:$0xff]  }
  0x8b   :  { %8115 = vmatpush3.bf16.msra.mxu0 %v8631_v49  ;;  %v1652_v37 = vrot.slane %v1651_v31, 4  ;;  %v1673_v49 = vshrl.u32 %v7154_v41, 16  ;;  %v1661_v54 = vrot.slane %v1659_v44, 4  ;;  %v8646_v31 = vld [vmem:[%s11285_s0 + $0x38] ss:$8 sps:$4 sm:$0xff]   ;;  %v8659_v41 = vld [vmem:[%s11286_s1 + $0x208] sm:$0xff]  }
  0x8c   :  { %8116 = vmatprep.subr.bf16.mxu0 %v8635_v0  ;;  %v1707_v18 = vor.u32 %v1706_v14, %v1703_v10  ;;  %v8651_v34 = vld [vmem:[%s11285_s0 + $0x50] ss:$8 sps:$4 sm:$0xff]   ;;  %v7288_v43 = vld [vmem:[%s11285_s0 + $0x8] sm:$0xf]  ;;  %v7289_v44 = vld [vmem:[%s11285_s0 + $0xc] sm:$0x1] }
  0x8d   :  { %8147 = vmatpush3.bf16.msra.mxu1 %v8632_v63  ;;  %v1657_v42 = vsel %vm9054_vm2, %v1652_v37, %v1656_v32  ;;  %v1675_v58 = vrot.slane %v1673_v49, 4  ;;  %v1665_v63 = vor.u32 %v1664_v55, %v1661_v54  ;;  %v8643_v32 = vld [vmem:[%s11285_s0 + $0xa8] ss:$8 sps:$4 sm:$0xff]   ;;  %v2446_v49 = vshll.u32 %v7288_v43, 16 }
  0x8e   :  { %8148 = vmatprep.subr.bf16.mxu1 %v8636_v50  ;;  %8069 = vmatmul.mubr.bf16.gmra.mxu0 %v8634_v35  ;;  %v7181_v48 = vcombine.low %v1643_v36, %v1657_v42  ;;  %v1708_v23 = vrot.slane %v1707_v18, 4  ;;  %v8653_v35 = vld [vmem:[%s11286_s1 + $0x218] sm:$0xff]   ;;  %v8652_v36 = vld [vmem:[%s11285_s0 + $0x60] ss:$8 sps:$4 sm:$0xff]   ;;  %v8656_v37 = vld [vmem:[%s11286_s1 + $0x210] sm:$0xff]   ;;  %v2452_v51 = vshll.u32 %v7289_v44, 16 }
  0x8f   :  { %8117 = vmatpush3.bf16.msra.mxu0 %v8635_v0  ;;  %v7159_v0 = vld [vmem:[%s11285_s0 + $0x1a4] sm:$0x1]  ;;  %v1679_v4 = vor.u32 %v1678_v59, %v1675_v58  ;;  %v1666_v9 = vrot.slane %v1665_v63, 4  ;;  %8120 = vmatprep.mubr.bf16.mxu0 %v8639_v21  ;;  %v8649_v39 = vld [vmem:[%s11285_s0 + $0xc8] ss:$8 sps:$4 sm:$0xff]   ;;  %v2460_v54 = vshll.u32 %v7290_v46, 16 }
  0x90   :  { %8118 = vmatprep.subr.bf16.mxu0 %v8637_v22  ;;  %8097 = vmatmul.mubr.bf16.gmra.mxu1 %v7181_v48  ;;  %v1710_v7 = vshll.u32 %v7159_v0, 16  ;;  %v8658_v42 = vld [vmem:[%s11285_s0 + $0x80] ss:$8 sps:$4 sm:$0xff]   ;;  %v2443_v48 = vshrl.u32 %v7288_v43, 16  ;;  %v2466_v55 = vshll.u32 %v7291_v47, 16  ;;  %v2448_v59 = vrot.slane %v2446_v49, 5 }
  0x91   :  { %8149 = vmatpush3.bf16.msra.mxu1 %v8636_v50  ;;  %v1680_v11 = vrot.slane %v1679_v4, 4  ;;  %v1671_v15 = vsel %vm9054_vm2, %v1666_v9, %v1670_v56  ;;  %v8642_v50 = vld [vmem:[%s11285_s0 + $0x98] ss:$8 sps:$4 sm:$0xff]   ;;  %v2459_v61 = vrot.slane %v2457_v52, 4  ;;  %v2462_v0 = vrot.slane %v2460_v54, 5 }
  0x92   :  { %8150 = vmatprep.subr.bf16.mxu1 %v8638_v38  ;;  %v1712_v19 = vrot.slane %v1710_v7, 5  ;;  %v7292_v56 = vld [vmem:[%s11285_s0 + $0x18] sm:$0xf]  ;;  %v2445_v58 = vrot.slane %v2443_v48, 4  ;;  %v8660_v63 = vld [vmem:[%s11285_s0 + $0x100] ss:$8 sps:$4 sm:$0xff]  }
  0x93   :  { %8119 = vmatpush3.bf16.msra.mxu0 %v8637_v22  ;;  %v1685_v16 = vsel %vm9054_vm2, %v1680_v11, %v1684_v60  ;;  %v1699_v22 = vsel %vm9054_vm2, %v1694_v17, %v1698_v13  ;;  %v2454_v60 = vrot.slane %v2452_v51, 5  ;;  %v2468_v1 = vrot.slane %v2466_v55, 5  ;;  %v7296_v10 = vld [vmem:[%s11285_s0 + $0x28] sm:$0xf]  ;;  %v7302_v43 = vld [vmem:[%s11285_s0 + $0x40] sm:$0xf] }
  0x94   :  { %8168 = vmatprep.subr.bf16.mxu0 %v9404_v28  ;;  %v7182_v20 = vcombine.low %v1671_v15, %v1685_v16  ;;  %v1713_v26 = vsel %vm9054_vm2, %v1708_v23, %v1712_v19  ;;  %v2471_v3 = vshrl.u32 %v7292_v56, 16  ;;  %v2474_v4 = vshll.u32 %v7292_v56, 16  ;;  %v7297_v15 = vld [vmem:[%s11285_s0 + $0x2c] sm:$0x1]  ;;  %v8661_v44 = vld [vmem:[%s11285_s0 + $0x110] ss:$8 sps:$4 sm:$0xff]  }
  0x95   :  { %8151 = vmatpush3.bf16.msra.mxu1 %v8638_v38  ;;  %v7183_v27 = vcombine.low %v1699_v22, %v1713_v26  ;;  %v8657_v38 = vld [vmem:[%s11285_s0 + $0x70] ss:$8 sps:$4 sm:$0xff]   ;;  %v2449_v5 = vor.u32 %v2448_v59, %v2445_v58  ;;  %v2485_v7 = vshrl.u32 %v7294_v62, 16  ;;  %v2488_v9 = vshll.u32 %v7294_v62, 16  ;;  %v7303_v48 = vld [vmem:[%s11285_s0 + $0x44] sm:$0x1] }
  0x96   :  { %8100 = vmatprep.mubr.bf16.mxu1 %v7182_v20  ;;  %8121 = vmatmul.mubr.bf16.vlgmr.msra.gmra.mxu0 %v8640_v24  ;;  %v2463_v11 = vor.u32 %v2462_v0, %v2459_v61  ;;  %v2473_v12 = vrot.slane %v2471_v3, 4  ;;  %v2476_v13 = vrot.slane %v2474_v4, 5  ;;  %v2494_v14 = vshll.u32 %v7295_v2, 16  ;;  %v7298_v20 = vld [vmem:[%s11285_s0 + $0x30] sm:$0xf] }
  0x97   :  { %8169 = vmatpush3.bf16.msra.mxu0 %v9404_v28  ;;  %8124 = vmatprep.mubr.bf16.mxu0 %v8645_v30  ;;  %v8650_v28 = vld [vmem:[%s11286_s1 + $0x220] sm:$0xff]   ;;  %v2450_v16 = vrot.slane %v2449_v5, 4  ;;  %v2482_v17 = vrot.slane %v2480_v6, 5  ;;  %v2487_v18 = vrot.slane %v2485_v7, 4  ;;  %v2490_v19 = vrot.slane %v2488_v9, 5 }
  0x98   :  { %8170 = vmatprep.subr.bf16.mxu0 %v8644_v25  ;;  %8101 = vmatmul.mubr.bf16.gmra.mxu1 %v7183_v27  ;;  %v2464_v21 = vrot.slane %v2463_v11, 4  ;;  %v2477_v22 = vor.u32 %v2476_v13, %v2473_v12  ;;  %v2496_v23 = vrot.slane %v2494_v14, 5  ;;  %v2499_v24 = vshrl.u32 %v7296_v10, 16  ;;  %v7304_v56 = vld [vmem:[%s11285_s0 + $0x50] sm:$0xf] }
  0x99   :  { %8152 = vmatprep.mubr.bf16.mxu1 %v8642_v50  ;;  %v2491_v26 = vor.u32 %v2490_v19, %v2487_v18  ;;  %v7299_v50 = vld [vmem:[%s11285_s0 + $0x34] sm:$0x1]  ;;  %v2502_v27 = vshll.u32 %v7296_v10, 16  ;;  %v2541_v59 = vshrl.u32 %v7302_v43, 16  ;;  %v2550_v0 = vshll.u32 %v7303_v48, 16  ;;  %8200 = vmatprep.subr.bf16.mxu1 %v8666_v8 }
  0x9a   :  { %v2469_v30 = vsel %vm9054_vm2, %v2464_v21, %v2468_v1  ;;  %v7306_v1 = vld [vmem:[%s11285_s0 + $0x58] sm:$0xf]  ;;  %v2555_v5 = vshrl.u32 %v7304_v56, 16  ;;  %v7307_v10 = vld [vmem:[%s11285_s0 + $0x5c] sm:$0x1]  ;;  %v2558_v11 = vshll.u32 %v7304_v56, 16 }
  0x9b   :  { %8171 = vmatpush3.bf16.msra.mxu0 %v8644_v25  ;;  %v2455_v25 = vsel %vm9054_vm2, %v2450_v16, %v2454_v60  ;;  %v7305_v60 = vld [vmem:[%s11285_s0 + $0x54] sm:$0x1]  ;;  %v2543_v4 = vrot.slane %v2541_v59, 4  ;;  %v2552_v9 = vrot.slane %v2550_v0, 5  ;;  %v7308_v16 = vld [vmem:[%s11285_s0 + $0x60] sm:$0xf] }
  0x9c   :  { %8172 = vmatprep.subr.bf16.mxu0 %v8647_v29  ;;  %v2557_v13 = vrot.slane %v2555_v5, 4  ;;  %v2564_v14 = vshll.u32 %v7305_v60, 16  ;;  %v2560_v19 = vrot.slane %v2558_v11, 5  ;;  %v7309_v21 = vld [vmem:[%s11285_s0 + $0x64] sm:$0x1] }
  0x9e   :  { %8125 = vmatmul.mubr.bf16.gmra.mxu0 %v8646_v31  ;;  %v2478_v31 = vrot.slane %v2477_v22, 4  ;;  %v7310_v22 = vld [vmem:[%s11285_s0 + $0x68] sm:$0xf] }
  0x9f   :  { %8173 = vmatpush3.bf16.msra.mxu0 %v8647_v29  ;;  %8128 = vmatprep.mubr.bf16.mxu0 %v8651_v34  ;;  %v2508_v29 = vshll.u32 %v7297_v15, 16  ;;  %v7336_v34 = vcombine.low %v2455_v25, %v2469_v30  ;;  %v2569_v15 = vshrl.u32 %v7306_v1, 16  ;;  %v2566_v25 = vrot.slane %v2564_v14, 5 }
  0xa0   :  { %8174 = vmatprep.subr.bf16.mxu0 %v8650_v28  ;;  %8153 = vmatmul.mubr.bf16.vlgmr.msra.gmra.mxu1 %v8643_v32  ;;  %v2513_v32 = vshrl.u32 %v7298_v20, 16  ;;  %v2578_v30 = vshll.u32 %v7307_v10, 16  ;;  %v7319_v10 = vld [vmem:[%s11285_s0 + $0x8c] sm:$0x1] }
  0xa1   :  { %8156 = vmatprep.mubr.bf16.mxu1 %v8648_v33  ;;  %v7300_v33 = vld [vmem:[%s11285_s0 + $0x38] sm:$0xf]  ;;  %8201 = vmatpush3.bf16.msra.mxu1 %v8666_v8 }
  0xa2   :  { %v2527_v49 = vshrl.u32 %v7300_v33, 16  ;;  %v2530_v51 = vshll.u32 %v7300_v33, 16  ;;  %v2586_v33 = vshll.u32 %v7308_v16, 16 }
  0xa3   :  { %8175 = vmatpush3.bf16.msra.mxu0 %v8650_v28  ;;  %v2501_v28 = vrot.slane %v2499_v24, 4 }
  0xa4   :  { %8176 = vmatprep.subr.bf16.mxu0 %v8653_v35  ;;  %v2532_v58 = vrot.slane %v2530_v51, 5  ;;  %v2600_v51 = vshll.u32 %v7310_v22, 16 }
  0xa6   :  { %8129 = vmatmul.mubr.bf16.gmra.mxu0 %v8652_v36  ;;  %v2504_v36 = vrot.slane %v2502_v27, 5  ;;  %v2561_v27 = vor.u32 %v2560_v19, %v2557_v13  ;;  %v2602_v59 = vrot.slane %v2600_v51, 5 }
  0xa7   :  { %8177 = vmatpush3.bf16.msra.mxu0 %v8653_v35  ;;  %8132 = vmatprep.mubr.bf16.mxu0 %v8657_v38  ;;  %v2492_v35 = vrot.slane %v2491_v26, 4  ;;  %v7301_v38 = vld [vmem:[%s11285_s0 + $0x3c] sm:$0x1]  ;;  %v2571_v26 = vrot.slane %v2569_v15, 4 }
  0xa8   :  { %8178 = vmatprep.subr.bf16.mxu0 %v8656_v37  ;;  %8157 = vmatmul.mubr.bf16.gmra.mxu1 %v8649_v39  ;;  %v2483_v39 = vsel %vm9054_vm2, %v2478_v31, %v2482_v17  ;;  %v2505_v47 = vor.u32 %v2504_v36, %v2501_v28  ;;  %v2536_v55 = vshll.u32 %v7301_v38, 16  ;;  %v7311_v31 = vld [vmem:[%s11285_s0 + $0x6c] sm:$0x1]  ;;  %v7312_v28 = vld [vmem:[%s11285_s0 + $0x70] sm:$0xf]  ;;  %v2562_v38 = vrot.slane %v2561_v27, 4 }
  0xa9   :  { %8160 = vmatprep.mubr.bf16.mxu1 %v8654_v40  ;;  %v2515_v40 = vrot.slane %v2513_v32, 4  ;;  %v2497_v46 = vsel %vm9054_vm2, %v2492_v35, %v2496_v23  ;;  %v2583_v32 = vshrl.u32 %v7308_v16, 16  ;;  %v2597_v35 = vshrl.u32 %v7310_v22, 16  ;;  %v7314_v36 = vld [vmem:[%s11285_s0 + $0x78] sm:$0xf] }
  0xaa   :  { %v7337_v52 = vcombine.low %v2483_v39, %v2497_v46  ;;  %v2506_v57 = vrot.slane %v2505_v47, 4  ;;  %v2538_v62 = vrot.slane %v2536_v55, 5  ;;  %v2567_v47 = vsel %vm9054_vm2, %v2562_v38, %v2566_v25 }
  0xab   :  { %8179 = vmatpush3.bf16.msra.mxu0 %v8656_v37  ;;  %v2510_v37 = vrot.slane %v2508_v29, 5  ;;  %v2606_v55 = vshll.u32 %v7311_v31, 16  ;;  %v2611_v56 = vshrl.u32 %v7312_v28, 16  ;;  %v2625_v60 = vshrl.u32 %v7314_v36, 16 }
  0xac   :  { %8180 = vmatprep.subr.bf16.mxu0 %v8659_v41 }
  0xad   :  { %v2511_v2 = vsel %vm9054_vm2, %v2506_v57, %v2510_v37  ;;  %v2614_v57 = vshll.u32 %v7312_v28, 16  ;;  %v2613_v0 = vrot.slane %v2611_v56, 4  ;;  %v2627_v5 = vrot.slane %v2625_v60, 4 }
  0xae   :  { %8133 = vmatmul.mubr.bf16.gmra.mxu0 %v8658_v42  ;;  %v2522_v42 = vshll.u32 %v7299_v50, 16 }
  0xaf   :  { %8181 = vmatpush3.bf16.msra.mxu0 %v8659_v41  ;;  %v2516_v41 = vshll.u32 %v7298_v20, 16  ;;  %8184 = vmatprep.mubr.bf16.mxu0 %v7336_v34  ;;  %v2572_v20 = vshll.u32 %v7306_v1, 16  ;;  %v2592_v34 = vshll.u32 %v7309_v21, 16 }
  0xb0   :  { %8182 = vmatprep.subr.bf16.mxu0 %v8662_v53  ;;  %8161 = vmatmul.mubr.bf16.gmra.mxu1 %v8655_v45  ;;  %v2524_v54 = vrot.slane %v2522_v42, 5  ;;  %v2529_v45 = vrot.slane %v2527_v49, 4  ;;  %v2599_v49 = vrot.slane %v2597_v35, 4 }
  0xb1   :  { %8164 = vmatprep.mubr.bf16.mxu1 %v8660_v63  ;;  %v2544_v63 = vshll.u32 %v7302_v43, 16  ;;  %v2574_v29 = vrot.slane %v2572_v20, 5  ;;  %v2585_v43 = vrot.slane %v2583_v32, 4  ;;  %v2594_v46 = vrot.slane %v2592_v34, 5 }
  0xb2   :  { %v2533_v3 = vor.u32 %v2532_v58, %v2529_v45  ;;  %v7317_v45 = vld [vmem:[%s11285_s0 + $0x84] sm:$0x1] }
  0xb3   :  { %8183 = vmatpush3.bf16.msra.mxu0 %v8662_v53  ;;  %v2518_v53 = vrot.slane %v2516_v41, 5  ;;  %v2546_v7 = vrot.slane %v2544_v63, 5  ;;  %v2575_v39 = vor.u32 %v2574_v29, %v2571_v26  ;;  %v7313_v41 = vld [vmem:[%s11285_s0 + $0x74] sm:$0x1]  ;;  %v2648_v15 = vshll.u32 %v7317_v45, 16 }
  0xb4   :  { %v2534_v12 = vrot.slane %v2533_v3, 4  ;;  %v2620_v1 = vshll.u32 %v7313_v41, 16  ;;  %v2608_v3 = vrot.slane %v2606_v55, 5 }
  0xb5   :  { %v2519_v61 = vor.u32 %v2518_v53, %v2515_v40  ;;  %v2547_v18 = vor.u32 %v2546_v7, %v2543_v4  ;;  %v2580_v40 = vrot.slane %v2578_v30, 5  ;;  %v2576_v48 = vrot.slane %v2575_v39, 4  ;;  %v7316_v53 = vld [vmem:[%s11285_s0 + $0x80] sm:$0xf] }
  0xb6   :  { %8185 = vmatmul.mubr.bf16.vlgmr.msra.gmra.mxu0 %v7337_v52  ;;  %v2539_v24 = vsel %vm9054_vm2, %v2534_v12, %v2538_v62  ;;  %v7315_v52 = vld [vmem:[%s11285_s0 + $0x7c] sm:$0x1]  ;;  %v2616_v4 = vrot.slane %v2614_v57, 5  ;;  %v2628_v7 = vshll.u32 %v7314_v36, 16  ;;  %v2639_v11 = vshrl.u32 %v7316_v53, 16 }
  0xb7   :  { %v2520_v6 = vrot.slane %v2519_v61, 4  ;;  %v2548_v50 = vrot.slane %v2547_v18, 4  ;;  %v2581_v58 = vsel %vm9054_vm2, %v2576_v48, %v2580_v40  ;;  %v7318_v61 = vld [vmem:[%s11285_s0 + $0x88] sm:$0xf]  ;;  %v2642_v14 = vshll.u32 %v7316_v53, 16 }
  0xb8   :  { %8165 = vmatmul.mubr.bf16.gmra.mxu1 %v8661_v44  ;;  %v2588_v44 = vrot.slane %v2586_v33, 5  ;;  %v7340_v62 = vcombine.low %v2567_v47, %v2581_v58  ;;  %v2617_v13 = vor.u32 %v2616_v4, %v2613_v0  ;;  %v2622_v16 = vrot.slane %v2620_v1, 5 }
  0xb9   :  { %v2525_v17 = vsel %vm9054_vm2, %v2520_v6, %v2524_v54  ;;  %v2553_v37 = vsel %vm9054_vm2, %v2548_v50, %v2552_v9  ;;  %v2634_v9 = vshll.u32 %v7315_v52, 16  ;;  %v2641_v18 = vrot.slane %v2639_v11, 4 }
  0xba   :  { %v7338_v23 = vcombine.low %v2511_v2, %v2525_v17  ;;  %v7339_v42 = vcombine.low %v2539_v24, %v2553_v37  ;;  %v2589_v54 = vor.u32 %v2588_v44, %v2585_v43  ;;  %v2603_v2 = vor.u32 %v2602_v59, %v2599_v49 }
  0xbb   :  { %v2630_v17 = vrot.slane %v2628_v7, 5  ;;  %v2653_v19 = vshrl.u32 %v7318_v61, 16  ;;  %v2618_v21 = vrot.slane %v2617_v13, 4  ;;  %v2636_v22 = vrot.slane %v2634_v9, 5 }
  0xbc   :  { %8188 = vmatprep.mubr.bf16.mxu0 %v7338_v23  ;;  %v2590_v63 = vrot.slane %v2589_v54, 4  ;;  %v2604_v12 = vrot.slane %v2603_v2, 4  ;;  %v2644_v23 = vrot.slane %v2642_v14, 5  ;;  %v2656_v50 = vshll.u32 %v7318_v61, 16 }
  0xbd   :  { %v2631_v25 = vor.u32 %v2630_v17, %v2627_v5  ;;  %v2655_v26 = vrot.slane %v2653_v19, 4  ;;  %v2650_v29 = vrot.slane %v2648_v15, 5  ;;  %v2662_v30 = vshll.u32 %v7319_v10, 16 }
  0xbe   :  { %8189 = vmatmul.mubr.bf16.gmra.mxu0 %v7339_v42  ;;  %v2595_v6 = vsel %vm9054_vm2, %v2590_v63, %v2594_v46  ;;  %v2609_v20 = vsel %vm9054_vm2, %v2604_v12, %v2608_v3  ;;  %v2645_v27 = vor.u32 %v2644_v23, %v2641_v18  ;;  %v2623_v31 = vsel %vm9054_vm2, %v2618_v21, %v2622_v16 }
  0xbf   :  { %8192 = vmatprep.mubr.bf16.mxu0 %v7340_v62  ;;  %v7341_v24 = vcombine.low %v2595_v6, %v2609_v20  ;;  %v2632_v28 = vrot.slane %v2631_v25, 4  ;;  %v2658_v32 = vrot.slane %v2656_v50, 5  ;;  %v2664_v34 = vrot.slane %v2662_v30, 5 }
  0xc0   :  { %v2646_v33 = vrot.slane %v2645_v27, 4 }
  0xc1   :  { %v2637_v35 = vsel %vm9054_vm2, %v2632_v28, %v2636_v22  ;;  %v2659_v36 = vor.u32 %v2658_v32, %v2655_v26 }
  0xc2   :  { %v7342_v37 = vcombine.low %v2623_v31, %v2637_v35  ;;  %v2651_v38 = vsel %vm9054_vm2, %v2646_v33, %v2650_v29 }
  0xc3   :  { %v2660_v39 = vrot.slane %v2659_v36, 4 }
  0xc5   :  { %v2665_v40 = vsel %vm9054_vm2, %v2660_v39, %v2664_v34 }
  0xc6   :  { %8193 = vmatmul.mubr.bf16.gmra.mxu0 %v7341_v24  ;;  %v7343_v41 = vcombine.low %v2651_v38, %v2665_v40 }
  0xc7   :  { %8196 = vmatprep.mubr.bf16.mxu0 %v7342_v37 }
  0xce   :  { %8197 = vmatmul.mubr.bf16.gmra.mxu0 %v7343_v41 }
  0xef   :  { %v7930_v42 = vpop.f32.mrf.mxu0 }
  0xf0   :  { %v7962_v43 = vpop.f32.mrf.mxu1 }
  0xf1   :  { %v449_v44 = vadd.f32 %v7962_v43, %v7930_v42  ;;  %v247_v46 = vpop.f32.mrf.mxu0 }
  0xf2   :  { %v440_v47 = vpop.f32.mrf.mxu1 }
  0xf3   :  { %v441_v48 = vadd.f32 %v440_v47, %v247_v46  ;;  %v7931_v49 = vpop.f32.mrf.mxu0 }
  0xf4   :  { %v7963_v51 = vpop.f32.mrf.mxu1 }
  0xf5   :  { %v452_v52 = vadd.f32 %v7963_v51, %v7931_v49  ;;  %v9652_v53 = vpop.f32.mrf.mxu0 }
  0xf6   :  { %v9654_v54 = vpop.f32.mrf.mxu1 }
  0xf7   :  { %v7934_v55 = vpop.f32.mrf.mxu0 }
  0xf8   :  { %v7966_v56 = vpop.f32.mrf.mxu1 }
  0xf9   :  { %v465_v57 = vadd.f32 %v7966_v56, %v7934_v55  ;;  %v263_v45 = vpop.f32.mrf.mxu0 }
  0xfa   :  { %v456_v58 = vpop.f32.mrf.mxu1 }
  0xfb   :  { %v457_v59 = vadd.f32 %v456_v58, %v263_v45  ;;  %v7935_v60 = vpop.f32.mrf.mxu0 }
  0xfc   :  { %v7967_v61 = vpop.f32.mrf.mxu1 }
  0xfd   :  { %v468_v62 = vadd.f32 %v7967_v61, %v7935_v60  ;;  %v9656_v63 = vpop.f32.mrf.mxu0 }
  0xfe   :  { %v9658_v0 = vpop.f32.mrf.mxu1 }
  0xff   :  { %v7938_v1 = vpop.f32.mrf.mxu0 }
 0x100   :  { %v7970_v2 = vpop.f32.mrf.mxu1 }
 0x101   :  { %v481_v3 = vadd.f32 %v7970_v2, %v7938_v1  ;;  %v279_v4 = vpop.f32.mrf.mxu0 }
 0x102   :  { %v472_v5 = vpop.f32.mrf.mxu1 }
 0x103   :  { %v473_v6 = vadd.f32 %v472_v5, %v279_v4  ;;  %v7939_v7 = vpop.f32.mrf.mxu0 }
 0x104   :  { %v7971_v9 = vpop.f32.mrf.mxu1 }
 0x105   :  { %v484_v10 = vadd.f32 %v7971_v9, %v7939_v7  ;;  %v9660_v11 = vpop.f32.mrf.mxu0 }
 0x106   :  { %v9662_v12 = vpop.f32.mrf.mxu1 }
 0x107   :  { %v7942_v13 = vpop.f32.mrf.mxu0 }
 0x108   :  { %v7974_v14 = vpop.f32.mrf.mxu1 }
 0x109   :  { %v497_v15 = vadd.f32 %v7974_v14, %v7942_v13  ;;  %v295_v16 = vpop.f32.mrf.mxu0 }
 0x10a   :  { %v488_v17 = vpop.f32.mrf.mxu1 }
 0x10b   :  { %v489_v18 = vadd.f32 %v488_v17, %v295_v16  ;;  %v7943_v19 = vpop.f32.mrf.mxu0 }
 0x10c   :  { %v7975_v20 = vpop.f32.mrf.mxu1 }
 0x10d   :  { %v500_v21 = vadd.f32 %v7975_v20, %v7943_v19  ;;  %v9664_v22 = vpop.f32.mrf.mxu0 }
 0x10e   :  { %11304 = vst [vmem:[#allocation10_spill] sm:$0xff] %v9664_v22  ;;  %v9666_v23 = vpop.f32.mrf.mxu1  ;;  %v8680_v22 = vld [vmem:[#allocation3 + $0x48] sm:$0xff]  }
 0x10f   :  { %11305 = vst [vmem:[#allocation11_spill] sm:$0xff] %v9666_v23  ;;  %v7994_v24 = vpop.f32.mrf.mxu0 }
 0x110   :  { %v958_v25 = vadd.f32 %v7994_v24, %v449_v44  ;;  %v8026_v26 = vpop.f32.mrf.mxu1 }
 0x111   :  { %v893_v50 = vpop.f32.mrf.mxu0 }
 0x112   :  { %v9668_v27 = vadd.f32 %v893_v50, %v441_v48  ;;  %v1201_v29 = vadd.f32 %v8026_v26, %v958_v25  ;;  %v9670_v30 = vpop.f32.mrf.mxu1 }
 0x113   :  { %v7995_v31 = vpop.f32.mrf.mxu0 }
 0x114   :  { %v9672_v28 = vadd.f32 %v7995_v31, %v452_v52  ;;  %v9674_v32 = vpop.f32.mrf.mxu1 }
 0x115   :  { %v9678_v34 = vpop.f32.mrf.mxu0 }
 0x116   :  { %v9676_v33 = vpop.f32.mrf.mxu1 }
 0x117   :  { %v7998_v37 = vpop.f32.mrf.mxu0 }
 0x118   :  { %v8030_v35 = vpop.f32.mrf.mxu1  ;;  %v962_v38 = vadd.f32 %v7998_v37, %v465_v57 }
 0x119   :  { %v909_v40 = vpop.f32.mrf.mxu0 }
 0x11a   :  { %v9680_v36 = vpop.f32.mrf.mxu1  ;;  %v9684_v41 = vadd.f32 %v909_v40, %v457_v59  ;;  %v1205_v42 = vadd.f32 %v8030_v35, %v962_v38 }
 0x11b   :  { %v7999_v43 = vpop.f32.mrf.mxu0 }
 0x11c   :  { %v9682_v39 = vpop.f32.mrf.mxu1  ;;  %v9686_v44 = vadd.f32 %v7999_v43, %v468_v62 }
 0x11d   :  { %v9690_v47 = vpop.f32.mrf.mxu0 }
 0x11e   :  { %v9688_v46 = vpop.f32.mrf.mxu1 }
 0x120   :  { %v8034_v48 = vpop.f32.mrf.mxu1 }
 0x122   :  { %v8002_v49 = vpop.f32.mrf.mxu0  ;;  %v9692_v51 = vpop.f32.mrf.mxu1 }
 0x123   :  { %v966_v52 = vadd.f32 %v8002_v49, %v481_v3 }
 0x124   :  { %v925_v55 = vpop.f32.mrf.mxu0  ;;  %v9696_v58 = vpop.f32.mrf.mxu1 }
 0x125   :  { %v9694_v56 = vadd.f32 %v925_v55, %v473_v6  ;;  %v1209_v57 = vadd.f32 %v8034_v48, %v966_v52 }
 0x126   :  { %v8003_v45 = vpop.f32.mrf.mxu0  ;;  %v9700_v60 = vpop.f32.mrf.mxu1 }
 0x127   :  { %v9698_v59 = vadd.f32 %v8003_v45, %v484_v10 }
 0x128   :  { %v9702_v61 = vpop.f32.mrf.mxu0  ;;  %v8038_v62 = vpop.f32.mrf.mxu1 }
 0x12a   :  { %v9706_v7 = vpop.f32.mrf.mxu1 }
 0x12b   :  { %11307 = vst [vmem:[#allocation13_spill] sm:$0xff] %v9706_v7 }
 0x12c   :  { %v9712_v10 = vpop.f32.mrf.mxu1 }
 0x12d   :  { %11310 = vst [vmem:[#allocation16_spill] sm:$0xff] %v9712_v10 }
 0x12e   :  { %v8006_v1 = vpop.f32.mrf.mxu0  ;;  %v9718_v19 = vpop.f32.mrf.mxu1 }
 0x12f   :  { %v970_v2 = vadd.f32 %v8006_v1, %v497_v15  ;;  %11311 = vst [vmem:[#allocation17_spill] sm:$0xff] %v9718_v19 }
 0x130   :  { %v941_v4 = vpop.f32.mrf.mxu0 }
 0x131   :  { %v9704_v5 = vadd.f32 %v941_v4, %v489_v18  ;;  %v1213_v3 = vadd.f32 %v8038_v62, %v970_v2  ;;  %v8663_v62 = vld [vmem:[#allocation3 + $0x38] sm:$0xff]   ;;  %v8664_v4 = vld [vmem:[#allocation3 + $0x30] sm:$0xff]  }
 0x132   :  { %v8007_v6 = vpop.f32.mrf.mxu0  ;;  %8232 = vmatprep.subr.bf16.mxu0 %v8663_v62 }
 0x133   :  { %11306 = vst [vmem:[#allocation12_spill] sm:$0xff] %v9704_v5  ;;  %v9708_v9 = vadd.f32 %v8007_v6, %v500_v21  ;;  %8233 = vmatpush3.bf16.msra.mxu0 %v8663_v62 }
 0x134   :  { %v9710_v13 = vpop.f32.mrf.mxu0  ;;  %8234 = vmatprep.subr.bf16.mxu0 %v8664_v4 }
 0x135   :  { %11308 = vst [vmem:[#allocation14_spill] sm:$0xff] %v9708_v9  ;;  %11309 = vst [vmem:[#allocation15_spill] sm:$0xff] %v9710_v13  ;;  %v8670_v9 = vld [vmem:[#allocation3 + $0x68] sm:$0xff]  }
 0x136   :  { %v8058_v14 = vpop.f32.mrf.mxu0 }
 0x137   :  { %v9714_v16 = vadd.f32 %v8058_v14, %v1201_v29  ;;  %8235 = vmatpush3.bf16.msra.mxu0 %v8664_v4  ;;  %v8668_v4 = vld [vmem:[#allocation3 + $0x70] sm:$0xff]  }
 0x138   :  { %v9716_v17 = vpop.f32.mrf.mxu0  ;;  %v9724_v20 = vpop.f32.mrf.mxu1  ;;  %8202 = vmatprep.subr.bf16.mxu1 %v8668_v4 }
 0x139   :  { %8203 = vmatpush3.bf16.msra.mxu1 %v8668_v4  ;;  %v8673_v4 = vld [vmem:[#allocation3 + $0x8] sm:$0xff]  }
 0x13a   :  { %v9720_v15 = vpop.f32.mrf.mxu0  ;;  %v9726_v21 = vpop.f32.mrf.mxu1  ;;  %8204 = vmatprep.subr.bf16.mxu1 %v8670_v9 }
 0x13c   :  { %v9722_v18 = vpop.f32.mrf.mxu0  ;;  %v9734_v29 = vpop.f32.mrf.mxu1 }
 0x13d   :  { %8205 = vmatpush3.bf16.msra.mxu1 %v8670_v9  ;;  %v8676_v9 = vld [vmem:[#allocation3 + $0x50] sm:$0xff]  }
 0x13e   :  { %v8062_v24 = vpop.f32.mrf.mxu0  ;;  %v9738_v35 = vpop.f32.mrf.mxu1 }
 0x13f   :  { %v9728_v25 = vadd.f32 %v8062_v24, %v1205_v42  ;;  %v8665_v24 = vld [vmem:[#allocation3 + $0x28] sm:$0xff]  }
 0x140   :  { %v9730_v26 = vpop.f32.mrf.mxu0  ;;  %8236 = vmatprep.subr.bf16.mxu0 %v8665_v24 }
 0x141   :  { %8237 = vmatpush3.bf16.msra.mxu0 %v8665_v24 }
 0x142   :  { %v9732_v50 = vpop.f32.mrf.mxu0  ;;  %v9744_v43 = vpop.f32.mrf.mxu1 }
 0x144   :  { %v9736_v31 = vpop.f32.mrf.mxu0  ;;  %v9748_v42 = vpop.f32.mrf.mxu1 }
 0x146   :  { %v8066_v37 = vpop.f32.mrf.mxu0  ;;  %v9750_v49 = vpop.f32.mrf.mxu1 }
 0x147   :  { %v9740_v38 = vadd.f32 %v8066_v37, %v1209_v57 }
 0x148   :  { %v9742_v40 = vpop.f32.mrf.mxu0  ;;  %v9754_v55 = vpop.f32.mrf.mxu1 }
 0x149   :  { %11312 = vst [vmem:[#allocation18_spill] sm:$0xff] %v9740_v38 }
 0x14a   :  { %v9746_v48 = vpop.f32.mrf.mxu0 }
 0x14b   :  { %11313 = vst [vmem:[#allocation19_spill] sm:$0xff] %v9746_v48  ;;  %v9800_v48 = vld [vmem:[#allocation3 + $0xf8] sm:$0xff]  }
 0x14c   :  { %v9752_v52 = vpop.f32.mrf.mxu0  ;;  %11329 = vst [vmem:[#allocation35_spill] sm:$0xff] %v9800_v48 }
 0x14d   :  { %11314 = vst [vmem:[#allocation20_spill] sm:$0xff] %v9752_v52 }
 0x14e   :  { %v8070_v45 = vpop.f32.mrf.mxu0 }
 0x14f   :  { %v9756_v1 = vadd.f32 %v8070_v45, %v1213_v3  ;;  %v8828_v3 = vmov 0   ;;  %v8667_v45 = vld [vmem:[#allocation3 + $0x20] sm:$0xff]  }
 0x150   :  { %v9758_v57 = vpop.f32.mrf.mxu0  ;;  %v9760_v2 = vpop.f32.mrf.mxu1  ;;  %3038 = vst [vmem:[#allocation2 + $0x80] sm:$0xf] %v8828_v3  ;;  %3039 = vst [vmem:[#allocation2 + $0x84] sm:$0x1] %v8828_v3  ;;  %8238 = vmatprep.subr.bf16.mxu0 %v8667_v45 }
 0x151   :  { %11315 = vst [vmem:[#allocation21_spill] sm:$0xff] %v9756_v1  ;;  %11316 = vst [vmem:[#allocation22_spill] sm:$0xff] %v9758_v57  ;;  %8239 = vmatpush3.bf16.msra.mxu0 %v8667_v45  ;;  %v8671_v57 = vld [vmem:[#allocation3 + $0x10] sm:$0xff]   ;;  %v8672_v45 = vld [vmem:[#allocation3 + $0x60] sm:$0xff]  }
 0x152   :  { %11317 = vst [vmem:[#allocation23_spill] sm:$0xff] %v9760_v2  ;;  %v9762_v6 = vpop.f32.mrf.mxu1  ;;  %v9764_v14 = vpop.f32.mrf.mxu0  ;;  %3006 = vst [vmem:[#allocation2] sm:$0xf] %v8828_v3  ;;  %8206 = vmatprep.subr.bf16.mxu1 %v8672_v45 }
 0x153   :  { %11318 = vst [vmem:[#allocation24_spill] sm:$0xff] %v9762_v6  ;;  %11319 = vst [vmem:[#allocation25_spill] sm:$0xff] %v9764_v14  ;;  %v8669_v14 = vld [vmem:[#allocation3 + $0x18] sm:$0xff]   ;;  %8207 = vmatpush3.bf16.msra.mxu1 %v8672_v45 }
 0x154   :  { %v9766_v37 = vpop.f32.mrf.mxu1  ;;  %v9768_v10 = vpop.f32.mrf.mxu0  ;;  %3007 = vst [vmem:[#allocation2 + $0x4] sm:$0x1] %v8828_v3  ;;  %3008 = vst [vmem:[#allocation2 + $0x8] sm:$0xf] %v8828_v3  ;;  %8240 = vmatprep.subr.bf16.mxu0 %v8669_v14 }
 0x155   :  { %11320 = vst [vmem:[#allocation26_spill] sm:$0xff] %v9766_v37  ;;  %11321 = vst [vmem:[#allocation27_spill] sm:$0xff] %v9768_v10  ;;  %8241 = vmatpush3.bf16.msra.mxu0 %v8669_v14  ;;  %v8675_v14 = vld [vmem:[#allocation3] sm:$0xff]  }
 0x156   :  { %3009 = vst [vmem:[#allocation2 + $0xc] sm:$0x1] %v8828_v3  ;;  %3010 = vst [vmem:[#allocation2 + $0x10] sm:$0xf] %v8828_v3  ;;  %v9770_v62 = vpop.f32.mrf.mxu1  ;;  %v9772_v24 = vpop.f32.mrf.mxu0  ;;  %8242 = vmatprep.subr.bf16.mxu0 %v8671_v57 }
 0x157   :  { %3011 = vst [vmem:[#allocation2 + $0x14] sm:$0x1] %v8828_v3  ;;  %3012 = vst [vmem:[#allocation2 + $0x18] sm:$0xf] %v8828_v3 }
 0x158   :  { %3013 = vst [vmem:[#allocation2 + $0x1c] sm:$0x1] %v8828_v3  ;;  %3014 = vst [vmem:[#allocation2 + $0x20] sm:$0xf] %v8828_v3  ;;  %v9774_v1 = vpop.f32.mrf.mxu0  ;;  %v9776_v10 = vpop.f32.mrf.mxu1 }
 0x159   :  { %3015 = vst [vmem:[#allocation2 + $0x24] sm:$0x1] %v8828_v3  ;;  %3016 = vst [vmem:[#allocation2 + $0x28] sm:$0xf] %v8828_v3  ;;  %8243 = vmatpush3.bf16.msra.mxu0 %v8671_v57 }
 0x15a   :  { %3017 = vst [vmem:[#allocation2 + $0x2c] sm:$0x1] %v8828_v3  ;;  %3018 = vst [vmem:[#allocation2 + $0x30] sm:$0xf] %v8828_v3  ;;  %v9778_v19 = vpop.f32.mrf.mxu0  ;;  %v9780_v8 = vpop.f32.mrf.mxu1  ;;  %8244 = vmatprep.subr.bf16.mxu0 %v8673_v4 }
 0x15b   :  { %3019 = vst [vmem:[#allocation2 + $0x34] sm:$0x1] %v8828_v3  ;;  %3020 = vst [vmem:[#allocation2 + $0x38] sm:$0xf] %v8828_v3 }
 0x15c   :  { %3021 = vst [vmem:[#allocation2 + $0x3c] sm:$0x1] %v8828_v3  ;;  %3022 = vst [vmem:[#allocation2 + $0x40] sm:$0xf] %v8828_v3  ;;  %v9784_v37 = vpop.f32.mrf.mxu1 }
 0x15d   :  { %3023 = vst [vmem:[#allocation2 + $0x44] sm:$0x1] %v8828_v3  ;;  %3024 = vst [vmem:[#allocation2 + $0x48] sm:$0xf] %v8828_v3  ;;  %8245 = vmatpush3.bf16.msra.mxu0 %v8673_v4  ;;  %v444_v4 = vadd.f32 %v9654_v54, %v9652_v53 }
 0x15e   :  { %3025 = vst [vmem:[#allocation2 + $0x4c] sm:$0x1] %v8828_v3  ;;  %3026 = vst [vmem:[#allocation2 + $0x50] sm:$0xf] %v8828_v3  ;;  %v9788_v2 = vpop.f32.mrf.mxu1  ;;  %8246 = vmatprep.subr.bf16.mxu0 %v8675_v14 }
 0x15f   :  { %3027 = vst [vmem:[#allocation2 + $0x54] sm:$0x1] %v8828_v3  ;;  %3028 = vst [vmem:[#allocation2 + $0x58] sm:$0xf] %v8828_v3 }
 0x160   :  { %3029 = vst [vmem:[#allocation2 + $0x5c] sm:$0x1] %v8828_v3  ;;  %3030 = vst [vmem:[#allocation2 + $0x60] sm:$0xf] %v8828_v3 }
 0x161   :  { %3031 = vst [vmem:[#allocation2 + $0x64] sm:$0x1] %v8828_v3  ;;  %3032 = vst [vmem:[#allocation2 + $0x68] sm:$0xf] %v8828_v3  ;;  %8247 = vmatpush3.bf16.msra.mxu0 %v8675_v14  ;;  %v957_v14 = vadd.f32 %v9678_v34, %v444_v4 }
 0x162   :  { %3033 = vst [vmem:[#allocation2 + $0x6c] sm:$0x1] %v8828_v3  ;;  %3034 = vst [vmem:[#allocation2 + $0x70] sm:$0xf] %v8828_v3  ;;  %8296 = vmatprep.subr.bf16.mxu0 %v9800_v48 }
 0x163   :  { %3035 = vst [vmem:[#allocation2 + $0x74] sm:$0x1] %v8828_v3  ;;  %3036 = vst [vmem:[#allocation2 + $0x78] sm:$0xf] %v8828_v3  ;;  %v1200_v53 = vadd.f32 %v9676_v33, %v957_v14  ;;  %v460_v33 = vadd.f32 %v9658_v0, %v9656_v63 }
 0x164   :  { %3037 = vst [vmem:[#allocation2 + $0x7c] sm:$0x1] %v8828_v3  ;;  %3040 = vst [vmem:[#allocation2 + $0x88] sm:$0xf] %v8828_v3 }
 0x165   :  { %3041 = vst [vmem:[#allocation2 + $0x8c] sm:$0x1] %v8828_v3  ;;  %3042 = vst [vmem:[#allocation2 + $0x90] sm:$0xf] %v8828_v3  ;;  %v1443_v34 = vadd.f32 %v9722_v18, %v1200_v53  ;;  %v961_v18 = vadd.f32 %v9690_v47, %v460_v33 }
 0x166   :  { %3043 = vst [vmem:[#allocation2 + $0x94] sm:$0x1] %v8828_v3  ;;  %3044 = vst [vmem:[#allocation2 + $0x98] sm:$0xf] %v8828_v3 }
 0x167   :  { %3045 = vst [vmem:[#allocation2 + $0x9c] sm:$0x1] %v8828_v3  ;;  %11322 = vst [vmem:[#allocation28_spill] sm:$0xff] %v9770_v62  ;;  %v9782_v3 = vpop.f32.mrf.mxu0 }
 0x168   :  { %11323 = vst [vmem:[#allocation29_spill] sm:$0xff] %v9776_v10  ;;  %11324 = vst [vmem:[#allocation30_spill] sm:$0xff] %v9780_v8  ;;  %v8674_v10 = vld [vmem:[#allocation3 + $0x58] sm:$0xff]   ;;  %v8154_v8 = vpop.f32.mrf.mxu1 }
 0x169   :  { %11325 = vst [vmem:[#allocation31_spill] sm:$0xff] %v9784_v37  ;;  %v9786_v62 = vpop.f32.mrf.mxu0  ;;  %11326 = vst [vmem:[#allocation32_spill] sm:$0xff] %v9788_v2  ;;  %8208 = vmatprep.subr.bf16.mxu1 %v8674_v10 }
 0x16a   :  { %v2331_v37 = vpop.f32.mrf.mxu1  ;;  %8209 = vmatpush3.bf16.msra.mxu1 %v8674_v10 }
 0x16b   :  { %v9790_v38 = vpop.f32.mrf.mxu0  ;;  %8210 = vmatprep.subr.bf16.mxu1 %v8676_v9 }
 0x16c   :  { %v8155_v5 = vpop.f32.mrf.mxu1 }
 0x16d   :  { %v9792_v13 = vpop.f32.mrf.mxu0 }
 0x16e   :  { %v2334_v57 = vpop.f32.mrf.mxu1  ;;  %8211 = vmatpush3.bf16.msra.mxu1 %v8676_v9 }
 0x16f   :  { %v9794_v7 = vpop.f32.mrf.mxu0  ;;  %8212 = vmatprep.subr.bf16.mxu1 %v8680_v22 }
 0x170   :  { %v9807_v10 = vpop.f32.mrf.mxu1 }
 0x171   :  { %v9796_v2 = vpop.f32.mrf.mxu0 }
 0x172   :  { %11327 = vst [vmem:[#allocation33_spill] sm:$0xff] %v9796_v2  ;;  %8213 = vmatpush3.bf16.msra.mxu1 %v8680_v22  ;;  %v8683_v2 = vld [vmem:[#allocation3 + $0x40] sm:$0xff]   ;;  %v1202_v22 = vadd.f32 %v9674_v32, %v9672_v28  ;;  %v1203_v32 = vadd.f32 %v9680_v36, %v9684_v41 }
 0x173   :  { %v9798_v45 = vpop.f32.mrf.mxu0  ;;  %8214 = vmatprep.subr.bf16.mxu1 %v8683_v2 }
 0x174   :  { %11328 = vst [vmem:[#allocation34_spill] sm:$0xff] %v9798_v45  ;;  %v2347_v45 = vpop.f32.mrf.mxu1  ;;  %v1446_v0 = vadd.f32 %v9730_v26, %v1203_v32 }
 0x175   :  { %v9802_v23 = vpop.f32.mrf.mxu0 }
 0x176   :  { %11330 = vst [vmem:[#allocation36_spill] sm:$0xff] %v9802_v23  ;;  %v1199_v23 = vadd.f32 %v9670_v30, %v9668_v27  ;;  %8215 = vmatpush3.bf16.msra.mxu1 %v8683_v2  ;;  %v9825_v4 = vpop.f32.mrf.mxu1  ;;  %v1445_v27 = vadd.f32 %v9720_v15, %v1202_v22  ;;  %v1912_v26 = vadd.f32 %v9748_v42, %v1446_v0 }
 0x177   :  { %v9809_v52 = vpop.f32.mrf.mxu0 }
 0x178   :  { %v1442_v54 = vadd.f32 %v9716_v17, %v1199_v23  ;;  %v1910_v23 = vadd.f32 %v9724_v20, %v9714_v16  ;;  %v1909_v17 = vadd.f32 %v9738_v35, %v1443_v34  ;;  %v2350_v2 = vpop.f32.mrf.mxu1  ;;  %v1911_v15 = vadd.f32 %v9734_v29, %v1445_v27 }
 0x179   :  { %v9812_v9 = vpop.f32.mrf.mxu0  ;;  %v476_v29 = vadd.f32 %v9662_v12, %v9660_v11  ;;  %v2155_v12 = vadd.f32 %v9790_v38, %v1912_v26 }
 0x17a   :  { %11331 = vst [vmem:[#allocation37_spill] sm:$0xff] %v9812_v9  ;;  %v1908_v30 = vadd.f32 %v9726_v21, %v1442_v54  ;;  %v2153_v21 = vadd.f32 %v9772_v24, %v1910_v23  ;;  %v2152_v63 = vadd.f32 %v9782_v3, %v1909_v17  ;;  %v2154_v20 = vadd.f32 %v9778_v19, %v1911_v15  ;;  %v9846_v53 = vpop.f32.mrf.mxu1  ;;  %v11333_v15 = vld [vmem:[#allocation20_spill] sm:$0xff] }
 0x17b   :  { %v9816_v6 = vpop.f32.mrf.mxu0  ;;  %v1206_v24 = vadd.f32 %v9682_v39, %v9686_v44  ;;  %v2398_v23 = vadd.f32 %v2347_v45, %v2155_v12  ;;  %v11341_v12 = vld [vmem:[#allocation18_spill] sm:$0xff] }
 0x17c   :  { %v2151_v28 = vadd.f32 %v9774_v1, %v1908_v30  ;;  %v1204_v1 = vadd.f32 %v9688_v46, %v961_v18  ;;  %v2396_v41 = vadd.f32 %v8154_v8, %v2153_v21  ;;  %v2395_v47 = vadd.f32 %v2334_v57, %v2152_v63  ;;  %v2363_v39 = vpop.f32.mrf.mxu1 }
 0x17d   :  { %v9820_v48 = vpop.f32.mrf.mxu0  ;;  %v2397_v3 = vadd.f32 %v8155_v5, %v2154_v20  ;;  %v1207_v8 = vadd.f32 %v9692_v51, %v9694_v56  ;;  %v965_v57 = vadd.f32 %v9702_v61, %v476_v29  ;;  %v1449_v11 = vadd.f32 %v9732_v50, %v1206_v24 }
 0x17e   :  { %v2394_v35 = vadd.f32 %v2331_v37, %v2151_v28  ;;  %v1447_v19 = vadd.f32 %v9736_v31, %v1204_v1  ;;  %v1914_v51 = vadd.f32 %v9744_v43, %v9728_v25  ;;  %v9883_v28 = vpop.f32.mrf.mxu1  ;;  %v9885_v25 = vld [vmem:[#allocation3 + $0xb8] sm:$0xff]   ;;  %v11334_v1 = vld [vmem:[#allocation10_spill] sm:$0xff] }
 0x17f   :  { %v9827_v9 = vpop.f32.mrf.mxu0  ;;  %v1450_v61 = vadd.f32 %v9742_v40, %v1207_v8  ;;  %v1915_v30 = vadd.f32 %v9750_v49, %v1449_v11  ;;  %v1208_v40 = vadd.f32 %v9700_v60, %v965_v57  ;;  %8264 = vmatprep.subr.bf16.mxu1 %v9885_v25  ;;  %v11340_v57 = vld [vmem:[#allocation15_spill] sm:$0xff] }
 0x180   :  { %v1913_v56 = vadd.f32 %v9754_v55, %v1447_v19  ;;  %v2157_v33 = vadd.f32 %v9786_v62, %v1914_v51  ;;  %v11332_v62 = vld [vmem:[#allocation24_spill] sm:$0xff]  ;;  %v2366_v20 = vpop.f32.mrf.mxu1 }
 0x181   :  { %v8186_v14 = vpop.f32.mrf.mxu0  ;;  %v2158_v49 = vadd.f32 %v9792_v13, %v1915_v30  ;;  %v1916_v45 = vadd.f32 %v11332_v62, %v1450_v61  ;;  %v1451_v60 = vadd.f32 %v11333_v15, %v1208_v40  ;;  %v11348_v62 = vld [vmem:[#allocation36_spill] sm:$0xff] }
 0x182   :  { %v9856_v46 = vadd.f32 %v8186_v14, %v2396_v41  ;;  %v2156_v17 = vadd.f32 %v9794_v7, %v1913_v56  ;;  %v1210_v7 = vadd.f32 %v9696_v58, %v9698_v59  ;;  %v2400_v0 = vadd.f32 %v9807_v10, %v2157_v33  ;;  %v11337_v59 = vld [vmem:[#allocation34_spill] sm:$0xff]  ;;  %v8166_v56 = vpop.f32.mrf.mxu1  ;;  %v11346_v33 = vld [vmem:[#allocation33_spill] sm:$0xff] }
 0x183   :  { %v2797_v16 = vpop.f32.mrf.mxu0  ;;  %v2159_v29 = vadd.f32 %v11337_v59, %v1916_v45  ;;  %v2401_v26 = vadd.f32 %v9825_v4, %v2158_v49  ;;  %v11347_v49 = vld [vmem:[#allocation17_spill] sm:$0xff] }
 0x184   :  { %v9848_v54 = vadd.f32 %v2797_v16, %v2394_v35  ;;  %v2901_v50 = vmul.f32 %v9856_v46, %v9856_v46  ;;  %v2399_v16 = vadd.f32 %v2350_v2, %v2156_v17 }
 0x185   :  { %v8187_v36 = vpop.f32.mrf.mxu0 }
 0x186   :  { %v2899_v44 = vmul.f32 %v9848_v54, %v9848_v54  ;;  %v9867_v31 = vadd.f32 %v8187_v36, %v2397_v3  ;;  %v11335_v36 = vld [vmem:[#allocation11_spill] sm:$0xff]  ;;  %v11339_v3 = vld [vmem:[#allocation13_spill] sm:$0xff] }
 0x187   :  { %v2800_v37 = vpop.f32.mrf.mxu0  ;;  %v492_v41 = vadd.f32 %v11335_v36, %v11334_v1  ;;  %v11352_v36 = vld [vmem:[#allocation27_spill] sm:$0xff] }
 0x188   :  { %v9858_v22 = vadd.f32 %v2800_v37, %v2395_v47  ;;  %v2902_v43 = vmul.f32 %v9867_v31, %v9867_v31  ;;  %v11336_v47 = vld [vmem:[#allocation19_spill] sm:$0xff]  ;;  %v11338_v37 = vld [vmem:[#allocation12_spill] sm:$0xff] }
 0x189   :  { %v8190_v27 = vpop.f32.mrf.mxu0  ;;  %v1453_v58 = vadd.f32 %v11336_v47, %v1210_v7  ;;  %v1211_v8 = vadd.f32 %v11339_v3, %v11338_v37  ;;  %v969_v11 = vadd.f32 %v11340_v57, %v492_v41 }
 0x18a   :  { %v2878_v5 = vadd.f32 %v9858_v22, %v9848_v54  ;;  %v2900_v42 = vmul.f32 %v9858_v22, %v9858_v22  ;;  %v9908_v19 = vadd.f32 %v8190_v27, %v2400_v0  ;;  %v11345_v27 = vld [vmem:[#allocation22_spill] sm:$0xff] }
 0x18b   :  { %v2813_v32 = vpop.f32.mrf.mxu0  ;;  %v1454_v30 = vadd.f32 %v11345_v27, %v1211_v8  ;;  %v1212_v7 = vadd.f32 %v11347_v49, %v969_v11 }
 0x18c   :  { %v2879_v38 = vadd.f32 %v2878_v5, %v9856_v46  ;;  %v2915_v34 = vadd.f32 %v2900_v42, %v2899_v44  ;;  %v9892_v14 = vadd.f32 %v2813_v32, %v2398_v23  ;;  %v11342_v44 = vld [vmem:[#allocation23_spill] sm:$0xff]  ;;  %v11343_v42 = vld [vmem:[#allocation28_spill] sm:$0xff] }
 0x18d   :  { %v8191_v63 = vpop.f32.mrf.mxu0  ;;  %v1918_v5 = vadd.f32 %v11342_v44, %v11341_v12  ;;  %v1917_v51 = vadd.f32 %v11343_v42, %v1451_v60  ;;  %v2379_v60 = vpop.f32.mrf.mxu1  ;;  %v1455_v41 = vadd.f32 %v11352_v36, %v1212_v7 }
 0x18e   :  { %v2916_v55 = vadd.f32 %v2915_v34, %v2901_v50  ;;  %v2880_v18 = vadd.f32 %v2879_v38, %v9867_v31  ;;  %v2903_v13 = vmul.f32 %v9892_v14, %v9892_v14  ;;  %v9918_v61 = vadd.f32 %v8191_v63, %v2401_v26  ;;  %v11344_v38 = vld [vmem:[#allocation26_spill] sm:$0xff] }
 0x18f   :  { %v2816_v24 = vpop.f32.mrf.mxu0  ;;  %v1919_v34 = vadd.f32 %v11344_v38, %v1453_v58  ;;  %v2161_v23 = vadd.f32 %v11346_v33, %v1918_v5  ;;  %v2160_v17 = vadd.f32 %v9809_v52, %v1917_v51  ;;  %v8167_v11 = vpop.f32.mrf.mxu1  ;;  %v11355_v5 = vld [vmem:[#allocation29_spill] sm:$0xff]  ;;  %v11356_v51 = vld [vmem:[#allocation32_spill] sm:$0xff] }
 0x190   :  { %v2917_v21 = vadd.f32 %v2916_v55, %v2902_v43  ;;  %v2881_v35 = vadd.f32 %v2880_v18, %v9892_v14  ;;  %v9910_v2 = vadd.f32 %v2816_v24, %v2399_v16  ;;  %v2402_v43 = vadd.f32 %v2363_v39, %v2159_v29  ;;  %v11349_v39 = vld [vmem:[#allocation14_spill] sm:$0xff]  ;;  %v11350_v16 = vld [vmem:[#allocation16_spill] sm:$0xff] }
 0x191   :  { %v8194_v40 = vpop.f32.mrf.mxu0  ;;  %v2905_v55 = vmul.f32 %v9908_v19, %v9908_v19  ;;  %v2162_v45 = vadd.f32 %v11348_v62, %v1919_v34  ;;  %v2404_v47 = vadd.f32 %v9846_v53, %v2161_v23  ;;  %v2403_v59 = vadd.f32 %v2366_v20, %v2160_v17  ;;  %v11354_v20 = vld [vmem:[#allocation21_spill] sm:$0xff] }
 0x192   :  { %v2918_v10 = vadd.f32 %v2917_v21, %v2903_v13  ;;  %v2882_v4 = vadd.f32 %v2881_v35, %v9910_v2  ;;  %v2904_v50 = vmul.f32 %v9910_v2, %v9910_v2  ;;  %v2906_v21 = vmul.f32 %v9918_v61, %v9918_v61  ;;  %v11351_v13 = vld [vmem:[#allocation30_spill] sm:$0xff] }
 0x193   :  { %v2829_v15 = vpop.f32.mrf.mxu0  ;;  %v1214_v35 = vadd.f32 %v11350_v16, %v11349_v39  ;;  %v1920_v1 = vadd.f32 %v11351_v13, %v1454_v30  ;;  %v2405_v57 = vadd.f32 %v9883_v28, %v2162_v45  ;;  %v9948_v12 = vadd.f32 %v8194_v40, %v2404_v47  ;;  %v11357_v28 = vld [vmem:[#allocation31_spill] sm:$0xff]  ;;  %v11358_v30 = vld [vmem:[#allocation37_spill] sm:$0xff]  ;;  %v2382_v40 = vpop.f32.mrf.mxu1 }
 0x194   :  { %v2883_v32 = vadd.f32 %v2882_v4, %v9908_v19  ;;  %v2919_v18 = vadd.f32 %v2918_v10, %v2904_v50  ;;  %v9934_v0 = vadd.f32 %v2829_v15, %v2402_v43  ;;  %v11353_v10 = vld [vmem:[#allocation25_spill] sm:$0xff]  ;;  %v1922_v42 = vadd.f32 %v11355_v5, %v11354_v20 }
 0x195   :  { %v8195_v58 = vpop.f32.mrf.mxu0  ;;  %v1457_v37 = vadd.f32 %v11353_v10, %v1214_v35  ;;  %v2163_v3 = vadd.f32 %v9816_v6, %v1920_v1  ;;  %v1921_v4 = vadd.f32 %v11356_v51, %v1455_v41  ;;  %v2909_v43 = vmul.f32 %v9948_v12, %v9948_v12 }
 0x196   :  { %v2920_v63 = vadd.f32 %v2919_v18, %v2905_v55  ;;  %v2884_v52 = vadd.f32 %v2883_v32, %v9918_v61  ;;  %v2907_v24 = vmul.f32 %v9934_v0, %v9934_v0  ;;  %v9955_v50 = vadd.f32 %v8195_v58, %v2405_v57 }
 0x197   :  { %v2832_v8 = vpop.f32.mrf.mxu0  ;;  %v1923_v27 = vadd.f32 %v11357_v28, %v1457_v37  ;;  %v2165_v33 = vadd.f32 %v11358_v30, %v1922_v42  ;;  %v2406_v23 = vadd.f32 %v2379_v60, %v2163_v3  ;;  %v2164_v17 = vadd.f32 %v9827_v9, %v1921_v4 }
 0x198   :  { %v2885_v29 = vadd.f32 %v2884_v52, %v9934_v0  ;;  %v2921_v26 = vadd.f32 %v2920_v63, %v2906_v21  ;;  %v9950_v53 = vadd.f32 %v2832_v8, %v2403_v59  ;;  %v2910_v62 = vmul.f32 %v9955_v50, %v9955_v50 }
 0x199   :  { %v8198_v34 = vpop.f32.mrf.mxu0  ;;  %v2166_v49 = vadd.f32 %v9820_v48, %v1923_v27  ;;  %v2408_v9 = vadd.f32 %v8166_v56, %v2165_v33  ;;  %v2407_v21 = vadd.f32 %v2382_v40, %v2164_v17  ;;  %v9990_v33 = vld [vmem:[#allocation2] sm:$0xf]  ;;  %v9992_v17 = vld [vmem:[#allocation2 + $0x50] sm:$0xf] }
 0x19a   :  { %v2922_v44 = vadd.f32 %v2921_v26, %v2907_v24  ;;  %v2886_v38 = vadd.f32 %v2885_v29, %v9950_v53  ;;  %v2908_v6 = vmul.f32 %v9950_v53, %v9950_v53  ;;  %v3422_v40 = vshrl.u32 %v9990_v33, 16 }
 0x19b   :  { %v2845_v18 = vpop.f32.mrf.mxu0  ;;  %v2409_v35 = vadd.f32 %v8167_v11, %v2166_v49  ;;  %v9975_v48 = vadd.f32 %v8198_v34, %v2408_v9 }
 0x19c   :  { %v2887_v55 = vadd.f32 %v2886_v38, %v9948_v12  ;;  %v2923_v32 = vadd.f32 %v2922_v44, %v2908_v6  ;;  %v9967_v7 = vadd.f32 %v2845_v18, %v2406_v23  ;;  %v2947_v18 = vlaneseq }
 0x19d   :  { %v8199_v60 = vpop.f32.mrf.mxu0  ;;  %v2913_v47 = vmul.f32 %v9975_v48, %v9975_v48  ;;  %v3424_v49 = vrot.slane %v3422_v40, 4 }
 0x19e   :  { %v2924_v45 = vadd.f32 %v2923_v32, %v2909_v43  ;;  %v2888_v15 = vadd.f32 %v2887_v55, %v9955_v50  ;;  %v2911_v52 = vmul.f32 %v9967_v7, %v9967_v7  ;;  %v9979_v36 = vadd.f32 %v8199_v60, %v2409_v35  ;;  %v3405_v60 = vld [vmem:[#allocation2 + $0x4] sm:$0x1]  ;;  %v4032_v35 = vld [vmem:[#allocation2] sm:$0xe] }
 0x19f   :  { %v2848_v16 = vpop.f32.mrf.mxu0  ;;  %v3425_v43 = vshll.u32 %v9990_v33, 16  ;;  %v3534_v55 = vshrl.u32 %v9992_v17, 16  ;;  %v3537_v32 = vshll.u32 %v9992_v17, 16  ;;  %v2948_v9 = vshrl.u32 %v2947_v18, 7 }
 0x1a0   :  { %v2889_v63 = vadd.f32 %v2888_v15, %v9967_v7  ;;  %v2925_v39 = vadd.f32 %v2924_v45, %v2910_v62  ;;  %v9977_v13 = vadd.f32 %v2848_v16, %v2407_v21  ;;  %v2914_v29 = vmul.f32 %v9979_v36, %v9979_v36 }
 0x1a1   :  { %v3427_v62 = vrot.slane %v3425_v43, 5  ;;  %v3536_v45 = vrot.slane %v3534_v55, 4  ;;  %v3539_v15 = vrot.slane %v3537_v32, 5 }
 0x1a2   :  { %v2926_v1 = vadd.f32 %v2925_v39, %v2911_v52  ;;  %v2890_v41 = vadd.f32 %v2889_v63, %v9977_v13  ;;  %v2912_v56 = vmul.f32 %v9977_v13, %v9977_v13  ;;  %v3431_v63 = vshll.u32 %v3405_v60, 16  ;;  %v9998_v52 = vld [vmem:[#allocation2 + $0x54] sm:$0x1] }
 0x1a3   :  { %v3428_v21 = vor.u32 %v3427_v62, %v3424_v49  ;;  %v3540_v39 = vor.u32 %v3539_v15, %v3536_v45  ;;  %v3543_v16 = vshll.u32 %v9998_v52, 16 }
 0x1a4   :  { %v2891_v58 = vadd.f32 %v2890_v41, %v9975_v48  ;;  %v2927_v59 = vadd.f32 %v2926_v1, %v2912_v56  ;;  %v2876_v1 = vld [vmem:[%s11287_s2] sm:$0x1]  ;;  %v10004_v41 = vsub.s32 0, %v2948_v9 }
 0x1a5   :  { %v10006_v56 = vrot.slane %v3428_v21, 4 }
 0x1a6   :  { %v2892_v24 = vadd.f32 %v2891_v58, %v9979_v36  ;;  %v2928_v26 = vadd.f32 %v2927_v59, %v2913_v47  ;;  %11359 = vst [vmem:[#allocation24_spill] sm:$0xff] %v10004_v41  ;;  %v10008_v47 = vrot.slane %v3431_v63, 5  ;;  %v10010_v59 = vrot.slane %v3540_v39, 4 }
 0x1a8   :  { %v2893_v10 = vrot.slane %v2892_v24, 4  ;;  %v2929_v37 = vadd.f32 %v2928_v26, %v2914_v29  ;;  %v10012_v29 = vrot.slane %v3543_v16, 5  ;;  %v4085_v26 = vrot.slane %v3405_v60, 5 }
 0x1aa   :  { %v2894_v3 = vadd.f32 %v2893_v10, %v2892_v24  ;;  %v2930_v8 = vrot.slane %v2929_v37, 4  ;;  %v7400_v24 = vrot.slane %v4032_v35, 9 }
 0x1ac   :  { %v2895_v57 = vrot.slane %v2894_v3, 2  ;;  %v2931_v11 = vadd.f32 %v2930_v8, %v2929_v37  ;;  %v2877_v8 = vld [vmem:[%s11288_s3] sm:$0x1]  ;;  %v8772_v37 = vld [vmem:[%s11285_s0 + $0x208] ss:$8 sps:$4 sm:$0xff]  }
 0x1ae   :  { %v2896_v44 = vadd.f32 %v2895_v57, %v2894_v3  ;;  %v2932_v20 = vrot.slane %v2931_v11, 2  ;;  %v10018_v3 = vld [vmem:[#allocation2 + $0x50] sm:$0xe] }
 0x1b0   :  { %v2897_v5 = vrot.slane %v2896_v44, 1  ;;  %v2933_v42 = vadd.f32 %v2932_v20, %v2931_v11  ;;  %v3434_v20 = vsel %vm9054_vm2, %v10006_v56, %v10008_v47 }
 0x1b2   :  { %v2898_v51 = vadd.f32 %v2897_v5, %v2896_v44  ;;  %v2934_v4 = vrot.slane %v2933_v42, 1  ;;  %v3546_v5 = vsel %vm9054_vm2, %v10010_v59, %v10012_v29 }
 0x1b4   :  { %v2935_v38 = vadd.f32 %v2934_v4, %v2933_v42  ;;  %v2936_v6 = vmul.f32 0.0078125, %v2898_v51  ;;  %v10036_v42 = vsel %vm10014_vm5, %v7400_v24, %v4085_v26  ;;  %v7408_v51 = vrot.slane %v10018_v3, 9 }
 0x1b5   :  { %v4117_v4 = vrot.slane %v9998_v52, 5 }
 0x1b6   :  { %v2937_v34 = vmul.f32 0.0078125, %v2935_v38  ;;  %v2938_v28 = vmul.f32 %v2936_v6, %v2936_v6 }
 0x1b8   :  { %v2939_v27 = vsub.f32 %v2937_v34, %v2938_v28 }
 0x1ba   :  { %v2940_v30 = vmax.f32 %v2939_v27, 0.0 }
 0x1bc   :  { %v2941_v23 = vadd.f32 1e-05, %v2940_v30 }
 0x1be   :  { %8775 = vrsqrt.f32 %v2941_v23 }
 0x1cb   :  { %v8776_v58 = vpop.eup %8775 }
 0x1cc   :  { %v2943_v10 = vmul.f32 %v8776_v58, %v2876_v1 }
 0x1ce   :  { %v2944_v57 = vmul.f32 %v2943_v10, %v2936_v6  ;;  %v10024_v11 = vrot.slane %v2943_v10, %v10004_v41 }
 0x1d0   :  { %v2945_v38 = vsub.f32 %v2877_v8, %v2944_v57  ;;  %v2965_v6 = vmul.f32 %v10024_v11, %v9977_v13  ;;  %v2952_v34 = vmul.f32 %v10024_v11, %v9848_v54  ;;  %v2953_v28 = vmul.f32 %v10024_v11, %v9858_v22 }
 0x1d1   :  { %v2954_v27 = vmul.f32 %v10024_v11, %v9856_v46  ;;  %v2955_v30 = vmul.f32 %v10024_v11, %v9867_v31  ;;  %v2956_v23 = vmul.f32 %v10024_v11, %v9892_v14  ;;  %v2957_v13 = vmul.f32 %v10024_v11, %v9910_v2 }
 0x1d2   :  { %v10055_v40 = vrot.slane %v2945_v38, %v10004_v41  ;;  %v2958_v54 = vmul.f32 %v10024_v11, %v9908_v19  ;;  %v10061_v46 = vmul.f32 %v10024_v11, %v9934_v0  ;;  %v10065_v22 = vmul.f32 %v10024_v11, %v9950_v53  ;;  %v3355_v38 = vld [vmem:[#allocation2 + $0x80] sm:$0xf] }
 0x1d3   :  { %v10069_v31 = vmul.f32 %v10024_v11, %v9948_v12  ;;  %v10073_v14 = vmul.f32 %v10024_v11, %v9955_v50  ;;  %v10077_v2 = vmul.f32 %v10024_v11, %v9967_v7  ;;  %v10081_v19 = vmul.f32 %v10024_v11, %v9975_v48 }
 0x1d4   :  { %v2987_v0 = vadd.f32 %v10055_v40, %v2965_v6  ;;  %v2974_v53 = vadd.f32 %v10055_v40, %v2952_v34  ;;  %v2975_v43 = vadd.f32 %v10055_v40, %v2953_v28  ;;  %v2976_v12 = vadd.f32 %v10055_v40, %v2954_v27  ;;  %v3358_v6 = vld [vmem:[#allocation2 + $0x84] sm:$0x1] }
 0x1d5   :  { %v2977_v55 = vadd.f32 %v10055_v40, %v2955_v30  ;;  %v2978_v50 = vadd.f32 %v10055_v40, %v2956_v23  ;;  %v2979_v32 = vadd.f32 %v10055_v40, %v2957_v13  ;;  %v2980_v7 = vadd.f32 %v10055_v40, %v2958_v54 }
 0x1d6   :  { %v3003_v18 = vmax.f32 %v2987_v0, 0.0  ;;  %v2990_v49 = vmax.f32 %v2974_v53, 0.0  ;;  %v2991_v48 = vmax.f32 %v2975_v43, 0.0  ;;  %v2992_v62 = vmax.f32 %v2976_v12, 0.0  ;;  %v3274_v0 = vld [vmem:[#allocation2 + $0x8] sm:$0xf] }
 0x1d7   :  { %v2993_v45 = vmax.f32 %v2977_v55, 0.0  ;;  %v2994_v15 = vmax.f32 %v2978_v50, 0.0  ;;  %v2995_v60 = vmax.f32 %v2979_v32, 0.0  ;;  %v2996_v9 = vmax.f32 %v2980_v7, 0.0  ;;  %v3283_v32 = vld [vmem:[#allocation2 + $0x10] sm:$0xf] }
 0x1d8   :  { %v7605_v21 = vpack.c.bf16 %v3003_v18, %v3003_v18  ;;  %v7592_v63 = vpack.c.bf16 %v2990_v49, %v2990_v49  ;;  %v7593_v39 = vpack.c.bf16 %v2991_v48, %v2991_v48  ;;  %v7594_v16 = vpack.c.bf16 %v2992_v62, %v2992_v62 }
 0x1d9   :  { %v7595_v35 = vpack.c.bf16 %v2993_v45, %v2993_v45  ;;  %v7596_v1 = vpack.c.bf16 %v2994_v15, %v2994_v15  ;;  %v10091_v58 = vpack.c.bf16 %v2995_v60, %v2995_v60  ;;  %v10093_v24 = vpack.c.bf16 %v2996_v9, %v2996_v9  ;;  %v3289_v15 = vld [vmem:[#allocation2 + $0x18] sm:$0xf]  ;;  %v3280_v60 = vld [vmem:[#allocation2 + $0xc] sm:$0x1] }
 0x1da   :  { %v3215_v26 = vshrl.u32 %v7605_v21, 16  ;;  %v3218_v10 = vshll.u32 %v7605_v21, 16  ;;  %v3111_v8 = vshrl.u32 %v7592_v63, 16  ;;  %v3114_v57 = vshll.u32 %v7592_v63, 16 }
 0x1db   :  { %v3119_v34 = vshrl.u32 %v7593_v39, 16  ;;  %v3122_v28 = vshll.u32 %v7593_v39, 16  ;;  %v3127_v27 = vshrl.u32 %v7594_v16, 16  ;;  %v3130_v30 = vshll.u32 %v7594_v16, 16 }
 0x1dc   :  { %v3217_v23 = vrot.slane %v3215_v26, 7  ;;  %v3113_v54 = vrot.slane %v3111_v8, 7  ;;  %v3135_v53 = vshrl.u32 %v7595_v35, 16  ;;  %v3138_v43 = vshll.u32 %v7595_v35, 16  ;;  %v3301_v8 = vld [vmem:[#allocation2 + $0x28] sm:$0xf] }
 0x1dd   :  { %v3121_v55 = vrot.slane %v3119_v34, 7  ;;  %v3129_v50 = vrot.slane %v3127_v27, 7  ;;  %v3143_v7 = vshrl.u32 %v7596_v1, 16  ;;  %v3146_v18 = vshll.u32 %v7596_v1, 16  ;;  %v3292_v27 = vld [vmem:[#allocation2 + $0x1c] sm:$0x1] }
 0x1de   :  { %v3220_v49 = vor.u32 %v3218_v10, %v3217_v23  ;;  %v3221_v48 = vrot.slane %v3217_v23, 4  ;;  %v3116_v62 = vor.u32 %v3114_v57, %v3113_v54  ;;  %v3117_v45 = vrot.slane %v3113_v54, 4  ;;  %v3295_v10 = vld [vmem:[#allocation2 + $0x20] sm:$0xf] }
 0x1df   :  { %v3124_v9 = vor.u32 %v3122_v28, %v3121_v55  ;;  %v3125_v21 = vrot.slane %v3121_v55, 4  ;;  %v3132_v63 = vor.u32 %v3130_v30, %v3129_v50  ;;  %v3133_v39 = vrot.slane %v3129_v50, 4 }
 0x1e0   :  { %v3356_v16 = vsel %vm10097_vm10, %v3220_v49, %v3355_v38  ;;  %v3359_v35 = vsel %vm10103_vm11, %v3221_v48, %v3358_v6  ;;  %v3275_v26 = vsel %vm10097_vm10, %v3116_v62, %v3274_v0  ;;  %v3137_v1 = vrot.slane %v3135_v53, 7  ;;  %v3286_v6 = vld [vmem:[#allocation2 + $0x14] sm:$0x1]  ;;  %v3298_v53 = vld [vmem:[#allocation2 + $0x24] sm:$0x1] }
 0x1e1   :  { %3357 = vst [vmem:[#allocation2 + $0x80] sm:$0xf] %v3356_v16  ;;  %3360 = vst [vmem:[#allocation2 + $0x84] sm:$0x1] %v3359_v35  ;;  %v3284_v57 = vsel %vm10097_vm10, %v3124_v9, %v3283_v32  ;;  %v3290_v34 = vsel %vm10097_vm10, %v3132_v63, %v3289_v15  ;;  %v3145_v28 = vrot.slane %v3143_v7, 7  ;;  %v3281_v38 = vsel %vm10103_vm11, %v3117_v45, %v3280_v60 }
 0x1e2   :  { %3276 = vst [vmem:[#allocation2 + $0x8] sm:$0xf] %v3275_v26  ;;  %3285 = vst [vmem:[#allocation2 + $0x10] sm:$0xf] %v3284_v57  ;;  %v3140_v30 = vor.u32 %v3138_v43, %v3137_v1  ;;  %v3141_v23 = vrot.slane %v3137_v1, 4  ;;  %v3151_v54 = vshrl.u32 %v10091_v58, 16  ;;  %v3287_v43 = vsel %vm10103_vm11, %v3125_v21, %v3286_v6 }
 0x1e3   :  { %3291 = vst [vmem:[#allocation2 + $0x18] sm:$0xf] %v3290_v34  ;;  %3282 = vst [vmem:[#allocation2 + $0xc] sm:$0x1] %v3281_v38  ;;  %v3154_v0 = vshll.u32 %v10091_v58, 16  ;;  %v3148_v55 = vor.u32 %v3146_v18, %v3145_v28  ;;  %v3149_v50 = vrot.slane %v3145_v28, 4  ;;  %v3293_v45 = vsel %vm10103_vm11, %v3133_v39, %v3292_v27 }
 0x1e4   :  { %v3159_v32 = vshrl.u32 %v10093_v24, 16  ;;  %v3162_v7 = vshll.u32 %v10093_v24, 16  ;;  %v3304_v49 = vld [vmem:[#allocation2 + $0x2c] sm:$0x1]  ;;  %v3296_v48 = vsel %vm10097_vm10, %v3140_v30, %v3295_v10  ;;  %v3153_v62 = vrot.slane %v3151_v54, 7 }
 0x1e5   :  { %3297 = vst [vmem:[#allocation2 + $0x20] sm:$0xf] %v3296_v48  ;;  %v3302_v58 = vsel %vm10097_vm10, %v3148_v55, %v3301_v8  ;;  %v3307_v15 = vld [vmem:[#allocation2 + $0x30] sm:$0xf]  ;;  %3288 = vst [vmem:[#allocation2 + $0x14] sm:$0x1] %v3287_v43  ;;  %v10135_v24 = vadd.f32 %v10055_v40, %v10061_v46  ;;  %v3299_v60 = vsel %vm10103_vm11, %v3141_v23, %v3298_v53 }
 0x1e6   :  { %v10131_v18 = vrot.slane %v3159_v32, 7  ;;  %3294 = vst [vmem:[#allocation2 + $0x1c] sm:$0x1] %v3293_v45  ;;  %v3310_v9 = vld [vmem:[#allocation2 + $0x34] sm:$0x1]  ;;  %v3156_v21 = vor.u32 %v3154_v0, %v3153_v62  ;;  %v3157_v63 = vrot.slane %v3153_v62, 4  ;;  %v3305_v16 = vsel %vm10103_vm11, %v3149_v50, %v3304_v49 }
 0x1e7   :  { %3303 = vst [vmem:[#allocation2 + $0x28] sm:$0xf] %v3302_v58  ;;  %v3313_v39 = vld [vmem:[#allocation2 + $0x38] sm:$0xf]  ;;  %3300 = vst [vmem:[#allocation2 + $0x24] sm:$0x1] %v3299_v60  ;;  %v10143_v35 = vadd.f32 %v10055_v40, %v10065_v22  ;;  %v10150_v10 = vadd.f32 %v10055_v40, %v10069_v31  ;;  %v10159_v28 = vadd.f32 %v10055_v40, %v10073_v14 }
 0x1e8   :  { %v3164_v26 = vor.u32 %v3162_v7, %v10131_v18  ;;  %v3165_v46 = vrot.slane %v10131_v18, 4  ;;  %v2998_v1 = vmax.f32 %v10135_v24, 0.0  ;;  %3306 = vst [vmem:[#allocation2 + $0x2c] sm:$0x1] %v3305_v16  ;;  %v3308_v57 = vsel %vm10097_vm10, %v3156_v21, %v3307_v15  ;;  %v8682_v49 = vld [vmem:[#allocation3 + $0xf0] sm:$0xff]  }
 0x1e9   :  { %v3374_v8 = vld [vmem:[#allocation2 + $0x8] sm:$0xf]  ;;  %v2999_v34 = vmax.f32 %v10143_v35, 0.0  ;;  %v3311_v22 = vsel %vm10103_vm11, %v3157_v63, %v3310_v9  ;;  %v3375_v30 = vld [vmem:[#allocation2 + $0x10] sm:$0xf] }
 0x1ea   :  { %v3436_v38 = vshrl.u32 %v3374_v8, 16  ;;  %v3439_v6 = vshll.u32 %v3374_v8, 16  ;;  %v7384_v27 = vcombine.low %v9990_v33, %v3374_v8  ;;  %v3376_v31 = vld [vmem:[#allocation2 + $0x18] sm:$0xf]  ;;  %3309 = vst [vmem:[#allocation2 + $0x30] sm:$0xf] %v3308_v57  ;;  %v3314_v23 = vsel %vm10097_vm10, %v3164_v26, %v3313_v39 }
 0x1eb   :  { %3312 = vst [vmem:[#allocation2 + $0x34] sm:$0x1] %v3311_v22  ;;  %v3450_v54 = vshrl.u32 %v3375_v30, 16  ;;  %v3453_v0 = vshll.u32 %v3375_v30, 16  ;;  %v3464_v53 = vshrl.u32 %v3376_v31, 16  ;;  %v3467_v55 = vshll.u32 %v3376_v31, 16 }
 0x1ec   :  { %v10164_v50 = vld [vmem:[#allocation2 + $0xc] sm:$0x1]  ;;  %3315 = vst [vmem:[#allocation2 + $0x38] sm:$0xf] %v3314_v23  ;;  %v3438_v14 = vrot.slane %v3436_v38, 4  ;;  %v3441_v32 = vrot.slane %v3439_v6, 5  ;;  %8248 = vmatprep.mubr.bf16.mxu0 %v7384_v27  ;;  %v7385_v7 = vcombine.low %v3375_v30, %v3376_v31 }
 0x1ed   :  { %v3445_v33 = vshll.u32 %v10164_v50, 16  ;;  %v3452_v48 = vrot.slane %v3450_v54, 4  ;;  %v3455_v62 = vrot.slane %v3453_v0, 5  ;;  %v3466_v43 = vrot.slane %v3464_v53, 4  ;;  %v3377_v58 = vld [vmem:[#allocation2 + $0x20] sm:$0xf] }
 0x1ee   :  { %v3469_v45 = vrot.slane %v3467_v55, 5  ;;  %8249 = vmatmul.mubr.bf16.vlgmr.msra.gmra.mxu0 %v7385_v7  ;;  %v3378_v15 = vld [vmem:[#allocation2 + $0x28] sm:$0xf]  ;;  %v3478_v60 = vshrl.u32 %v3377_v58, 16  ;;  %v3481_v9 = vshll.u32 %v3377_v58, 16  ;;  %v3442_v21 = vor.u32 %v3441_v32, %v3438_v14  ;;  %v11367_v8 = vld [vmem:[#allocation35_spill] sm:$0xff] }
 0x1ef   :  { %v3447_v63 = vrot.slane %v3445_v33, 5  ;;  %v3492_v39 = vshrl.u32 %v3378_v15, 16  ;;  %v3495_v16 = vshll.u32 %v3378_v15, 16  ;;  %v7386_v26 = vcombine.low %v3377_v58, %v3378_v15  ;;  %8297 = vmatpush3.bf16.msra.mxu0 %v11367_v8  ;;  %v8685_v57 = vld [vmem:[#allocation3 + $0xe8] sm:$0xff]   ;;  %v10168_v22 = vld [vmem:[#allocation2 + $0x14] sm:$0x1] }
 0x1f0   :  { %v3456_v38 = vor.u32 %v3455_v62, %v3452_v48  ;;  %v3480_v6 = vrot.slane %v3478_v60, 4  ;;  %v3483_v27 = vrot.slane %v3481_v9, 5  ;;  %8298 = vmatprep.subr.bf16.mxu0 %v8682_v49  ;;  %v3443_v30 = vrot.slane %v3442_v21, 4  ;;  %v10170_v31 = vld [vmem:[#allocation2 + $0x1c] sm:$0x1] }
 0x1f1   :  { %v3459_v23 = vshll.u32 %v10168_v22, 16  ;;  %v3494_v54 = vrot.slane %v3492_v39, 4  ;;  %v3497_v0 = vrot.slane %v3495_v16, 5  ;;  %8252 = vmatprep.mubr.bf16.mxu0 %v7386_v26  ;;  %v3379_v53 = vld [vmem:[#allocation2 + $0x30] sm:$0xf]  ;;  %v3470_v14 = vor.u32 %v3469_v45, %v3466_v43  ;;  %v8688_v16 = vld [vmem:[#allocation3 + $0xe0] sm:$0xff]  }
 0x1f2   :  { %v3457_v55 = vrot.slane %v3456_v38, 4  ;;  %v3448_v32 = vsel %vm9054_vm2, %v3443_v30, %v3447_v63  ;;  %v3506_v33 = vshrl.u32 %v3379_v53, 16  ;;  %v3509_v48 = vshll.u32 %v3379_v53, 16  ;;  %v10180_v21 = vld [vmem:[#allocation2 + $0x24] sm:$0x1] }
 0x1f3   :  { %v3380_v7 = vld [vmem:[#allocation2 + $0x38] sm:$0xf]  ;;  %v3461_v62 = vrot.slane %v3459_v23, 5  ;;  %8299 = vmatpush3.bf16.msra.mxu0 %v8682_v49  ;;  %v7368_v58 = vcombine.low %v3434_v20, %v3448_v32  ;;  %v10182_v43 = vld [vmem:[#allocation2 + $0x2c] sm:$0x1]  ;;  %v3471_v39 = vrot.slane %v3470_v14, 4  ;;  %v7600_v20 = vpack.c.bf16 %v2998_v1, %v2998_v1 }
 0x1f4   :  { %v3520_v15 = vshrl.u32 %v3380_v7, 16  ;;  %v3523_v60 = vshll.u32 %v3380_v7, 16  ;;  %v7387_v9 = vcombine.low %v3379_v53, %v3380_v7  ;;  %v10184_v45 = vrot.slane %v3506_v33, 4  ;;  %8300 = vmatprep.subr.bf16.mxu0 %v8685_v57  ;;  %v3316_v7 = vld [vmem:[#allocation2 + $0x3c] sm:$0x1] }
 0x1f5   :  { %v3511_v63 = vrot.slane %v3509_v48, 5  ;;  %v3462_v49 = vsel %vm9054_vm2, %v3457_v55, %v3461_v62  ;;  %8216 = vmatprep.mubr.bf16.mxu1 %v7368_v58  ;;  %v3473_v47 = vshll.u32 %v10170_v31, 16  ;;  %v3484_v8 = vor.u32 %v3483_v27, %v3480_v6  ;;  %v3325_v33 = vld [vmem:[#allocation2 + $0x58] sm:$0xf] }
 0x1f6   :  { %v10188_v26 = vrot.slane %v3520_v15, 4  ;;  %v10190_v56 = vrot.slane %v3523_v60, 5  ;;  %8253 = vmatmul.mubr.bf16.gmra.mxu0 %v7387_v9  ;;  %v3487_v38 = vshll.u32 %v10180_v21, 16  ;;  %v3498_v30 = vor.u32 %v3497_v0, %v3494_v54  ;;  %v8691_v1 = vld [vmem:[#allocation3 + $0xd8] sm:$0xff]   ;;  %v8689_v60 = vld [vmem:[#allocation3 + $0xb0] sm:$0xff]  }
 0x1f7   :  { %v3501_v23 = vshll.u32 %v10182_v43, 16  ;;  %v3475_v53 = vrot.slane %v3473_v47, 5  ;;  %v3175_v55 = vshrl.u32 %v7600_v20, 16  ;;  %v3178_v14 = vshll.u32 %v7600_v20, 16  ;;  %8301 = vmatpush3.bf16.msra.mxu0 %v8685_v57 }
 0x1f8   :  { %v3000_v32 = vmax.f32 %v10150_v10, 0.0  ;;  %v3485_v48 = vrot.slane %v3484_v8, 4  ;;  %v3489_v62 = vrot.slane %v3487_v38, 5  ;;  %v3499_v24 = vrot.slane %v3498_v30, 4  ;;  %8302 = vmatprep.subr.bf16.mxu0 %v8688_v16 }
 0x1f9   :  { %v3503_v58 = vrot.slane %v3501_v23, 5  ;;  %v3476_v6 = vsel %vm9054_vm2, %v3471_v39, %v3475_v53  ;;  %v3177_v27 = vrot.slane %v3175_v55, 7  ;;  %v7601_v54 = vpack.c.bf16 %v2999_v34, %v2999_v34  ;;  %v10212_v39 = vld [vmem:[#allocation2 + $0x34] sm:$0x1]  ;;  %v3331_v53 = vld [vmem:[#allocation2 + $0x60] sm:$0xf] }
 0x1fa   :  { %v7602_v0 = vpack.c.bf16 %v3000_v32, %v3000_v32  ;;  %v7369_v57 = vcombine.low %v3462_v49, %v3476_v6  ;;  %v3490_v10 = vsel %vm9054_vm2, %v3485_v48, %v3489_v62  ;;  %v3317_v9 = vsel %vm10103_vm11, %v3165_v46, %v3316_v7  ;;  %v8694_v23 = vld [vmem:[#allocation3 + $0xd0] sm:$0xff]   ;;  %v3337_v55 = vld [vmem:[#allocation2 + $0x68] sm:$0xf] }
 0x1fb   :  { %v3504_v15 = vsel %vm9054_vm2, %v3499_v24, %v3503_v58  ;;  %v3180_v47 = vor.u32 %v3178_v14, %v3177_v27  ;;  %v3181_v35 = vrot.slane %v3177_v27, 4  ;;  %8303 = vmatpush3.bf16.msra.mxu0 %v8688_v16  ;;  %v3183_v34 = vshrl.u32 %v7601_v54, 16  ;;  %3318 = vst [vmem:[#allocation2 + $0x3c] sm:$0x1] %v3317_v9 }
 0x1fc   :  { %v7370_v20 = vcombine.low %v3490_v10, %v3504_v15  ;;  %8217 = vmatmul.mubr.bf16.vlgmr.msra.gmra.mxu1 %v7369_v57  ;;  %v3186_v49 = vshll.u32 %v7601_v54, 16  ;;  %v3191_v8 = vshrl.u32 %v7602_v0, 16  ;;  %v3194_v38 = vshll.u32 %v7602_v0, 16  ;;  %8304 = vmatprep.subr.bf16.mxu0 %v8691_v1  ;;  %v10230_v54 = vld [vmem:[#allocation2 + $0x80] sm:$0xf]  ;;  %v8697_v0 = vld [vmem:[#allocation3 + $0xc8] sm:$0xff]  }
 0x1fd   :  { %v3512_v30 = vor.u32 %v3511_v63, %v10184_v45  ;;  %v3326_v18 = vsel %vm10097_vm10, %v3180_v47, %v3325_v33  ;;  %8265 = vmatpush3.bf16.msra.mxu1 %v9885_v25  ;;  %v3185_v46 = vrot.slane %v3183_v34, 7  ;;  %v3515_v16 = vshll.u32 %v10212_v39, 16  ;;  %v8693_v25 = vld [vmem:[#allocation3 + $0xa8] sm:$0xff]   ;;  %v3328_v33 = vld [vmem:[#allocation2 + $0x5c] sm:$0x1]  ;;  %v8695_v34 = vld [vmem:[#allocation3 + $0xa0] sm:$0xff]  }
 0x1fe   :  { %8220 = vmatprep.mubr.bf16.mxu1 %v7370_v20  ;;  %v3526_v14 = vor.u32 %v10190_v56, %v10188_v26  ;;  %3327 = vst [vmem:[#allocation2 + $0x58] sm:$0xf] %v3326_v18  ;;  %8266 = vmatprep.subr.bf16.mxu1 %v8689_v60  ;;  %v10221_v32 = vrot.slane %v3191_v8, 7  ;;  %v2986_v63 = vadd.f32 %v10055_v40, %v10077_v2  ;;  %v3001_v7 = vmax.f32 %v10159_v28, 0.0  ;;  %v3334_v10 = vld [vmem:[#allocation2 + $0x64] sm:$0x1] }
 0x1ff   :  { %v10223_v45 = vrot.slane %v3512_v30, 4  ;;  %v3188_v48 = vor.u32 %v3186_v49, %v3185_v46  ;;  %v3189_v62 = vrot.slane %v3185_v46, 4  ;;  %v3517_v24 = vrot.slane %v3515_v16, 5  ;;  %8305 = vmatpush3.bf16.msra.mxu0 %v8691_v1  ;;  %v8700_v16 = vld [vmem:[#allocation3 + $0xc0] sm:$0xff]  }
 0x200   :  { %v3527_v58 = vrot.slane %v3526_v14, 4  ;;  %v3196_v26 = vor.u32 %v3194_v38, %v10221_v32  ;;  %v3197_v56 = vrot.slane %v10221_v32, 4  ;;  %v3002_v6 = vmax.f32 %v2986_v63, 0.0  ;;  %8306 = vmatprep.subr.bf16.mxu0 %v8694_v23 }
 0x201   :  { %v7603_v27 = vpack.c.bf16 %v3001_v7, %v3001_v7  ;;  %8267 = vmatpush3.bf16.msra.mxu1 %v8689_v60  ;;  %v3332_v2 = vsel %vm10097_vm10, %v3188_v48, %v3331_v53  ;;  %v3518_v28 = vsel %vm9054_vm2, %v10223_v45, %v3517_v24  ;;  %v3329_v1 = vsel %vm10103_vm11, %v3181_v35, %v3328_v33  ;;  %v3343_v35 = vld [vmem:[#allocation2 + $0x70] sm:$0xf] }
 0x202   :  { %v2988_v57 = vadd.f32 %v10055_v40, %v10081_v19  ;;  %3333 = vst [vmem:[#allocation2 + $0x60] sm:$0xf] %v3332_v2  ;;  %v3338_v15 = vsel %vm10097_vm10, %v3196_v26, %v3337_v55  ;;  %v10243_v9 = vld [vmem:[#allocation2 + $0x3c] sm:$0x1]  ;;  %v7604_v60 = vpack.c.bf16 %v3002_v6, %v3002_v6  ;;  %8268 = vmatprep.subr.bf16.mxu1 %v8693_v25  ;;  %3330 = vst [vmem:[#allocation2 + $0x5c] sm:$0x1] %v3329_v1 }
 0x203   :  { %v3199_v47 = vshrl.u32 %v7603_v27, 16  ;;  %v3202_v20 = vshll.u32 %v7603_v27, 16  ;;  %3339 = vst [vmem:[#allocation2 + $0x68] sm:$0xf] %v3338_v15  ;;  %v3529_v49 = vshll.u32 %v10243_v9, 16  ;;  %8307 = vmatpush3.bf16.msra.mxu0 %v8694_v23  ;;  %v3618_v19 = vshrl.u32 %v10230_v54, 16 }
 0x204   :  { %v3004_v8 = vmax.f32 %v2988_v57, 0.0  ;;  %v3621_v38 = vshll.u32 %v10230_v54, 16  ;;  %v3207_v18 = vshrl.u32 %v7604_v60, 16  ;;  %v3210_v46 = vshll.u32 %v7604_v60, 16  ;;  %8308 = vmatprep.subr.bf16.mxu0 %v8697_v0  ;;  %v3340_v55 = vld [vmem:[#allocation2 + $0x6c] sm:$0x1] }
 0x205   :  { %v10248_v30 = vrot.slane %v3199_v47, 7  ;;  %v3335_v53 = vsel %vm10103_vm11, %v3189_v62, %v3334_v10  ;;  %v3382_v14 = vld [vmem:[#allocation2 + $0x58] sm:$0xf]  ;;  %v3531_v45 = vrot.slane %v3529_v49, 5  ;;  %8269 = vmatpush3.bf16.msra.mxu1 %v8693_v25  ;;  %v10254_v23 = vrot.slane %v3618_v19, 4 }
 0x206   :  { %v10252_v63 = vpack.c.bf16 %v3004_v8, %v3004_v8  ;;  %v10256_v7 = vrot.slane %v3621_v38, 5  ;;  %3336 = vst [vmem:[#allocation2 + $0x64] sm:$0x1] %v3335_v53  ;;  %v3548_v33 = vshrl.u32 %v3382_v14, 16  ;;  %v3551_v48 = vshll.u32 %v3382_v14, 16  ;;  %8270 = vmatprep.subr.bf16.mxu1 %v8695_v34  ;;  %v8698_v62 = vld [vmem:[#allocation3 + $0x98] sm:$0xff]  }
 0x207   :  { %v7388_v24 = vcombine.low %v9992_v17, %v3382_v14  ;;  %v3204_v26 = vor.u32 %v3202_v20, %v10248_v30  ;;  %v3532_v6 = vsel %vm9054_vm2, %v3527_v58, %v3531_v45  ;;  %v3205_v25 = vrot.slane %v10248_v30, 4  ;;  %8309 = vmatpush3.bf16.msra.mxu0 %v8697_v0  ;;  %v3349_v15 = vld [vmem:[#allocation2 + $0x78] sm:$0xf]  ;;  %v8701_v53 = vld [vmem:[#allocation3 + $0x90] sm:$0xff]  }
 0x208   :  { %v3209_v27 = vrot.slane %v3207_v18, 7  ;;  %v3223_v2 = vshrl.u32 %v10252_v63, 16  ;;  %v3550_v1 = vrot.slane %v3548_v33, 4  ;;  %v3553_v57 = vrot.slane %v3551_v48, 5  ;;  %8310 = vmatprep.subr.bf16.mxu0 %v8700_v16  ;;  %v10266_v60 = vld [vmem:[#allocation3 + $0x178] sm:$0xff]  }
 0x209   :  { %8256 = vmatprep.mubr.bf16.mxu0 %v7388_v24  ;;  %v7371_v10 = vcombine.low %v3518_v28, %v3532_v6  ;;  %v3344_v17 = vsel %vm10097_vm10, %v3204_v26, %v3343_v35  ;;  %v3383_v47 = vld [vmem:[#allocation2 + $0x60] sm:$0xf]  ;;  %v10268_v49 = vld [vmem:[#allocation2 + $0x5c] sm:$0x1]  ;;  %8271 = vmatpush3.bf16.msra.mxu1 %v8695_v34  ;;  %v3341_v0 = vsel %vm10103_vm11, %v3197_v56, %v3340_v55  ;;  %v3346_v28 = vld [vmem:[#allocation2 + $0x74] sm:$0x1] }
 0x20a   :  { %v3212_v20 = vor.u32 %v3210_v46, %v3209_v27  ;;  %v3213_v58 = vrot.slane %v3209_v27, 4  ;;  %3345 = vst [vmem:[#allocation2 + $0x70] sm:$0xf] %v3344_v17  ;;  %v3225_v8 = vrot.slane %v3223_v2, 7  ;;  %v3384_v19 = vld [vmem:[#allocation2 + $0x68] sm:$0xf]  ;;  %v3554_v30 = vor.u32 %v3553_v57, %v3550_v1  ;;  %8272 = vmatprep.subr.bf16.mxu1 %v8698_v62 }
 0x20b   :  { %v3562_v35 = vshrl.u32 %v3383_v47, 16  ;;  %v3565_v38 = vshll.u32 %v3383_v47, 16  ;;  %8221 = vmatmul.mubr.bf16.gmra.mxu1 %v7371_v10  ;;  %v3557_v18 = vshll.u32 %v10268_v49, 16  ;;  %3342 = vst [vmem:[#allocation2 + $0x6c] sm:$0x1] %v3341_v0  ;;  %v3576_v14 = vshrl.u32 %v3384_v19, 16  ;;  %8311 = vmatpush3.bf16.msra.mxu0 %v8700_v16 }
 0x20c   :  { %v3352_v46 = vld [vmem:[#allocation2 + $0x7c] sm:$0x1]  ;;  %v3579_v34 = vshll.u32 %v3384_v19, 16  ;;  %v7389_v45 = vcombine.low %v3383_v47, %v3384_v19  ;;  %v3350_v32 = vsel %vm10097_vm10, %v3212_v20, %v3349_v15  ;;  %v3364_v56 = vld [vmem:[#allocation2 + $0x8c] sm:$0x1]  ;;  %v3555_v48 = vrot.slane %v3554_v30, 4  ;;  %8360 = vmatprep.subr.bf16.mxu0 %v10266_v60 }
 0x20d   :  { %v3564_v55 = vrot.slane %v3562_v35, 4  ;;  %v3567_v33 = vrot.slane %v3565_v38, 5  ;;  %3351 = vst [vmem:[#allocation2 + $0x78] sm:$0xf] %v3350_v32  ;;  %v3559_v24 = vrot.slane %v3557_v18, 5  ;;  %v3578_v6 = vrot.slane %v3576_v14, 4  ;;  %8273 = vmatpush3.bf16.msra.mxu1 %v8698_v62 }
 0x20e   :  { %v10277_v26 = vld [vmem:[#allocation2 + $0x64] sm:$0x1]  ;;  %v3581_v27 = vrot.slane %v3579_v34, 5  ;;  %8257 = vmatmul.mubr.bf16.gmra.mxu0 %v7389_v45  ;;  %v3226_v2 = vshll.u32 %v10252_v63, 16  ;;  %v3229_v1 = vrot.slane %v3225_v8, 4  ;;  %v3347_v15 = vsel %vm10103_vm11, %v3205_v25, %v3346_v28  ;;  %8274 = vmatprep.subr.bf16.mxu1 %v8701_v53  ;;  %v8704_v47 = vld [vmem:[#allocation3 + $0x88] sm:$0xff]  }
 0x20f   :  { %v3560_v16 = vsel %vm9054_vm2, %v3555_v48, %v3559_v24  ;;  %v3361_v57 = vld [vmem:[#allocation2 + $0x88] sm:$0xf]  ;;  %v3568_v10 = vor.u32 %v3567_v33, %v3564_v55  ;;  %v3571_v17 = vshll.u32 %v10277_v26, 16  ;;  %3348 = vst [vmem:[#allocation2 + $0x74] sm:$0x1] %v3347_v15  ;;  %v3353_v0 = vsel %vm10103_vm11, %v3213_v58, %v3352_v46 }
 0x210   :  { %v7372_v63 = vcombine.low %v3546_v5, %v3560_v16  ;;  %v3228_v20 = vor.u32 %v3226_v2, %v3225_v8  ;;  %v3582_v62 = vor.u32 %v3581_v27, %v3578_v6  ;;  %v10293_v19 = vld [vmem:[#allocation2 + $0x84] sm:$0x1]  ;;  %v4033_v35 = vld [vmem:[#allocation2 + $0x8] sm:$0xe]  ;;  %3354 = vst [vmem:[#allocation2 + $0x7c] sm:$0x1] %v3353_v0  ;;  %v3365_v28 = vsel %vm10103_vm11, %v3229_v1, %v3364_v56 }
 0x211   :  { %v3385_v38 = vld [vmem:[#allocation2 + $0x70] sm:$0xf]  ;;  %v3569_v30 = vrot.slane %v3568_v10, 4  ;;  %v3573_v25 = vrot.slane %v3571_v17, 5  ;;  %v3624_v59 = vor.u32 %v10256_v7, %v10254_v23  ;;  %8275 = vmatpush3.bf16.msra.mxu1 %v8701_v53  ;;  %3366 = vst [vmem:[#allocation2 + $0x8c] sm:$0x1] %v3365_v28 }
 0x212   :  { %v3590_v29 = vshrl.u32 %v3385_v38, 16  ;;  %v3593_v5 = vshll.u32 %v3385_v38, 16  ;;  %8224 = vmatprep.mubr.bf16.mxu1 %v7372_v63  ;;  %v3362_v8 = vsel %vm10097_vm10, %v3228_v20, %v3361_v57  ;;  %v10301_v58 = vld [vmem:[#allocation2 + $0x6c] sm:$0x1]  ;;  %v3583_v18 = vrot.slane %v3582_v62, 4  ;;  %8276 = vmatprep.subr.bf16.mxu1 %v8704_v47  ;;  %v8707_v7 = vld [vmem:[#allocation3 + $0x80] sm:$0xff]  }
 0x213   :  { %3363 = vst [vmem:[#allocation2 + $0x88] sm:$0xf] %v3362_v8  ;;  %v3574_v46 = vsel %vm9054_vm2, %v3569_v30, %v3573_v25  ;;  %v3585_v14 = vshll.u32 %v10301_v58, 16  ;;  %v10306_v34 = vrot.slane %v3624_v59, 4  ;;  %v3627_v23 = vshll.u32 %v10293_v19, 16  ;;  %v10316_v16 = vld [vmem:[#allocation3 + $0x138] sm:$0xff]  }
 0x214   :  { %v3386_v45 = vld [vmem:[#allocation2 + $0x78] sm:$0xf]  ;;  %v3592_v32 = vrot.slane %v3590_v29, 4  ;;  %v3595_v56 = vrot.slane %v3593_v5, 5  ;;  %v7401_v55 = vrot.slane %v4033_v35, 9  ;;  %v4089_v33 = vrot.slane %v10164_v50, 5 }
 0x215   :  { %v3604_v53 = vshrl.u32 %v3386_v45, 16  ;;  %v3607_v48 = vshll.u32 %v3386_v45, 16  ;;  %v7390_v24 = vcombine.low %v3385_v38, %v3386_v45  ;;  %v3587_v6 = vrot.slane %v3585_v14, 5  ;;  %8277 = vmatpush3.bf16.msra.mxu1 %v8704_v47  ;;  %v4034_v63 = vld [vmem:[#allocation2 + $0x10] sm:$0xe] }
 0x216   :  { %v3596_v27 = vor.u32 %v3595_v56, %v3592_v32  ;;  %v10310_v2 = vrot.slane %v3627_v23, 5  ;;  %v10314_v1 = vsel %vm10014_vm5, %v7401_v55, %v4089_v33  ;;  %v10324_v50 = vsel %vm10014_vm5, %v7408_v51, %v4117_v4  ;;  %v10328_v15 = vld [vmem:[#allocation2 + $0x74] sm:$0x1]  ;;  %8278 = vmatprep.subr.bf16.mxu1 %v8707_v7  ;;  %v4035_v62 = vld [vmem:[#allocation2 + $0x18] sm:$0xe] }
 0x217   :  { %v3606_v57 = vrot.slane %v3604_v53, 4  ;;  %v3609_v10 = vrot.slane %v3607_v48, 5  ;;  %8260 = vmatprep.mubr.bf16.mxu0 %v7390_v24  ;;  %v3588_v17 = vsel %vm9054_vm2, %v3583_v18, %v3587_v6  ;;  %v2959_v47 = vmul.f32 %v10024_v11, %v9918_v61  ;;  %v10332_v20 = vld [vmem:[#allocation2 + $0x7c] sm:$0x1]  ;;  %v4036_v25 = vld [vmem:[#allocation2 + $0x20] sm:$0xe] }
 0x218   :  { %v7373_v52 = vcombine.low %v3574_v46, %v3588_v17  ;;  %v3597_v3 = vrot.slane %v3596_v27, 4  ;;  %v3599_v51 = vshll.u32 %v10328_v15, 16  ;;  %v7416_v4 = vcombine.low %v10036_v42, %v10314_v1  ;;  %v10338_v38 = vld [vmem:[#allocation2 + $0x8c] sm:$0x1]  ;;  %v8699_v59 = vld [vmem:[#allocation2 + $0x8] ss:$8 sps:$4 sm:$0xff]  }
 0x219   :  { %v3610_v0 = vor.u32 %v3609_v10, %v3606_v57  ;;  %v3613_v35 = vshll.u32 %v10332_v20, 16  ;;  %v3630_v61 = vsel %vm9054_vm2, %v10306_v34, %v10310_v2  ;;  %v2981_v30 = vadd.f32 %v10055_v40, %v2959_v47  ;;  %8279 = vmatpush3.bf16.msra.mxu1 %v8707_v7  ;;  %v4037_v33 = vld [vmem:[#allocation2 + $0x28] sm:$0xe]  ;;  %v4038_v2 = vld [vmem:[#allocation2 + $0x30] sm:$0xe] }
 0x21a   :  { %v3388_v28 = vld [vmem:[#allocation2 + $0x88] sm:$0xf]  ;;  %8225 = vmatmul.mubr.bf16.gmra.mxu1 %v7373_v52  ;;  %v3601_v29 = vrot.slane %v3599_v51, 5  ;;  %v3641_v5 = vshll.u32 %v10338_v38, 16  ;;  %v7402_v8 = vrot.slane %v4034_v63, 9  ;;  %v4093_v18 = vrot.slane %v10168_v22, 5  ;;  %8328 = vmatprep.subr.bf16.mxu1 %v10316_v16 }
 0x21b   :  { %v3632_v46 = vshrl.u32 %v3388_v28, 16  ;;  %v3635_v14 = vshll.u32 %v3388_v28, 16  ;;  %v7391_v23 = vcombine.low %v10230_v54, %v3388_v28  ;;  %v3611_v45 = vrot.slane %v3610_v0, 4  ;;  %v4039_v63 = vld [vmem:[#allocation2 + $0x38] sm:$0xe] }
 0x21c   :  { %v3602_v34 = vsel %vm9054_vm2, %v3597_v3, %v3601_v29  ;;  %v3615_v32 = vrot.slane %v3613_v35, 5  ;;  %v2997_v56 = vmax.f32 %v2981_v30, 0.0  ;;  %v7403_v55 = vrot.slane %v4035_v62, 9  ;;  %v4041_v52 = vld [vmem:[#allocation2 + $0x58] sm:$0xe] }
 0x21d   :  { %v3634_v53 = vrot.slane %v3632_v46, 4  ;;  %v3637_v48 = vrot.slane %v3635_v14, 5  ;;  %8261 = vmatmul.mubr.bf16.gmra.mxu0 %v7391_v23  ;;  %v3643_v24 = vrot.slane %v3641_v5, 5  ;;  %v4097_v22 = vrot.slane %v10170_v31, 5  ;;  %v3319_v35 = vld [vmem:[#allocation2 + $0x40] sm:$0xf] }
 0x21e   :  { %8312 = vmatprep.mubr.bf16.mxu0 %v8699_v59  ;;  %v3616_v54 = vsel %vm9054_vm2, %v3611_v45, %v3615_v32  ;;  %v7599_v7 = vpack.c.bf16 %v2997_v56, %v2997_v56  ;;  %v7404_v6 = vrot.slane %v4036_v25, 9  ;;  %v4101_v27 = vrot.slane %v10180_v21, 5  ;;  %v8702_v21 = vld [vmem:[#allocation2 + $0x18] ss:$8 sps:$4 sm:$0xff]   ;;  %v8705_v14 = vld [vmem:[#allocation2 + $0x28] ss:$8 sps:$4 sm:$0xff]  }
 0x21f   :  { %v7374_v57 = vcombine.low %v3602_v34, %v3616_v54  ;;  %v3638_v10 = vor.u32 %v3637_v48, %v3634_v53  ;;  %v10357_v17 = vsel %vm10014_vm5, %v7402_v8, %v4093_v18  ;;  %v7405_v47 = vrot.slane %v4037_v33, 9  ;;  %v4042_v18 = vld [vmem:[#allocation2 + $0x60] sm:$0xe]  ;;  %v10383_v45 = vld [vmem:[#allocation2 + $0xc] sm:$0x1] }
 0x220   :  { %v3167_v3 = vshrl.u32 %v7599_v7, 16  ;;  %v3170_v31 = vshll.u32 %v7599_v7, 16  ;;  %v10361_v51 = vsel %vm10014_vm5, %v7403_v55, %v4097_v22  ;;  %v10365_v62 = vsel %vm10014_vm5, %v7404_v6, %v4101_v27  ;;  %v4043_v33 = vld [vmem:[#allocation2 + $0x68] sm:$0xe]  ;;  %v10397_v22 = vld [vmem:[#allocation2 + $0x14] sm:$0x1] }
 0x221   :  { %8228 = vmatprep.mubr.bf16.mxu1 %v7374_v57  ;;  %v3639_v0 = vrot.slane %v3638_v10, 4  ;;  %v4105_v30 = vrot.slane %v10182_v43, 5  ;;  %v7406_v25 = vrot.slane %v4038_v2, 9  ;;  %v4109_v28 = vrot.slane %v10212_v39, 5  ;;  %v5065_v53 = vld [vmem:[#allocation2 + $0x8] sm:$0xe] }
 0x222   :  { %v10369_v59 = vrot.slane %v3167_v3, 7  ;;  %v7407_v29 = vrot.slane %v4039_v63, 9  ;;  %v4113_v5 = vrot.slane %v10243_v9, 5  ;;  %v7409_v8 = vrot.slane %v4041_v52, 9  ;;  %v8706_v9 = vld [vmem:[#allocation3 + $0x170] sm:$0xff]  }
 0x223   :  { %v3644_v46 = vsel %vm9054_vm2, %v3639_v0, %v3643_v24  ;;  %v10376_v23 = vsel %vm10014_vm5, %v7405_v47, %v4105_v30  ;;  %v10380_v43 = vsel %vm10014_vm5, %v7406_v25, %v4109_v28  ;;  %v4121_v39 = vrot.slane %v10268_v49, 5  ;;  %v5066_v54 = vld [vmem:[#allocation2 + $0x10] sm:$0xe]  ;;  %v4045_v63 = vld [vmem:[#allocation2 + $0x78] sm:$0xe] }
 0x224   :  { %v7375_v34 = vcombine.low %v3630_v61, %v3644_v46  ;;  %v3172_v32 = vor.u32 %v3170_v31, %v10369_v59  ;;  %v3173_v56 = vrot.slane %v10369_v59, 4  ;;  %v7417_v55 = vcombine.low %v10357_v17, %v10361_v51  ;;  %v4044_v57 = vld [vmem:[#allocation2 + $0x70] sm:$0xe]  ;;  %v10414_v52 = vld [vmem:[#allocation2 + $0x1c] sm:$0x1] }
 0x225   :  { %8313 = vmatmul.mubr.bf16.vlgmr.msra.gmra.mxu0 %v8702_v21  ;;  %v7418_v48 = vcombine.low %v10365_v62, %v10376_v23  ;;  %v10393_v49 = vsel %vm10014_vm5, %v7407_v29, %v4113_v5  ;;  %v2967_v61 = vmul.f32 %v10024_v11, %v9979_v36  ;;  %v7410_v24 = vrot.slane %v4042_v18, 9  ;;  %v10416_v3 = vld [vmem:[#allocation2 + $0x24] sm:$0x1]  ;;  %v4046_v5 = vld [vmem:[#allocation2 + $0x80] sm:$0xe] }
 0x226   :  { %8229 = vmatmul.mubr.bf16.gmra.mxu1 %v7375_v34  ;;  %8316 = vmatprep.mubr.bf16.mxu0 %v8705_v14  ;;  %v3320_v7 = vsel %vm10097_vm10, %v3172_v32, %v3319_v35  ;;  %v7419_v6 = vcombine.low %v10380_v43, %v10393_v49  ;;  %v10405_v27 = vsel %vm10014_vm5, %v7409_v8, %v4121_v39  ;;  %v4125_v2 = vrot.slane %v10277_v26, 5  ;;  %v8709_v26 = vld [vmem:[#allocation3 + $0x168] sm:$0xff]   ;;  %v5068_v35 = vld [vmem:[#allocation2 + $0x20] sm:$0xe]  ;;  %v8713_v34 = vld [vmem:[#allocation3 + $0x130] sm:$0xff]  }
 0x227   :  { %8361 = vmatpush3.bf16.msra.mxu0 %v10266_v60  ;;  %8280 = vmatprep.mubr.bf16.mxu1 %v7416_v4  ;;  %3321 = vst [vmem:[#allocation2 + $0x40] sm:$0xf] %v3320_v7  ;;  %v2989_v36 = vadd.f32 %v10055_v40, %v2967_v61  ;;  %v7411_v11 = vrot.slane %v4043_v33, 9  ;;  %v4129_v10 = vrot.slane %v10301_v58, 5  ;;  %v7464_v47 = vrot.slane %v5065_v53, 9  ;;  %v8712_v8 = vld [vmem:[#allocation3 + $0x160] sm:$0xff]  }
 0x228   :  { %8362 = vmatprep.subr.bf16.mxu0 %v8706_v9  ;;  %v10420_v60 = vsel %vm10014_vm5, %v7410_v24, %v4125_v2  ;;  %v5115_v42 = vrot.slane %v10383_v45, 5  ;;  %v7465_v1 = vrot.slane %v5066_v54, 9  ;;  %v5119_v40 = vrot.slane %v10397_v22, 5  ;;  %v5067_v4 = vld [vmem:[#allocation2 + $0x18] sm:$0xe] }
 0x229   :  { %v3005_v31 = vmax.f32 %v2989_v36, 0.0  ;;  %v10426_v58 = vsel %vm10014_vm5, %v7411_v11, %v4129_v10  ;;  %v7412_v21 = vrot.slane %v4044_v57, 9  ;;  %v4133_v0 = vrot.slane %v10328_v15, 5  ;;  %v10446_v39 = vld [vmem:[#allocation2 + $0x2c] sm:$0x1] }
 0x22a   :  { %v7420_v30 = vcombine.low %v10324_v50, %v10405_v27  ;;  %v10433_v25 = vsel %vm10014_vm5, %v7464_v47, %v5115_v42  ;;  %v10437_v28 = vsel %vm10014_vm5, %v7465_v1, %v5119_v40  ;;  %v7413_v29 = vrot.slane %v4045_v63, 9  ;;  %v4047_v61 = vld [vmem:[#allocation2 + $0x88] sm:$0xe]  ;;  %v10450_v24 = vld [vmem:[#allocation2 + $0x34] sm:$0x1] }
 0x22b   :  { %8363 = vmatpush3.bf16.msra.mxu0 %v8706_v9  ;;  %v7607_v18 = vpack.c.bf16 %v3005_v31, %v3005_v31  ;;  %v7421_v15 = vcombine.low %v10420_v60, %v10426_v58  ;;  %v10443_v46 = vsel %vm10014_vm5, %v7412_v21, %v4133_v0  ;;  %v4137_v14 = vrot.slane %v10332_v20, 5  ;;  %v8710_v54 = vld [vmem:[#allocation2 + $0x58] ss:$8 sps:$4 sm:$0xff]   ;;  %v5069_v36 = vld [vmem:[#allocation2 + $0x28] sm:$0xe] }
 0x22c   :  { %8364 = vmatprep.subr.bf16.mxu0 %v8709_v26  ;;  %v7466_v32 = vrot.slane %v5067_v4, 9  ;;  %v5123_v33 = vrot.slane %v10414_v52, 5  ;;  %v7467_v53 = vrot.slane %v5068_v35, 9  ;;  %v5127_v9 = vrot.slane %v10416_v3, 5  ;;  %v5070_v11 = vld [vmem:[#allocation2 + $0x30] sm:$0xe] }
 0x22d   :  { %v3231_v7 = vshrl.u32 %v7607_v18, 16  ;;  %v7480_v2 = vcombine.low %v10433_v25, %v10437_v28  ;;  %v10456_v20 = vsel %vm10014_vm5, %v7413_v29, %v4137_v14  ;;  %v7414_v57 = vrot.slane %v4046_v5, 9  ;;  %v3367_v63 = vld [vmem:[#allocation2 + $0x90] sm:$0xf]  ;;  %v4599_v31 = vld [vmem:[#allocation2 + $0x8] sm:$0xf] }
 0x22e   :  { %v8708_v10 = vld [vmem:[#allocation2 + $0x38] ss:$8 sps:$4 sm:$0xff]   ;;  %8281 = vmatmul.mubr.bf16.vlgmr.msra.gmra.mxu1 %v7417_v55  ;;  %v3234_v47 = vshll.u32 %v7607_v18, 16  ;;  %v10463_v42 = vsel %vm10014_vm5, %v7466_v32, %v5123_v33  ;;  %v10467_v1 = vsel %vm10014_vm5, %v7467_v53, %v5127_v9  ;;  %v4141_v40 = vrot.slane %v10293_v19, 5  ;;  %v8717_v0 = vld [vmem:[#allocation3 + $0x128] sm:$0xff]   ;;  %v8718_v53 = vld [vmem:[#allocation3 + $0x150] sm:$0xff]  }
 0x22f   :  { %8365 = vmatpush3.bf16.msra.mxu0 %v8709_v26  ;;  %8284 = vmatprep.mubr.bf16.mxu1 %v7418_v48  ;;  %v10473_v4 = vrot.slane %v3231_v7, 7  ;;  %v7422_v17 = vcombine.low %v10443_v46, %v10456_v20  ;;  %v7415_v51 = vrot.slane %v4047_v61, 9  ;;  %v4145_v55 = vrot.slane %v10338_v38, 5  ;;  %v8715_v21 = vld [vmem:[#allocation3 + $0x158] sm:$0xff]   ;;  %v4601_v48 = vld [vmem:[#allocation2 + $0x10] sm:$0xf] }
 0x230   :  { %8317 = vmatmul.mubr.bf16.gmra.mxu0 %v8708_v10  ;;  %8329 = vmatpush3.bf16.msra.mxu1 %v10316_v16  ;;  %v7481_v19 = vcombine.low %v10463_v42, %v10467_v1  ;;  %v7468_v26 = vrot.slane %v5069_v36, 9  ;;  %v5131_v62 = vrot.slane %v10446_v39, 5  ;;  %v7469_v23 = vrot.slane %v5070_v11, 9  ;;  %v3322_v33 = vld [vmem:[#allocation2 + $0x44] sm:$0x1]  ;;  %v8729_v1 = vld [vmem:[#allocation3 + $0x1e8] sm:$0xff]  }
 0x231   :  { %8320 = vmatprep.mubr.bf16.mxu0 %v8710_v54  ;;  %8366 = vmatprep.subr.bf16.mxu0 %v8712_v8  ;;  %v3236_v35 = vor.u32 %v3234_v47, %v10473_v4  ;;  %v10485_v38 = vsel %vm10014_vm5, %v7414_v57, %v4141_v40  ;;  %v10489_v16 = vsel %vm10014_vm5, %v7415_v51, %v4145_v55  ;;  %v5135_v29 = vrot.slane %v10450_v24, 5  ;;  %v10504_v57 = vld [vmem:[#allocation2 + $0x3c] sm:$0x1]  ;;  %v5071_v36 = vld [vmem:[#allocation2 + $0x38] sm:$0xe]  ;;  %v8719_v10 = vld [vmem:[#allocation3 + $0x120] sm:$0xff]  }
 0x232   :  { %8330 = vmatprep.subr.bf16.mxu1 %v8713_v34  ;;  %v3237_v5 = vrot.slane %v10473_v4, 4  ;;  %v10495_v18 = vsel %vm10014_vm5, %v7468_v26, %v5131_v62  ;;  %v4632_v14 = vshrl.u32 %v4599_v31, 16  ;;  %v4635_v32 = vshll.u32 %v4599_v31, 16  ;;  %v8714_v11 = vld [vmem:[#allocation2 + $0x68] ss:$8 sps:$4 sm:$0xff]  }
 0x233   :  { %8367 = vmatpush3.bf16.msra.mxu0 %v8712_v8  ;;  %v3368_v9 = vsel %vm10097_vm10, %v3236_v35, %v3367_v63  ;;  %v10501_v61 = vsel %vm10014_vm5, %v7469_v23, %v5135_v29  ;;  %v4641_v54 = vshll.u32 %v10383_v45, 16  ;;  %v4646_v7 = vshrl.u32 %v4601_v48, 16  ;;  %v4603_v40 = vld [vmem:[#allocation2 + $0x18] sm:$0xf]  ;;  %v10515_v26 = vld [vmem:[#allocation2 + $0x40] sm:$0xe] }
 0x234   :  { %8331 = vmatpush3.bf16.msra.mxu1 %v8713_v34  ;;  %8368 = vmatprep.subr.bf16.mxu0 %v8715_v21  ;;  %3369 = vst [vmem:[#allocation2 + $0x90] sm:$0xf] %v3368_v9  ;;  %v7423_v8 = vcombine.low %v10485_v38, %v10489_v16  ;;  %v4634_v13 = vrot.slane %v4632_v14, 4  ;;  %v4637_v47 = vrot.slane %v4635_v32, 5  ;;  %v4649_v63 = vshll.u32 %v4601_v48, 16  ;;  %v10520_v62 = vld [vmem:[#allocation3 + $0x148] sm:$0xff]  }
 0x235   :  { %v8716_v51 = vld [vmem:[#allocation2 + $0x78] ss:$8 sps:$4 sm:$0xff]   ;;  %8332 = vmatprep.subr.bf16.mxu1 %v8717_v0  ;;  %v7482_v45 = vcombine.low %v10495_v18, %v10501_v61  ;;  %v4648_v55 = vrot.slane %v4646_v7, 4  ;;  %v4655_v31 = vshll.u32 %v10397_v22, 16  ;;  %v3323_v34 = vsel %vm10103_vm11, %v3173_v56, %v3322_v33  ;;  %v3370_v14 = vld [vmem:[#allocation2 + $0x94] sm:$0x1] }
 0x236   :  { %8285 = vmatmul.mubr.bf16.gmra.mxu1 %v7419_v6  ;;  %v4638_v23 = vor.u32 %v4637_v47, %v4634_v13  ;;  %v4651_v48 = vrot.slane %v4649_v63, 5  ;;  %3324 = vst [vmem:[#allocation2 + $0x44] sm:$0x1] %v3323_v34  ;;  %v7470_v35 = vrot.slane %v5071_v36, 9  ;;  %v5139_v29 = vrot.slane %v10504_v57, 5  ;;  %v8722_v6 = vld [vmem:[#allocation3 + $0x118] sm:$0xff]  }
 0x237   :  { %v4605_v22 = vld [vmem:[#allocation2 + $0x20] sm:$0xf]  ;;  %8369 = vmatpush3.bf16.msra.mxu0 %v8715_v21  ;;  %8288 = vmatprep.mubr.bf16.mxu1 %v7420_v30  ;;  %v4643_v59 = vrot.slane %v4641_v54, 5  ;;  %v4657_v56 = vrot.slane %v4655_v31, 5  ;;  %v4660_v32 = vshrl.u32 %v4603_v40, 16  ;;  %v4663_v43 = vshll.u32 %v4603_v40, 16 }
 0x238   :  { %v10526_v49 = vld [vmem:[#allocation2 + $0x5c] sm:$0x1]  ;;  %8321 = vmatmul.mubr.bf16.gmra.mxu0 %v8714_v11  ;;  %8333 = vmatpush3.bf16.msra.mxu1 %v8717_v0  ;;  %v4639_v33 = vrot.slane %v4638_v23, 4  ;;  %v4652_v9 = vor.u32 %v4651_v48, %v4648_v55  ;;  %v7471_v7 = vrot.slane %v10515_v26, 9  ;;  %v4669_v36 = vshll.u32 %v10414_v52, 16 }
 0x239   :  { %v5073_v21 = vld [vmem:[#allocation2 + $0x58] sm:$0xe]  ;;  %8324 = vmatprep.mubr.bf16.mxu0 %v8716_v51  ;;  %8370 = vmatprep.subr.bf16.mxu0 %v8718_v53  ;;  %v4662_v50 = vrot.slane %v4660_v32, 4  ;;  %v4665_v27 = vrot.slane %v4663_v43, 5  ;;  %v4674_v30 = vshrl.u32 %v4605_v22, 16  ;;  %v4677_v54 = vshll.u32 %v4605_v22, 16 }
 0x23a   :  { %v10530_v13 = vld [vmem:[#allocation2 + $0x64] sm:$0x1]  ;;  %v5074_v47 = vld [vmem:[#allocation2 + $0x60] sm:$0xe]  ;;  %8334 = vmatprep.subr.bf16.mxu1 %v8719_v10  ;;  %v4644_v0 = vsel %vm9054_vm2, %v4639_v33, %v4643_v59  ;;  %v4653_v11 = vrot.slane %v4652_v9, 4  ;;  %v10536_v63 = vsel %vm10014_vm5, %v7470_v35, %v5139_v29  ;;  %v4683_v52 = vshll.u32 %v10416_v3, 16 }
 0x23b   :  { %v4607_v40 = vld [vmem:[#allocation2 + $0x28] sm:$0xf]  ;;  %8371 = vmatpush3.bf16.msra.mxu0 %v8718_v53  ;;  %v4666_v51 = vor.u32 %v4665_v27, %v4662_v50  ;;  %v4676_v55 = vrot.slane %v4674_v30, 4  ;;  %v4679_v31 = vrot.slane %v4677_v54, 5  ;;  %v4609_v34 = vld [vmem:[#allocation2 + $0x30] sm:$0xf]  ;;  %v3371_v26 = vsel %vm10103_vm11, %v3237_v5, %v3370_v14 }
 0x23c   :  { %8335 = vmatpush3.bf16.msra.mxu1 %v8719_v10  ;;  %v8720_v23 = vld [vmem:[#allocation2 + $0x88] ss:$8 sps:$4 sm:$0xff]   ;;  %8372 = vmatprep.subr.bf16.mxu0 %v10520_v62  ;;  %v4658_v48 = vsel %vm9054_vm2, %v4653_v11, %v4657_v56  ;;  %v4671_v35 = vrot.slane %v4669_v36, 5  ;;  %v7472_v3 = vrot.slane %v5073_v21, 9  ;;  %v5147_v53 = vrot.slane %v10526_v49, 5  ;;  %v8723_v29 = vld [vmem:[#allocation3 + $0x140] sm:$0xff]  }
 0x23d   :  { %3372 = vst [vmem:[#allocation2 + $0x94] sm:$0x1] %v3371_v26  ;;  %8336 = vmatprep.subr.bf16.mxu1 %v8722_v6  ;;  %v10547_v22 = vld [vmem:[#allocation2 + $0x44] sm:$0x1]  ;;  %v4667_v4 = vrot.slane %v4666_v51, 4  ;;  %v4680_v59 = vor.u32 %v4679_v31, %v4676_v55  ;;  %v4685_v12 = vrot.slane %v4683_v52, 5  ;;  %v7448_v14 = vcombine.low %v4644_v0, %v4658_v48 }
 0x23e   :  { %v7473_v5 = vrot.slane %v5074_v47, 9  ;;  %8289 = vmatmul.mubr.bf16.gmra.mxu1 %v7421_v15  ;;  %v8724_v10 = vld [vmem:[#allocation3 + $0x110] sm:$0xff]   ;;  %v5143_v56 = vrot.slane %v10547_v22, 5  ;;  %v5151_v32 = vrot.slane %v10530_v13, 5  ;;  %v4688_v43 = vshrl.u32 %v4607_v40, 16  ;;  %v10558_v33 = vld [vmem:[#allocation3 + $0x1f8] sm:$0xff]  }
 0x23f   :  { %8373 = vmatpush3.bf16.msra.mxu0 %v10520_v62  ;;  %8292 = vmatprep.mubr.bf16.mxu1 %v7422_v17  ;;  %v8726_v9 = vld [vmem:[#allocation3 + $0x108] sm:$0xff]   ;;  %v4672_v60 = vsel %vm9054_vm2, %v4667_v4, %v4671_v35  ;;  %v4681_v58 = vrot.slane %v4680_v59, 4  ;;  %v10564_v15 = vsel %vm10014_vm5, %v7472_v3, %v5147_v53  ;;  %v4691_v36 = vshll.u32 %v4607_v40, 16  ;;  %v10576_v50 = vld [vmem:[#allocation2 + $0x74] sm:$0x1]  ;;  %v8728_v3 = vld [vmem:[#allocation3 + $0x100] sm:$0xff]  }
 0x240   :  { %v10566_v21 = vld [vmem:[#allocation2 + $0x6c] sm:$0x1]  ;;  %8325 = vmatmul.mubr.bf16.gmra.mxu0 %v8720_v23  ;;  %8337 = vmatpush3.bf16.msra.mxu1 %v8722_v6  ;;  %v10570_v46 = vsel %vm10014_vm5, %v7471_v7, %v5143_v56  ;;  %v10574_v20 = vsel %vm10014_vm5, %v7473_v5, %v5151_v32  ;;  %v4690_v17 = vrot.slane %v4688_v43, 4  ;;  %v4702_v62 = vshrl.u32 %v4609_v34, 16  ;;  %v5075_v27 = vld [vmem:[#allocation2 + $0x68] sm:$0xe] }
 0x241   :  { %8376 = vmatprep.mubr.bf16.mxu0 %v7480_v2  ;;  %8374 = vmatprep.subr.bf16.mxu0 %v8723_v29  ;;  %v7483_v6 = vcombine.low %v10536_v63, %v10570_v46  ;;  %v4686_v7 = vsel %vm9054_vm2, %v4681_v58, %v4685_v12  ;;  %v4693_v30 = vrot.slane %v4691_v36, 5  ;;  %v4697_v54 = vshll.u32 %v10446_v39, 16  ;;  %v5076_v47 = vld [vmem:[#allocation2 + $0x70] sm:$0xe]  ;;  %v4611_v0 = vld [vmem:[#allocation2 + $0x38] sm:$0xf] }
 0x242   :  { %8338 = vmatprep.subr.bf16.mxu1 %v8724_v10  ;;  %v10586_v11 = vcombine.low %v4672_v60, %v4686_v7  ;;  %v7484_v52 = vcombine.low %v10564_v15, %v10574_v20  ;;  %v4704_v25 = vrot.slane %v4702_v62, 4  ;;  %v4705_v28 = vshll.u32 %v4609_v34, 16  ;;  %v4613_v31 = vld [vmem:[#allocation2 + $0x40] sm:$0xf]  ;;  %v8727_v39 = vld [vmem:[#allocation3 + $0x1f0] sm:$0xff]   ;;  %v8733_v46 = vld [vmem:[#allocation3 + $0x1d8] sm:$0xff]  }
 0x243   :  { %8375 = vmatpush3.bf16.msra.mxu0 %v8723_v29  ;;  %v4694_v2 = vor.u32 %v4693_v30, %v4690_v17  ;;  %v4711_v40 = vshll.u32 %v10450_v24, 16  ;;  %v7474_v51 = vrot.slane %v5075_v27, 9  ;;  %v5155_v55 = vrot.slane %v10566_v21, 5  ;;  %v10598_v4 = vld [vmem:[#allocation2 + $0x7c] sm:$0x1]  ;;  %v8734_v20 = vld [vmem:[#allocation3 + $0x1a8] sm:$0xff]  }
 0x244   :  { %8339 = vmatpush3.bf16.msra.mxu1 %v8724_v10  ;;  %8424 = vmatprep.subr.bf16.mxu0 %v10558_v33  ;;  %v4707_v26 = vrot.slane %v4705_v28, 5  ;;  %v7475_v23 = vrot.slane %v5076_v47, 9  ;;  %v5159_v48 = vrot.slane %v10576_v50, 5  ;;  %v4716_v35 = vshrl.u32 %v4611_v0, 16  ;;  %v10608_v56 = vld [vmem:[#allocation2 + $0x84] sm:$0x1] }
 0x245   :  { %8340 = vmatprep.subr.bf16.mxu1 %v8726_v9  ;;  %v4695_v34 = vrot.slane %v4694_v2, 4  ;;  %v4699_v53 = vrot.slane %v4697_v54, 5  ;;  %v10596_v24 = vsel %vm10014_vm5, %v7474_v51, %v5155_v55  ;;  %v4719_v29 = vshll.u32 %v4611_v0, 16  ;;  %v5077_v32 = vld [vmem:[#allocation2 + $0x78] sm:$0xe] }
 0x246   :  { %8293 = vmatmul.mubr.bf16.gmra.mxu1 %v7423_v8  ;;  %v4708_v59 = vor.u32 %v4707_v26, %v4704_v25  ;;  %v10605_v12 = vsel %vm10014_vm5, %v7475_v23, %v5159_v48  ;;  %v4718_v5 = vrot.slane %v4716_v35, 4  ;;  %v4725_v10 = vshll.u32 %v10504_v57, 16  ;;  %v5078_v43 = vld [vmem:[#allocation2 + $0x80] sm:$0xe]  ;;  %v4615_v16 = vld [vmem:[#allocation2 + $0x58] sm:$0xf] }
 0x247   :  { %8344 = vmatprep.mubr.bf16.mxu1 %v7448_v14  ;;  %v4700_v60 = vsel %vm9054_vm2, %v4695_v34, %v4699_v53  ;;  %v4713_v58 = vrot.slane %v4711_v40, 5  ;;  %v4721_v36 = vrot.slane %v4719_v29, 5  ;;  %v4730_v38 = vshrl.u32 %v4613_v31, 16  ;;  %v8730_v14 = vld [vmem:[#allocation3 + $0x1b8] sm:$0xff]   ;;  %v4617_v18 = vld [vmem:[#allocation2 + $0x60] sm:$0xf] }
 0x248   :  { %8377 = vmatmul.mubr.bf16.vlgmr.msra.gmra.mxu0 %v7481_v19  ;;  %8341 = vmatpush3.bf16.msra.mxu1 %v8726_v9  ;;  %v4709_v8 = vrot.slane %v4708_v59, 4  ;;  %v7485_v57 = vcombine.low %v10596_v24, %v10605_v12  ;;  %v4733_v17 = vshll.u32 %v4613_v31, 16  ;;  %v4739_v62 = vshll.u32 %v10547_v22, 16  ;;  %v10636_v0 = vld [vmem:[#allocation2 + $0x8c] sm:$0x1]  ;;  %v8731_v35 = vld [vmem:[#allocation3 + $0x1e0] sm:$0xff]  }
 0x249   :  { %8380 = vmatprep.mubr.bf16.mxu0 %v7482_v45  ;;  %8425 = vmatpush3.bf16.msra.mxu0 %v10558_v33  ;;  %v4722_v27 = vor.u32 %v4721_v36, %v4718_v5  ;;  %v4732_v7 = vrot.slane %v4730_v38, 4  ;;  %v7476_v30 = vrot.slane %v5077_v32, 9  ;;  %v5163_v42 = vrot.slane %v10598_v4, 5  ;;  %v5079_v51 = vld [vmem:[#allocation2 + $0x88] sm:$0xe]  ;;  %v8732_v29 = vld [vmem:[#allocation3 + $0x1b0] sm:$0xff]  }
 0x24a   :  { %8426 = vmatprep.subr.bf16.mxu0 %v8727_v39  ;;  %8342 = vmatprep.subr.bf16.mxu1 %v8728_v3  ;;  %v4714_v19 = vsel %vm9054_vm2, %v4709_v8, %v4713_v58  ;;  %v10625_v9 = vrot.slane %v4725_v10, 5  ;;  %v4735_v22 = vrot.slane %v4733_v17, 5  ;;  %v7477_v54 = vrot.slane %v5078_v43, 9  ;;  %v4619_v48 = vld [vmem:[#allocation2 + $0x68] sm:$0xf] }
 0x24b   :  { %v10627_v61 = vrot.slane %v4722_v27, 4  ;;  %v10629_v45 = vrot.slane %v4739_v62, 5  ;;  %v10633_v33 = vsel %vm10014_vm5, %v7476_v30, %v5163_v42  ;;  %v5167_v47 = vrot.slane %v10608_v56, 5  ;;  %v10651_v43 = vld [vmem:[#allocation2 + $0x94] sm:$0x1] }
 0x24c   :  { %8343 = vmatpush3.bf16.msra.mxu1 %v8728_v3  ;;  %v4736_v25 = vor.u32 %v4735_v22, %v4732_v7  ;;  %v4744_v28 = vshrl.u32 %v4615_v16, 16  ;;  %v4747_v2 = vshll.u32 %v4615_v16, 16  ;;  %v4753_v40 = vshll.u32 %v10526_v49, 16  ;;  %v4621_v38 = vld [vmem:[#allocation2 + $0x70] sm:$0xf] }
 0x24d   :  { %8427 = vmatpush3.bf16.msra.mxu0 %v8727_v39  ;;  %8392 = vmatprep.subr.bf16.mxu1 %v8730_v14  ;;  %v7450_v55 = vcombine.low %v4700_v60, %v4714_v19  ;;  %v10641_v31 = vsel %vm10014_vm5, %v7477_v54, %v5167_v47  ;;  %v4758_v26 = vshrl.u32 %v4617_v18, 16  ;;  %v4761_v23 = vshll.u32 %v4617_v18, 16  ;;  %v5080_v39 = vld [vmem:[#allocation2 + $0x90] sm:$0xe]  ;;  %v10675_v22 = vld [vmem:[#allocation2 + $0x14] sm:$0x1] }
 0x24e   :  { %8428 = vmatprep.subr.bf16.mxu0 %v8729_v1  ;;  %v4728_v3 = vsel %vm9054_vm2, %v10627_v61, %v10625_v9  ;;  %v4737_v34 = vrot.slane %v4736_v25, 4  ;;  %v4746_v49 = vrot.slane %v4744_v28, 4  ;;  %v4749_v53 = vrot.slane %v4747_v2, 5  ;;  %v5630_v9 = vld [vmem:[#allocation2 + $0x10] sm:$0xf] }
 0x24f   :  { %8345 = vmatmul.mubr.bf16.vlgmr.msra.gmra.mxu1 %v10586_v11  ;;  %v7486_v59 = vcombine.low %v10633_v33, %v10641_v31  ;;  %v4760_v5 = vrot.slane %v4758_v26, 4  ;;  %v4763_v10 = vrot.slane %v4761_v23, 5  ;;  %v4767_v32 = vshll.u32 %v10530_v13, 16  ;;  %v10681_v47 = vld [vmem:[#allocation2 + $0x1c] sm:$0x1]  ;;  %v8735_v28 = vld [vmem:[#allocation3 + $0x1d0] sm:$0xff]  }
 0x250   :  { %8381 = vmatmul.mubr.bf16.gmra.mxu0 %v7483_v6  ;;  %8348 = vmatprep.mubr.bf16.mxu1 %v7450_v55  ;;  %v4750_v60 = vor.u32 %v4749_v53, %v4746_v49  ;;  %v4755_v58 = vrot.slane %v4753_v40, 5  ;;  %v7478_v36 = vrot.slane %v5079_v51, 9  ;;  %v5171_v11 = vrot.slane %v10636_v0, 5  ;;  %v8736_v55 = vld [vmem:[#allocation3 + $0x1a0] sm:$0xff]   ;;  %v8761_v44 = vld [vmem:[#allocation2 + $0x90] ss:$8 sps:$4 sm:$0xff]  }
 0x251   :  { %8384 = vmatprep.mubr.bf16.mxu0 %v7484_v52  ;;  %8429 = vmatpush3.bf16.msra.mxu0 %v8729_v1  ;;  %v4742_v13 = vsel %vm9054_vm2, %v4737_v34, %v10629_v45  ;;  %v4764_v16 = vor.u32 %v4763_v10, %v4760_v5  ;;  %v4769_v8 = vrot.slane %v4767_v32, 5  ;;  %v7479_v63 = vrot.slane %v5080_v39, 9  ;;  %v5632_v45 = vld [vmem:[#allocation2 + $0x18] sm:$0xf]  ;;  %v4625_v33 = vld [vmem:[#allocation2 + $0x80] sm:$0xf] }
 0x252   :  { %8393 = vmatpush3.bf16.msra.mxu1 %v8730_v14  ;;  %8430 = vmatprep.subr.bf16.mxu0 %v8731_v35  ;;  %v4751_v6 = vrot.slane %v4750_v60, 4  ;;  %v10665_v17 = vsel %vm10014_vm5, %v7478_v36, %v5171_v11  ;;  %v5175_v62 = vrot.slane %v10651_v43, 5  ;;  %v4772_v15 = vshrl.u32 %v4619_v48, 16  ;;  %v8738_v10 = vld [vmem:[#allocation3 + $0x198] sm:$0xff]  }
 0x253   :  { %8394 = vmatprep.subr.bf16.mxu1 %v8732_v29  ;;  %v4765_v52 = vrot.slane %v4764_v16, 4  ;;  %v4775_v27 = vshll.u32 %v4619_v48, 16  ;;  %v4781_v7 = vshll.u32 %v10566_v21, 16  ;;  %v4786_v30 = vshrl.u32 %v4621_v38, 16 }
 0x254   :  { %v4756_v14 = vsel %vm9054_vm2, %v4751_v6, %v4755_v58  ;;  %v10673_v42 = vsel %vm10014_vm5, %v7479_v63, %v5175_v62  ;;  %v4774_v1 = vrot.slane %v4772_v15, 4  ;;  %v4789_v19 = vshll.u32 %v4621_v38, 16  ;;  %v5634_v63 = vld [vmem:[#allocation2 + $0x20] sm:$0xf] }
 0x255   :  { %8431 = vmatpush3.bf16.msra.mxu0 %v8731_v35  ;;  %v7451_v54 = vcombine.low %v4728_v3, %v4742_v13  ;;  %v4770_v18 = vsel %vm9054_vm2, %v4765_v52, %v4769_v8  ;;  %v7487_v21 = vcombine.low %v10665_v17, %v10673_v42  ;;  %v4777_v61 = vrot.slane %v4775_v27, 5  ;;  %v8737_v3 = vld [vmem:[#allocation3 + $0x1c8] sm:$0xff]  }
 0x256   :  { %8395 = vmatpush3.bf16.msra.mxu1 %v8732_v29  ;;  %8432 = vmatprep.subr.bf16.mxu0 %v8733_v46  ;;  %v7452_v25 = vcombine.low %v4756_v14, %v4770_v18  ;;  %v4788_v2 = vrot.slane %v4786_v30, 4  ;;  %v4791_v40 = vrot.slane %v4789_v19, 5  ;;  %v4795_v51 = vshll.u32 %v10576_v50, 16  ;;  %v4623_v29 = vld [vmem:[#allocation2 + $0x78] sm:$0xf]  ;;  %v8739_v30 = vld [vmem:[#allocation3 + $0x1c0] sm:$0xff]  }
 0x257   :  { %8349 = vmatmul.mubr.bf16.gmra.mxu1 %v7451_v54  ;;  %8396 = vmatprep.subr.bf16.mxu1 %v8734_v20  ;;  %v4778_v26 = vor.u32 %v4777_v61, %v4774_v1  ;;  %v4783_v23 = vrot.slane %v4781_v7, 5  ;;  %v5663_v48 = vshrl.u32 %v5630_v9, 16  ;;  %v5666_v35 = vshll.u32 %v5630_v9, 16  ;;  %v8740_v14 = vld [vmem:[#allocation3 + $0x190] sm:$0xff]   ;;  %v10700_v9 = vld [vmem:[#allocation2 + $0x24] sm:$0x1] }
 0x258   :  { %8385 = vmatmul.mubr.bf16.gmra.mxu0 %v7485_v57  ;;  %8352 = vmatprep.mubr.bf16.mxu1 %v7452_v25  ;;  %v4792_v34 = vor.u32 %v4791_v40, %v4788_v2  ;;  %v5672_v49 = vshll.u32 %v10675_v22, 16  ;;  %v5677_v53 = vshrl.u32 %v5632_v45, 16  ;;  %v5680_v39 = vshll.u32 %v5632_v45, 16  ;;  %v5636_v54 = vld [vmem:[#allocation2 + $0x28] sm:$0xf] }
 0x259   :  { %8388 = vmatprep.mubr.bf16.mxu0 %v7486_v59  ;;  %8433 = vmatpush3.bf16.msra.mxu0 %v8733_v46  ;;  %v4779_v50 = vrot.slane %v4778_v26, 4  ;;  %v4797_v5 = vrot.slane %v4795_v51, 5  ;;  %v5665_v32 = vrot.slane %v5663_v48, 4  ;;  %v5668_v60 = vrot.slane %v5666_v35, 5  ;;  %v4627_v2 = vld [vmem:[#allocation2 + $0x88] sm:$0xf] }
 0x25a   :  { %8397 = vmatpush3.bf16.msra.mxu1 %v8734_v20  ;;  %8434 = vmatprep.subr.bf16.mxu0 %v8735_v28  ;;  %v4793_v24 = vrot.slane %v4792_v34, 4  ;;  %v5679_v12 = vrot.slane %v5677_v53, 4  ;;  %v5682_v57 = vrot.slane %v5680_v39, 5  ;;  %v5686_v58 = vshll.u32 %v10681_v47, 16  ;;  %v8741_v39 = vld [vmem:[#allocation3 + $0x188] sm:$0xff]  }
 0x25b   :  { %8398 = vmatprep.subr.bf16.mxu1 %v8736_v55  ;;  %v4784_v36 = vsel %vm9054_vm2, %v4779_v50, %v4783_v23  ;;  %v5669_v11 = vor.u32 %v5668_v60, %v5665_v32  ;;  %v4800_v31 = vshrl.u32 %v4623_v29, 16  ;;  %v4803_v59 = vshll.u32 %v4623_v29, 16 }
 0x25c   :  { %v4798_v38 = vsel %vm9054_vm2, %v4793_v24, %v4797_v5  ;;  %v5674_v13 = vrot.slane %v5672_v49, 5  ;;  %v5683_v16 = vor.u32 %v5682_v57, %v5679_v12  ;;  %v4809_v8 = vshll.u32 %v10598_v4, 16  ;;  %v4629_v49 = vld [vmem:[#allocation2 + $0x90] sm:$0xf] }
 0x25d   :  { %8435 = vmatpush3.bf16.msra.mxu0 %v8735_v28  ;;  %v7453_v46 = vcombine.low %v4784_v36, %v4798_v38  ;;  %v5670_v6 = vrot.slane %v5669_v11, 4  ;;  %v4802_v62 = vrot.slane %v4800_v31, 4  ;;  %v4805_v15 = vrot.slane %v4803_v59, 5  ;;  %v8743_v31 = vld [vmem:[#allocation3 + $0x180] sm:$0xff]  }
 0x25e   :  { %8399 = vmatpush3.bf16.msra.mxu1 %v8736_v55  ;;  %8436 = vmatprep.subr.bf16.mxu0 %v8737_v3  ;;  %v5684_v20 = vrot.slane %v5683_v16, 4  ;;  %v5688_v52 = vrot.slane %v5686_v58, 5  ;;  %v4814_v27 = vshrl.u32 %v4625_v33, 16  ;;  %v4817_v7 = vshll.u32 %v4625_v33, 16  ;;  %v5638_v33 = vld [vmem:[#allocation2 + $0x30] sm:$0xf] }
 0x25f   :  { %8353 = vmatmul.mubr.bf16.gmra.mxu1 %v7453_v46  ;;  %8400 = vmatprep.subr.bf16.mxu1 %v8738_v10  ;;  %v5675_v1 = vsel %vm9054_vm2, %v5670_v6, %v5674_v13  ;;  %v4806_v4 = vor.u32 %v4805_v15, %v4802_v62  ;;  %v4823_v19 = vshll.u32 %v10608_v56, 16  ;;  %v5691_v18 = vshrl.u32 %v5634_v63, 16  ;;  %v10707_v56 = vld [vmem:[#allocation2 + $0x2c] sm:$0x1] }
 0x260   :  { %8389 = vmatmul.mubr.bf16.gmra.mxu0 %v7487_v21  ;;  %v5689_v61 = vsel %vm9054_vm2, %v5684_v20, %v5688_v52  ;;  %v4816_v45 = vrot.slane %v4814_v27, 4  ;;  %v4819_v25 = vrot.slane %v4817_v7, 5  ;;  %v5694_v28 = vshll.u32 %v5634_v63, 16  ;;  %v10713_v21 = vld [vmem:[%s11292_s7 + $0x38] sm:$0xff]  }
 0x261   :  { %8437 = vmatpush3.bf16.msra.mxu0 %v8737_v3  ;;  %v7512_v40 = vcombine.low %v5675_v1, %v5689_v61  ;;  %v4807_v51 = vrot.slane %v4806_v4, 4  ;;  %v4811_v55 = vrot.slane %v4809_v8, 5  ;;  %v5693_v26 = vrot.slane %v5691_v18, 4  ;;  %v10722_v8 = vld [vmem:[#allocation2 + $0x34] sm:$0x1]  ;;  %v10727_v7 = vld [vmem:[#allocation3 + $0x238] sm:$0xff]  }
 0x262   :  { %v4820_v23 = vor.u32 %v4819_v25, %v4816_v45  ;;  %8401 = vmatpush3.bf16.msra.mxu1 %v8738_v10  ;;  %8438 = vmatprep.subr.bf16.mxu0 %v8739_v30  ;;  %v5696_v48 = vrot.slane %v5694_v28, 5  ;;  %v5700_v17 = vshll.u32 %v10700_v9, 16  ;;  %v5705_v42 = vshrl.u32 %v5636_v54, 16  ;;  %v5640_v63 = vld [vmem:[#allocation2 + $0x38] sm:$0xf] }
 0x263   :  { %8440 = vmatprep.mubr.bf16.mxu0 %v7512_v40  ;;  %v4812_v35 = vsel %vm9054_vm2, %v4807_v51, %v4811_v55  ;;  %v4825_v3 = vrot.slane %v4823_v19, 5  ;;  %8402 = vmatprep.subr.bf16.mxu1 %v8740_v14  ;;  %v5708_v34 = vshll.u32 %v5636_v54, 16  ;;  %v4828_v53 = vshrl.u32 %v4627_v2, 16  ;;  %v5642_v45 = vld [vmem:[#allocation2 + $0x40] sm:$0xf] }
 0x264   :  { %v4821_v29 = vrot.slane %v4820_v23, 4  ;;  %v5697_v50 = vor.u32 %v5696_v48, %v5693_v26  ;;  %v5707_v5 = vrot.slane %v5705_v42, 4  ;;  %v5714_v10 = vshll.u32 %v10707_v56, 16  ;;  %v10734_v25 = vld [vmem:[#allocation2 + $0x44] sm:$0x1]  ;;  %v10739_v26 = vld [vmem:[%s11292_s7 + $0x30] sm:$0xff]  }
 0x265   :  { %8439 = vmatpush3.bf16.msra.mxu0 %v8739_v30  ;;  %v5702_v32 = vrot.slane %v5700_v17, 5  ;;  %v5710_v60 = vrot.slane %v5708_v34, 5  ;;  %v4830_v24 = vrot.slane %v4828_v53, 4  ;;  %v4831_v12 = vshll.u32 %v4627_v2, 16  ;;  %v5644_v55 = vld [vmem:[#allocation2 + $0x48] sm:$0xf] }
 0x266   :  { %v4826_v57 = vsel %vm9054_vm2, %v4821_v29, %v4825_v3  ;;  %8403 = vmatpush3.bf16.msra.mxu1 %v8740_v14  ;;  %v5698_v58 = vrot.slane %v5697_v50, 4  ;;  %v4837_v36 = vshll.u32 %v10636_v0, 16  ;;  %v4842_v11 = vshrl.u32 %v4629_v49, 16  ;;  %8488 = vmatprep.subr.bf16.mxu0 %v10713_v21  ;;  %v10729_v14 = vld [vmem:[#allocation2 + $0x3c] sm:$0x1] }
 0x267   :  { %v7454_v59 = vcombine.low %v4812_v35, %v4826_v57  ;;  %v5711_v38 = vor.u32 %v5710_v60, %v5707_v5  ;;  %v4833_v13 = vrot.slane %v4831_v12, 5  ;;  %v4845_v16 = vshll.u32 %v4629_v49, 16  ;;  %8404 = vmatprep.subr.bf16.mxu1 %v8741_v39  ;;  %v8742_v50 = vld [vmem:[#allocation2 + $0x10] ss:$8 sps:$4 sm:$0xff]   ;;  %v10747_v5 = vld [vmem:[#allocation2 + $0x4c] sm:$0x1] }
 0x268   :  { %v5703_v46 = vsel %vm9054_vm2, %v5698_v58, %v5702_v32  ;;  %v5716_v6 = vrot.slane %v5714_v10, 5  ;;  %v4844_v62 = vrot.slane %v4842_v11, 4  ;;  %v4851_v0 = vshll.u32 %v10651_v43, 16  ;;  %v5646_v32 = vld [vmem:[#allocation2 + $0x60] sm:$0xf] }
 0x269   :  { %8356 = vmatprep.mubr.bf16.mxu1 %v7454_v59  ;;  %v5712_v15 = vrot.slane %v5711_v38, 4  ;;  %v4834_v20 = vor.u32 %v4833_v13, %v4830_v24  ;;  %v4847_v52 = vrot.slane %v4845_v16, 5  ;;  %v5719_v27 = vshrl.u32 %v5638_v33, 16  ;;  %v10751_v58 = vld [vmem:[#allocation2 + $0x64] sm:$0x1] }
 0x26a   :  { %v4839_v30 = vrot.slane %v4837_v36, 5  ;;  %v5722_v1 = vshll.u32 %v5638_v33, 16  ;;  %v5728_v4 = vshll.u32 %v10722_v8, 16  ;;  %v5733_v19 = vshrl.u32 %v5640_v63, 16  ;;  %8405 = vmatpush3.bf16.msra.mxu1 %v8741_v39  ;;  %v10757_v36 = vld [vmem:[%s11292_s7 + $0x28] sm:$0xff]  }
 0x26b   :  { %v5717_v54 = vsel %vm9054_vm2, %v5712_v15, %v5716_v6  ;;  %v4835_v18 = vrot.slane %v4834_v20, 4  ;;  %v4848_v43 = vor.u32 %v4847_v52, %v4844_v62  ;;  %v5721_v61 = vrot.slane %v5719_v27, 4  ;;  %8406 = vmatprep.subr.bf16.mxu1 %v8743_v31  ;;  %v5648_v38 = vld [vmem:[#allocation2 + $0x68] sm:$0xf]  ;;  %v10762_v15 = vld [vmem:[#allocation2 + $0x6c] sm:$0x1] }
 0x26c   :  { %v7513_v28 = vcombine.low %v5703_v46, %v5717_v54  ;;  %v4853_v2 = vrot.slane %v4851_v0, 5  ;;  %v5724_v40 = vrot.slane %v5722_v1, 5  ;;  %v5735_v51 = vrot.slane %v5733_v19, 4  ;;  %v10768_v52 = vld [vmem:[%s11292_s7 + $0x20] sm:$0xff]   ;;  %v5650_v19 = vld [vmem:[#allocation2 + $0x70] sm:$0xf] }
 0x26d   :  { %v4840_v23 = vsel %vm9054_vm2, %v4835_v18, %v4839_v30  ;;  %v4849_v48 = vrot.slane %v4848_v43, 4  ;;  %v5736_v17 = vshll.u32 %v5640_v63, 16  ;;  %v5742_v42 = vshll.u32 %v10729_v14, 16 }
 0x26e   :  { %8441 = vmatmul.mubr.bf16.vlgmr.msra.gmra.mxu0 %v7513_v28  ;;  %v5725_v35 = vor.u32 %v5724_v40, %v5721_v61  ;;  %8407 = vmatpush3.bf16.msra.mxu1 %v8743_v31  ;;  %v5747_v3 = vshrl.u32 %v5642_v45, 16  ;;  %v5750_v34 = vshll.u32 %v5642_v45, 16  ;;  %v5756_v49 = vshll.u32 %v10734_v25, 16  ;;  %v5652_v45 = vld [vmem:[#allocation2 + $0x78] sm:$0xf] }
 0x26f   :  { %v4854_v53 = vsel %vm9054_vm2, %v4849_v48, %v4853_v2  ;;  %v5730_v39 = vrot.slane %v5728_v4, 5  ;;  %v5738_v29 = vrot.slane %v5736_v17, 5  ;;  %v5761_v10 = vshrl.u32 %v5644_v55, 16  ;;  %8456 = vmatprep.subr.bf16.mxu1 %v10727_v7  ;;  %8489 = vmatpush3.bf16.msra.mxu0 %v10713_v21  ;;  %v8744_v40 = vld [vmem:[#allocation2 + $0x20] ss:$8 sps:$4 sm:$0xff]  }
 0x270   :  { %v7455_v60 = vcombine.low %v4840_v23, %v4854_v53  ;;  %v5726_v24 = vrot.slane %v5725_v35, 4  ;;  %v5749_v12 = vrot.slane %v5747_v3, 4  ;;  %v5752_v57 = vrot.slane %v5750_v34, 5  ;;  %8490 = vmatprep.subr.bf16.mxu0 %v10739_v26  ;;  %v10776_v23 = vld [vmem:[#allocation2 + $0x74] sm:$0x1] }
 0x271   :  { %v5739_v11 = vor.u32 %v5738_v29, %v5735_v51  ;;  %v5744_v33 = vrot.slane %v5742_v42, 5  ;;  %v5763_v31 = vrot.slane %v5761_v10, 4  ;;  %v5764_v59 = vshll.u32 %v5644_v55, 16  ;;  %v8746_v35 = vld [vmem:[#allocation2 + $0x30] ss:$8 sps:$4 sm:$0xff]  }
 0x272   :  { %8357 = vmatmul.mubr.bf16.gmra.mxu1 %v7455_v60  ;;  %v5753_v13 = vor.u32 %v5752_v57, %v5749_v12  ;;  %v5758_v16 = vrot.slane %v5756_v49, 5  ;;  %v5770_v63 = vshll.u32 %v10747_v5, 16  ;;  %v5775_v46 = vshrl.u32 %v5646_v32, 16  ;;  %v8747_v3 = vld [vmem:[#allocation3 + $0x230] sm:$0xff]   ;;  %v5654_v12 = vld [vmem:[#allocation2 + $0x80] sm:$0xf] }
 0x273   :  { %v5731_v6 = vsel %vm9054_vm2, %v5726_v24, %v5730_v39  ;;  %v5740_v62 = vrot.slane %v5739_v11, 4  ;;  %8408 = vmatprep.mubr.bf16.mxu1 %v8742_v50  ;;  %v5766_v0 = vrot.slane %v5764_v59, 5  ;;  %v5778_v20 = vshll.u32 %v5646_v32, 16  ;;  %8491 = vmatpush3.bf16.msra.mxu0 %v10739_v26  ;;  %v10780_v39 = vld [vmem:[#allocation2 + $0x7c] sm:$0x1] }
 0x274   :  { %v5754_v27 = vrot.slane %v5753_v13, 4  ;;  %v5777_v30 = vrot.slane %v5775_v46, 4  ;;  %v5784_v1 = vshll.u32 %v10751_v58, 16  ;;  %v5789_v4 = vshrl.u32 %v5648_v38, 16  ;;  %8492 = vmatprep.subr.bf16.mxu0 %v10757_v36  ;;  %v5656_v59 = vld [vmem:[#allocation2 + $0x88] sm:$0xf] }
 0x275   :  { %v5745_v54 = vsel %vm9054_vm2, %v5740_v62, %v5744_v33  ;;  %v5767_v18 = vor.u32 %v5766_v0, %v5763_v31  ;;  %v5772_v43 = vrot.slane %v5770_v63, 5  ;;  %v5780_v61 = vrot.slane %v5778_v20, 5 }
 0x276   :  { %v7514_v28 = vcombine.low %v5731_v6, %v5745_v54  ;;  %v5759_v2 = vsel %vm9054_vm2, %v5754_v27, %v5758_v16  ;;  %v5791_v51 = vrot.slane %v5789_v4, 4  ;;  %v5792_v55 = vshll.u32 %v5648_v38, 16  ;;  %v10789_v38 = vld [vmem:[%s11292_s7 + $0x18] sm:$0xff]   ;;  %v8750_v27 = vld [vmem:[#allocation3 + $0x228] sm:$0xff]  }
 0x277   :  { %v5768_v48 = vrot.slane %v5767_v18, 4  ;;  %v5781_v17 = vor.u32 %v5780_v61, %v5777_v30  ;;  %v5798_v42 = vshll.u32 %v10762_v15, 16  ;;  %v5803_v34 = vshrl.u32 %v5650_v19, 16  ;;  %8493 = vmatpush3.bf16.msra.mxu0 %v10757_v36  ;;  %v8749_v54 = vld [vmem:[#allocation2 + $0x40] ss:$8 sps:$4 sm:$0xff]  }
 0x278   :  { %8444 = vmatprep.mubr.bf16.mxu0 %v7514_v28  ;;  %v5786_v49 = vrot.slane %v5784_v1, 5  ;;  %v5794_v53 = vrot.slane %v5792_v55, 5  ;;  %v5806_v29 = vshll.u32 %v5650_v19, 16  ;;  %v5817_v50 = vshrl.u32 %v5652_v45, 16  ;;  %8494 = vmatprep.subr.bf16.mxu0 %v10768_v52  ;;  %v10795_v1 = vld [vmem:[#allocation2 + $0x84] sm:$0x1] }
 0x279   :  { %v5773_v10 = vsel %vm9054_vm2, %v5768_v48, %v5772_v43  ;;  %v5782_v32 = vrot.slane %v5781_v17, 4  ;;  %v5805_v60 = vrot.slane %v5803_v34, 4  ;;  %v5812_v24 = vshll.u32 %v10776_v23, 16  ;;  %v5658_v61 = vld [vmem:[#allocation2 + $0x90] sm:$0xf] }
 0x27a   :  { %v7515_v57 = vcombine.low %v5759_v2, %v5773_v10  ;;  %8409 = vmatmul.mubr.bf16.vlgmr.msra.gmra.mxu1 %v8744_v40  ;;  %v5795_v11 = vor.u32 %v5794_v53, %v5791_v51  ;;  %v5800_v33 = vrot.slane %v5798_v42, 5  ;;  %v5808_v31 = vrot.slane %v5806_v29, 5  ;;  %v10806_v55 = vld [vmem:[#allocation2 + $0x8c] sm:$0x1]  ;;  %v5660_v48 = vld [vmem:[#allocation2 + $0x98] sm:$0xf] }
 0x27b   :  { %v5787_v13 = vsel %vm9054_vm2, %v5782_v32, %v5786_v49  ;;  %8412 = vmatprep.mubr.bf16.mxu1 %v8746_v35  ;;  %8457 = vmatpush3.bf16.msra.mxu1 %v10727_v7  ;;  %v5819_v16 = vrot.slane %v5817_v50, 4  ;;  %v5820_v63 = vshll.u32 %v5652_v45, 16  ;;  %v5826_v46 = vshll.u32 %v10780_v39, 16  ;;  %v10804_v45 = vld [vmem:[%s11292_s7 + $0x10] sm:$0xff]   ;;  %v8751_v49 = vld [vmem:[#allocation2 + $0x60] ss:$8 sps:$4 sm:$0xff]  }
 0x27c   :  { %8445 = vmatmul.mubr.bf16.gmra.mxu0 %v7515_v57  ;;  %v5796_v6 = vrot.slane %v5795_v11, 4  ;;  %8458 = vmatprep.subr.bf16.mxu1 %v8747_v3  ;;  %v5809_v62 = vor.u32 %v5808_v31, %v5805_v60  ;;  %v5831_v0 = vshrl.u32 %v5654_v12, 16  ;;  %v5834_v20 = vshll.u32 %v5654_v12, 16  ;;  %v8753_v53 = vld [vmem:[#allocation3 + $0x220] sm:$0xff]   ;;  %v10819_v11 = vld [vmem:[%s11292_s7 + $0x8] sm:$0xff]  }
 0x27d   :  { %v5822_v30 = vrot.slane %v5820_v63, 5  ;;  %v5845_v4 = vshrl.u32 %v5656_v59, 16  ;;  %8495 = vmatpush3.bf16.msra.mxu0 %v10768_v52  ;;  %v5814_v2 = vrot.slane %v5812_v24, 5  ;;  %v5828_v51 = vrot.slane %v5826_v46, 5  ;;  %v10823_v46 = vld [vmem:[#allocation2 + $0x9c] sm:$0x1] }
 0x27e   :  { %v5801_v7 = vsel %vm9054_vm2, %v5796_v6, %v5800_v33  ;;  %v5810_v19 = vrot.slane %v5809_v62, 4  ;;  %v5833_v18 = vrot.slane %v5831_v0, 4  ;;  %v5836_v43 = vrot.slane %v5834_v20, 5  ;;  %8496 = vmatprep.subr.bf16.mxu0 %v10789_v38  ;;  %v8756_v62 = vld [vmem:[#allocation3 + $0x218] sm:$0xff]  }
 0x27f   :  { %v7516_v28 = vcombine.low %v5787_v13, %v5801_v7  ;;  %8459 = vmatpush3.bf16.msra.mxu1 %v8747_v3  ;;  %v5823_v40 = vor.u32 %v5822_v30, %v5819_v16  ;;  %v5840_v42 = vshll.u32 %v10795_v1, 16  ;;  %v5847_v35 = vrot.slane %v5845_v4, 4  ;;  %v10811_v3 = vld [vmem:[#allocation2 + $0x94] sm:$0x1] }
 0x280   :  { %v5837_v17 = vor.u32 %v5836_v43, %v5833_v18  ;;  %v5848_v34 = vshll.u32 %v5656_v59, 16  ;;  %8460 = vmatprep.subr.bf16.mxu1 %v8750_v27  ;;  %v5815_v29 = vsel %vm9054_vm2, %v5810_v19, %v5814_v2  ;;  %v5859_v10 = vshrl.u32 %v5658_v61, 16 }
 0x281   :  { %8448 = vmatprep.mubr.bf16.mxu0 %v7516_v28  ;;  %v5824_v50 = vrot.slane %v5823_v40, 4  ;;  %v5862_v32 = vshll.u32 %v5658_v61, 16  ;;  %8497 = vmatpush3.bf16.msra.mxu0 %v10789_v38  ;;  %v5854_v12 = vshll.u32 %v10806_v55, 16  ;;  %v5873_v57 = vshrl.u32 %v5660_v48, 16  ;;  %v6096_v61 = vld [vmem:[#allocation2 + $0x10] sm:$0xe] }
 0x282   :  { %8413 = vmatmul.mubr.bf16.gmra.mxu1 %v8749_v54  ;;  %v5838_v60 = vrot.slane %v5837_v17, 4  ;;  %v5850_v24 = vrot.slane %v5848_v34, 5  ;;  %8498 = vmatprep.subr.bf16.mxu0 %v10804_v45  ;;  %v5861_v31 = vrot.slane %v5859_v10, 4  ;;  %v5842_v16 = vrot.slane %v5840_v42, 5  ;;  %v10834_v54 = vld [vmem:[%s11292_s7] sm:$0xff]   ;;  %v8759_v34 = vld [vmem:[#allocation3 + $0x210] sm:$0xff]  }
 0x283   :  { %v5829_v33 = vsel %vm9054_vm2, %v5824_v50, %v5828_v51  ;;  %8416 = vmatprep.mubr.bf16.mxu1 %v8751_v49  ;;  %8461 = vmatpush3.bf16.msra.mxu1 %v8750_v27  ;;  %v5864_v59 = vrot.slane %v5862_v32, 5  ;;  %v5868_v6 = vshll.u32 %v10811_v3, 16  ;;  %v5875_v20 = vrot.slane %v5873_v57, 4  ;;  %v6097_v28 = vld [vmem:[#allocation2 + $0x18] sm:$0xe] }
 0x284   :  { %v7517_v13 = vcombine.low %v5815_v29, %v5829_v33  ;;  %v5851_v63 = vor.u32 %v5850_v24, %v5847_v35  ;;  %8462 = vmatprep.subr.bf16.mxu1 %v8753_v53  ;;  %v5876_v30 = vshll.u32 %v5660_v48, 16  ;;  %v5882_v4 = vshll.u32 %v10823_v46, 16  ;;  %v8755_v40 = vld [vmem:[#allocation2 + $0x70] ss:$8 sps:$4 sm:$0xff]   ;;  %v8757_v35 = vld [vmem:[#allocation2 + $0x80] ss:$8 sps:$4 sm:$0xff]  }
 0x285   :  { %v5865_v0 = vor.u32 %v5864_v59, %v5861_v31  ;;  %8499 = vmatpush3.bf16.msra.mxu0 %v10804_v45  ;;  %v5843_v27 = vsel %vm9054_vm2, %v5838_v60, %v5842_v16  ;;  %v5856_v19 = vrot.slane %v5854_v12, 5  ;;  %v5870_v48 = vrot.slane %v5868_v6, 5  ;;  %v8762_v24 = vld [vmem:[#allocation3 + $0x208] sm:$0xff]   ;;  %v6098_v33 = vld [vmem:[#allocation2 + $0x20] sm:$0xe] }
 0x286   :  { %8449 = vmatmul.mubr.bf16.gmra.mxu0 %v7517_v13  ;;  %v5852_v7 = vrot.slane %v5851_v63, 4  ;;  %8500 = vmatprep.subr.bf16.mxu0 %v10819_v11  ;;  %v5878_v43 = vrot.slane %v5876_v30, 5  ;;  %v5884_v42 = vrot.slane %v5882_v4, 5  ;;  %v7528_v49 = vrot.slane %v6096_v61, 9  ;;  %v6099_v31 = vld [vmem:[#allocation2 + $0x28] sm:$0xe] }
 0x287   :  { %8463 = vmatpush3.bf16.msra.mxu1 %v8753_v53  ;;  %v5866_v18 = vrot.slane %v5865_v0, 4  ;;  %v6146_v53 = vrot.slane %v10675_v22, 5  ;;  %v7529_v29 = vrot.slane %v6097_v28, 9  ;;  %v6150_v50 = vrot.slane %v10681_v47, 5  ;;  %v8767_v22 = vld [vmem:[%s11285_s0 + $0x1b0] ss:$8 sps:$4 sm:$0xff]  }
 0x288   :  { %v5857_v2 = vsel %vm9054_vm2, %v5852_v7, %v5856_v19  ;;  %8464 = vmatprep.subr.bf16.mxu1 %v8756_v62  ;;  %v5879_v17 = vor.u32 %v5878_v43, %v5875_v20  ;;  %v6100_v59 = vld [vmem:[#allocation2 + $0x30] sm:$0xe]  ;;  %v6101_v13 = vld [vmem:[#allocation2 + $0x38] sm:$0xe]  ;;  %v8764_v63 = vld [vmem:[#allocation3 + $0x200] sm:$0xff]   ;;  %v7530_v6 = vrot.slane %v6098_v33, 9 }
 0x289   :  { %v7518_v51 = vcombine.low %v5843_v27, %v5857_v2  ;;  %8501 = vmatpush3.bf16.msra.mxu0 %v10819_v11  ;;  %v5871_v10 = vsel %vm9054_vm2, %v5866_v18, %v5870_v48  ;;  %v6147_v47 = vsel %vm10014_vm5, %v7528_v49, %v6146_v53  ;;  %v6151_v57 = vsel %vm10014_vm5, %v7529_v29, %v6150_v50  ;;  %v8768_v19 = vld [vmem:[%s11285_s0 + $0x1c0] ss:$8 sps:$4 sm:$0xff]  }
 0x28a   :  { %8417 = vmatmul.mubr.bf16.gmra.mxu1 %v8755_v40  ;;  %8502 = vmatprep.subr.bf16.mxu0 %v10834_v54  ;;  %v5880_v32 = vrot.slane %v5879_v17, 4  ;;  %v7544_v16 = vcombine.low %v6147_v47, %v6151_v57  ;;  %v7531_v0 = vrot.slane %v6099_v31, 9  ;;  %v6158_v20 = vrot.slane %v10707_v56, 5  ;;  %v6103_v61 = vld [vmem:[#allocation2 + $0x48] sm:$0xe] }
 0x28b   :  { %8452 = vmatprep.mubr.bf16.mxu0 %v7518_v51  ;;  %8420 = vmatprep.mubr.bf16.mxu1 %v8757_v35  ;;  %v7532_v30 = vrot.slane %v6100_v59, 9  ;;  %v6162_v4 = vrot.slane %v10722_v8, 5  ;;  %v7533_v27 = vrot.slane %v6101_v13, 9  ;;  %v6166_v7 = vrot.slane %v10729_v14, 5  ;;  %v6102_v8 = vld [vmem:[#allocation2 + $0x40] sm:$0xe] }
 0x28c   :  { %8465 = vmatpush3.bf16.msra.mxu1 %v8756_v62  ;;  %v5885_v60 = vsel %vm9054_vm2, %v5880_v32, %v5884_v42  ;;  %v6154_v62 = vrot.slane %v10700_v9, 5  ;;  %v8769_v9 = vld [vmem:[%s11285_s0 + $0x1d0] ss:$8 sps:$4 sm:$0xff]   ;;  %v6159_v18 = vsel %vm10014_vm5, %v7531_v0, %v6158_v20  ;;  %v6104_v28 = vld [vmem:[#allocation2 + $0x60] sm:$0xe]  ;;  %v7534_v51 = vrot.slane %v6102_v8, 9 }
 0x28d   :  { %8466 = vmatprep.subr.bf16.mxu1 %v8759_v34  ;;  %v7519_v12 = vcombine.low %v5871_v10, %v5885_v60  ;;  %8503 = vmatpush3.bf16.msra.mxu0 %v10834_v54  ;;  %v6163_v14 = vsel %vm10014_vm5, %v7532_v30, %v6162_v4  ;;  %v6167_v43 = vsel %vm10014_vm5, %v7533_v27, %v6166_v7  ;;  %v6105_v2 = vld [vmem:[#allocation2 + $0x68] sm:$0xe]  ;;  %v6170_v17 = vrot.slane %v10734_v25, 5  ;;  %v6106_v10 = vld [vmem:[#allocation2 + $0x70] sm:$0xe] }
 0x28e   :  { %v6155_v56 = vsel %vm10014_vm5, %v7530_v6, %v6154_v62  ;;  %v7546_v48 = vcombine.low %v6163_v14, %v6167_v43  ;;  %v7535_v42 = vrot.slane %v6103_v61, 9  ;;  %v6174_v35 = vrot.slane %v10747_v5, 5  ;;  %v8770_v50 = vld [vmem:[%s11285_s0 + $0x1e0] ss:$8 sps:$4 sm:$0xff]  }
 0x28f   :  { %8453 = vmatmul.mubr.bf16.gmra.mxu0 %v7519_v12  ;;  %v7545_v40 = vcombine.low %v6155_v56, %v6159_v18  ;;  %v6178_v49 = vrot.slane %v10751_v58, 5  ;;  %v7537_v53 = vrot.slane %v6105_v2, 9  ;;  %v6182_v29 = vrot.slane %v10762_v15, 5  ;;  %v6108_v32 = vld [vmem:[#allocation2 + $0x80] sm:$0xe] }
 0x290   :  { %8467 = vmatpush3.bf16.msra.mxu1 %v8759_v34  ;;  %8504 = vmatprep.mubr.bf16.mxu0 %v8767_v22  ;;  %v7536_v34 = vrot.slane %v6104_v28, 9  ;;  %v6171_v25 = vsel %vm10014_vm5, %v7534_v51, %v6170_v17  ;;  %v6175_v5 = vsel %vm10014_vm5, %v7535_v42, %v6174_v35  ;;  %v6109_v60 = vld [vmem:[#allocation2 + $0x88] sm:$0xe]  ;;  %v7538_v22 = vrot.slane %v6106_v10, 9 }
 0x291   :  { %8468 = vmatprep.subr.bf16.mxu1 %v8762_v24  ;;  %v6183_v15 = vsel %vm10014_vm5, %v7537_v53, %v6182_v29  ;;  %v6186_v47 = vrot.slane %v10776_v23, 5  ;;  %v6190_v33 = vrot.slane %v10780_v39, 5  ;;  %v7540_v31 = vrot.slane %v6108_v32, 9  ;;  %v8774_v56 = vld [vmem:[%s11285_s0 + $0x228] ss:$8 sps:$4 sm:$0xff]  }
 0x292   :  { %8421 = vmatmul.mubr.bf16.gmra.mxu1 %v8761_v44  ;;  %v6179_v58 = vsel %vm10014_vm5, %v7536_v34, %v6178_v49  ;;  %v6194_v44 = vrot.slane %v10795_v1, 5  ;;  %v7541_v59 = vrot.slane %v6109_v60, 9  ;;  %v6202_v62 = vrot.slane %v10811_v3, 5  ;;  %v8771_v3 = vld [vmem:[%s11285_s0 + $0x1f8] ss:$8 sps:$4 sm:$0xff]  }
 0x293   :  { %8472 = vmatprep.mubr.bf16.mxu1 %v7544_v16  ;;  %v7548_v12 = vcombine.low %v6179_v58, %v6183_v15  ;;  %v6187_v13 = vsel %vm10014_vm5, %v7538_v22, %v6186_v47  ;;  %v6110_v16 = vld [vmem:[#allocation2 + $0x90] sm:$0xe]  ;;  %v6206_v20 = vrot.slane %v10823_v46, 5 }
 0x294   :  { %8469 = vmatpush3.bf16.msra.mxu1 %v8762_v24  ;;  %v7547_v24 = vcombine.low %v6171_v25, %v6175_v5  ;;  %v6195_v39 = vsel %vm10014_vm5, %v7540_v31, %v6194_v44 }
 0x295   :  { %8470 = vmatprep.subr.bf16.mxu1 %v8764_v63 }
 0x297   :  { %8505 = vmatmul.mubr.bf16.vlgmr.msra.gmra.mxu0 %v8768_v19 }
 0x298   :  { %8471 = vmatpush3.bf16.msra.mxu1 %v8764_v63  ;;  %8508 = vmatprep.mubr.bf16.mxu0 %v8769_v9  ;;  %v6111_v63 = vld [vmem:[#allocation2 + $0x98] sm:$0xe] }
 0x299   :  { %8520 = vmatprep.subr.bf16.mxu1 %v10713_v21  ;;  %v7543_v0 = vrot.slane %v6111_v63, 9 }
 0x29b   :  { %8473 = vmatmul.mubr.bf16.vlgmr.msra.gmra.mxu1 %v7545_v40 }
 0x29c   :  { %8476 = vmatprep.mubr.bf16.mxu1 %v7546_v48  ;;  %8528 = vmatpush3.bf16.msra.mxu1 %v10713_v21  ;;  %v6107_v21 = vld [vmem:[#allocation2 + $0x78] sm:$0xe] }
 0x29d   :  { %8521 = vmatprep.subr.bf16.mxu1 %v10739_v26  ;;  %v7539_v57 = vrot.slane %v6107_v21, 9 }
 0x29f   :  { %8509 = vmatmul.mubr.bf16.gmra.mxu0 %v8770_v50  ;;  %v6191_v23 = vsel %vm10014_vm5, %v7539_v57, %v6190_v33 }
 0x2a0   :  { %8529 = vmatpush3.bf16.msra.mxu1 %v10739_v26  ;;  %v6198_v26 = vrot.slane %v10806_v55, 5  ;;  %v7549_v55 = vcombine.low %v6187_v13, %v6191_v23 }
 0x2a1   :  { %8522 = vmatprep.subr.bf16.mxu1 %v10757_v36 }
 0x2a2   :  { %v6199_v1 = vsel %vm10014_vm5, %v7541_v59, %v6198_v26 }
 0x2a3   :  { %8477 = vmatmul.mubr.bf16.gmra.mxu1 %v7547_v24  ;;  %v7550_v6 = vcombine.low %v6195_v39, %v6199_v1 }
 0x2a4   :  { %8480 = vmatprep.mubr.bf16.mxu1 %v7548_v12  ;;  %8530 = vmatpush3.bf16.msra.mxu1 %v10757_v36  ;;  %v7542_v36 = vrot.slane %v6110_v16, 9 }
 0x2a5   :  { %8523 = vmatprep.subr.bf16.mxu1 %v10768_v52 }
 0x2a6   :  { %v6203_v30 = vsel %vm10014_vm5, %v7542_v36, %v6202_v62 }
 0x2a8   :  { %8531 = vmatpush3.bf16.msra.mxu1 %v10768_v52  ;;  %v6207_v52 = vsel %vm10014_vm5, %v7543_v0, %v6206_v20 }
 0x2a9   :  { %8524 = vmatprep.subr.bf16.mxu1 %v10789_v38  ;;  %v7551_v46 = vcombine.low %v6203_v30, %v6207_v52 }
 0x2ab   :  { %8481 = vmatmul.mubr.bf16.gmra.mxu1 %v7549_v55 }
 0x2ac   :  { %8484 = vmatprep.mubr.bf16.mxu1 %v7550_v6  ;;  %8532 = vmatpush3.bf16.msra.mxu1 %v10789_v38 }
 0x2ad   :  { %8525 = vmatprep.subr.bf16.mxu1 %v10804_v45 }
 0x2ae   :  { %v8250_v4 = vpop.f32.mrf.mxu0 }
 0x2b0   :  { %8533 = vmatpush3.bf16.msra.mxu1 %v10804_v45  ;;  %v3969_v27 = vpop.f32.mrf.mxu0  ;;  %v8773_v45 = vld [vmem:[%s11285_s0 + $0x218] ss:$8 sps:$4 sm:$0xff]  }
 0x2b1   :  { %8526 = vmatprep.subr.bf16.mxu1 %v10819_v11 }
 0x2b2   :  { %v8251_v38 = vpop.f32.mrf.mxu0 }
 0x2b3   :  { %8485 = vmatmul.mubr.bf16.gmra.mxu1 %v7551_v46 }
 0x2b4   :  { %8534 = vmatpush3.bf16.msra.mxu1 %v10819_v11  ;;  %8512 = vmatprep.mubr.bf16.mxu1 %v8771_v3  ;;  %v3972_v7 = vpop.f32.mrf.mxu0 }
 0x2b5   :  { %8527 = vmatprep.subr.bf16.mxu1 %v10834_v54 }
 0x2b6   :  { %v8254_v9 = vpop.f32.mrf.mxu0 }
 0x2b8   :  { %8535 = vmatpush3.bf16.msra.mxu1 %v10834_v54  ;;  %v3985_v43 = vpop.f32.mrf.mxu0 }
 0x2ba   :  { %v8255_v2 = vpop.f32.mrf.mxu0 }
 0x2bb   :  { %8513 = vmatmul.mubr.bf16.vlgmr.msra.gmra.mxu1 %v8772_v37 }
 0x2bc   :  { %8516 = vmatprep.mubr.bf16.mxu1 %v8773_v45  ;;  %v8218_v19 = vpop.f32.mrf.mxu1  ;;  %v3988_v40 = vpop.f32.mrf.mxu0 }
 0x2bd   :  { %v3978_v11 = vadd.f32 %v8250_v4, %v8218_v19 }
 0x2be   :  { %v3776_v18 = vpop.f32.mrf.mxu1 }
 0x2bf   :  { %v3970_v8 = vadd.f32 %v3969_v27, %v3776_v18 }
 0x2c0   :  { %v8219_v14 = vpop.f32.mrf.mxu1 }
 0x2c1   :  { %v3981_v61 = vadd.f32 %v8251_v38, %v8219_v14 }
 0x2c2   :  { %v3779_v54 = vpop.f32.mrf.mxu1 }
 0x2c3   :  { %8517 = vmatmul.mubr.bf16.gmra.mxu1 %v8774_v56  ;;  %v3973_v28 = vadd.f32 %v3972_v7, %v3779_v54 }
 0x2cb   :  { %v8222_v51 = vpop.f32.mrf.mxu1 }
 0x2cc   :  { %v3994_v48 = vadd.f32 %v8254_v9, %v8222_v51 }
 0x2cd   :  { %v3792_v17 = vpop.f32.mrf.mxu1 }
 0x2ce   :  { %v8258_v42 = vpop.f32.mrf.mxu0  ;;  %v3986_v35 = vadd.f32 %v3985_v43, %v3792_v17 }
 0x2cf   :  { %v8223_v34 = vpop.f32.mrf.mxu1 }
 0x2d0   :  { %v3997_v49 = vadd.f32 %v8255_v2, %v8223_v34  ;;  %v4001_v53 = vpop.f32.mrf.mxu0 }
 0x2d1   :  { %v3795_v29 = vpop.f32.mrf.mxu1 }
 0x2d2   :  { %v3989_v50 = vadd.f32 %v3988_v40, %v3795_v29  ;;  %v8259_v25 = vpop.f32.mrf.mxu0 }
 0x2d4   :  { %v4004_v5 = vpop.f32.mrf.mxu0 }
 0x2da   :  { %v8226_v10 = vpop.f32.mrf.mxu1 }
 0x2db   :  { %v4010_v58 = vadd.f32 %v8258_v42, %v8226_v10 }
 0x2dc   :  { %v3808_v15 = vpop.f32.mrf.mxu1 }
 0x2dd   :  { %v8262_v21 = vpop.f32.mrf.mxu0  ;;  %v4002_v32 = vadd.f32 %v4001_v53, %v3808_v15 }
 0x2de   :  { %v8227_v60 = vpop.f32.mrf.mxu1 }
 0x2df   :  { %v4017_v24 = vpop.f32.mrf.mxu0  ;;  %v4013_v22 = vadd.f32 %v8259_v25, %v8227_v60 }
 0x2e0   :  { %v3811_v12 = vpop.f32.mrf.mxu1 }
 0x2e1   :  { %v8263_v47 = vpop.f32.mrf.mxu0  ;;  %v4005_v57 = vadd.f32 %v4004_v5, %v3811_v12 }
 0x2e3   :  { %v4020_v33 = vpop.f32.mrf.mxu0 }
 0x2e5   :  { %v8314_v31 = vpop.f32.mrf.mxu0 }
 0x2e6   :  { %v8230_v44 = vpop.f32.mrf.mxu1 }
 0x2e7   :  { %v4026_v59 = vadd.f32 %v8262_v21, %v8230_v44  ;;  %v4520_v26 = vpop.f32.mrf.mxu0 }
 0x2e8   :  { %v3824_v13 = vpop.f32.mrf.mxu1 }
 0x2e9   :  { %v4018_v23 = vadd.f32 %v4017_v24, %v3824_v13  ;;  %v8315_v16 = vpop.f32.mrf.mxu0 }
 0x2ea   :  { %v8231_v39 = vpop.f32.mrf.mxu1 }
 0x2eb   :  { %v4029_v1 = vadd.f32 %v8263_v47, %v8231_v39  ;;  %v4523_v63 = vpop.f32.mrf.mxu0 }
 0x2ec   :  { %v3827_v55 = vpop.f32.mrf.mxu1 }
 0x2ed   :  { %v4021_v36 = vadd.f32 %v4020_v33, %v3827_v55 }
 0x2ee   :  { %v8282_v6 = vpop.f32.mrf.mxu1 }
 0x2ef   :  { %v4343_v62 = vadd.f32 %v8282_v6, %v3978_v11 }
 0x2f0   :  { %v8318_v0 = vpop.f32.mrf.mxu0  ;;  %v4278_v20 = vpop.f32.mrf.mxu1 }
 0x2f1   :  { %v4341_v30 = vadd.f32 %v4278_v20, %v3970_v8  ;;  %v4585_v52 = vadd.f32 %v8314_v31, %v4343_v62 }
 0x2f2   :  { %v4536_v4 = vpop.f32.mrf.mxu0  ;;  %v8283_v3 = vpop.f32.mrf.mxu1 }
 0x2f3   :  { %v4344_v46 = vadd.f32 %v8283_v3, %v3981_v61  ;;  %v4583_v27 = vadd.f32 %v4520_v26, %v4341_v30 }
 0x2f4   :  { %v8319_v38 = vpop.f32.mrf.mxu0  ;;  %v4281_v37 = vpop.f32.mrf.mxu1 }
 0x2f5   :  { %v4342_v45 = vadd.f32 %v4281_v37, %v3973_v28  ;;  %v4586_v7 = vadd.f32 %v8315_v16, %v4344_v46 }
 0x2f6   :  { %v4539_v19 = vpop.f32.mrf.mxu0  ;;  %v8286_v9 = vpop.f32.mrf.mxu1 }
 0x2f7   :  { %v4347_v56 = vadd.f32 %v8286_v9, %v3994_v48  ;;  %v4584_v18 = vadd.f32 %v4523_v63, %v4342_v45 }
 0x2f8   :  { %v8322_v14 = vpop.f32.mrf.mxu0  ;;  %v4294_v43 = vpop.f32.mrf.mxu1 }
 0x2f9   :  { %v4345_v54 = vadd.f32 %v4294_v43, %v3986_v35  ;;  %v4589_v11 = vadd.f32 %v8318_v0, %v4347_v56 }
 0x2fa   :  { %v4552_v2 = vpop.f32.mrf.mxu0  ;;  %v8287_v40 = vpop.f32.mrf.mxu1 }
 0x2fb   :  { %v4348_v8 = vadd.f32 %v8287_v40, %v3997_v49  ;;  %v4587_v51 = vadd.f32 %v4536_v4, %v4345_v54 }
 0x2fc   :  { %v8323_v17 = vpop.f32.mrf.mxu0  ;;  %v4297_v42 = vpop.f32.mrf.mxu1 }
 0x2fd   :  { %v4346_v61 = vadd.f32 %v4297_v42, %v3989_v50  ;;  %v4590_v34 = vadd.f32 %v8319_v38, %v4348_v8 }
 0x2fe   :  { %v4555_v53 = vpop.f32.mrf.mxu0  ;;  %v8290_v29 = vpop.f32.mrf.mxu1 }
 0x2ff   :  { %v4351_v28 = vadd.f32 %v8290_v29, %v4010_v58  ;;  %v4588_v25 = vadd.f32 %v4539_v19, %v4346_v61 }
 0x300   :  { %v8326_v5 = vpop.f32.mrf.mxu0  ;;  %v4310_v10 = vpop.f32.mrf.mxu1 }
 0x301   :  { %v4349_v48 = vadd.f32 %v4310_v10, %v4002_v32  ;;  %v4593_v15 = vadd.f32 %v8322_v14, %v4351_v28 }
 0x302   :  { %v4568_v21 = vpop.f32.mrf.mxu0  ;;  %v8291_v60 = vpop.f32.mrf.mxu1 }
 0x303   :  { %v4352_v35 = vadd.f32 %v8291_v60, %v4013_v22  ;;  %v4591_v24 = vadd.f32 %v4552_v2, %v4349_v48 }
 0x304   :  { %v8327_v12 = vpop.f32.mrf.mxu0  ;;  %v4313_v47 = vpop.f32.mrf.mxu1 }
 0x305   :  { %v4350_v49 = vadd.f32 %v4313_v47, %v4005_v57  ;;  %v4594_v33 = vadd.f32 %v8323_v17, %v4352_v35 }
 0x306   :  { %v4571_v31 = vpop.f32.mrf.mxu0  ;;  %v8294_v44 = vpop.f32.mrf.mxu1 }
 0x307   :  { %v4355_v50 = vadd.f32 %v8294_v44, %v4026_v59  ;;  %v4592_v26 = vadd.f32 %v4555_v53, %v4350_v49 }
 0x308   :  { %v8378_v13 = vpop.f32.mrf.mxu0  ;;  %v4326_v16 = vpop.f32.mrf.mxu1 }
 0x309   :  { %v4353_v58 = vadd.f32 %v4326_v16, %v4018_v23  ;;  %v4597_v39 = vadd.f32 %v8326_v5, %v4355_v50 }
 0x30a   :  { %v10933_v63 = vpop.f32.mrf.mxu0  ;;  %v8295_v32 = vpop.f32.mrf.mxu1 }
 0x30b   :  { %v4356_v55 = vadd.f32 %v8295_v32, %v4029_v1  ;;  %v4595_v6 = vadd.f32 %v4568_v21, %v4353_v58 }
 0x30c   :  { %v10935_v62 = vpop.f32.mrf.mxu0  ;;  %v4329_v22 = vpop.f32.mrf.mxu1 }
 0x30d   :  { %v4354_v0 = vadd.f32 %v4329_v22, %v4021_v36  ;;  %v4598_v20 = vadd.f32 %v8327_v12, %v4356_v55 }
 0x30e   :  { %v10937_v57 = vpop.f32.mrf.mxu0 }
 0x30f   :  { %v8346_v30 = vpop.f32.mrf.mxu1  ;;  %v4596_v4 = vadd.f32 %v4571_v31, %v4354_v0 }
 0x310   :  { %v8382_v59 = vpop.f32.mrf.mxu0  ;;  %v5051_v3 = vadd.f32 %v8346_v30, %v4585_v52 }
 0x311   :  { %v4986_v46 = vpop.f32.mrf.mxu1 }
 0x312   :  { %v10939_v38 = vpop.f32.mrf.mxu0  ;;  %v10941_v23 = vadd.f32 %v4986_v46, %v4583_v27  ;;  %v10943_v37 = vadd.f32 %v8378_v13, %v5051_v3 }
 0x313   :  { %v8347_v1 = vpop.f32.mrf.mxu1 }
 0x314   :  { %v10945_v45 = vpop.f32.mrf.mxu0  ;;  %v10947_v19 = vadd.f32 %v8347_v1, %v4586_v7 }
 0x315   :  { %v4989_v36 = vpop.f32.mrf.mxu1 }
 0x316   :  { %v10949_v9 = vpop.f32.mrf.mxu0  ;;  %v10951_v56 = vadd.f32 %v4989_v36, %v4584_v18 }
 0x317   :  { %v8350_v14 = vpop.f32.mrf.mxu1 }
 0x318   :  { %v8386_v43 = vpop.f32.mrf.mxu0  ;;  %v5055_v52 = vadd.f32 %v8350_v14, %v4589_v11  ;;  %v5372_v41 = vadd.f32 %v10937_v57, %v10951_v56 }
 0x319   :  { %v5002_v54 = vpop.f32.mrf.mxu1 }
 0x31a   :  { %v10953_v2 = vpop.f32.mrf.mxu0  ;;  %v10955_v27 = vadd.f32 %v5002_v54, %v4587_v51  ;;  %v10957_v40 = vadd.f32 %v8382_v59, %v5055_v52 }
 0x31b   :  { %v8351_v8 = vpop.f32.mrf.mxu1 }
 0x31c   :  { %v10959_v17 = vpop.f32.mrf.mxu0  ;;  %v10961_v7 = vadd.f32 %v8351_v8, %v4590_v34 }
 0x31d   :  { %v5005_v42 = vpop.f32.mrf.mxu1 }
 0x31e   :  { %v10963_v61 = vpop.f32.mrf.mxu0  ;;  %v10965_v18 = vadd.f32 %v5005_v42, %v4588_v25 }
 0x31f   :  { %v8354_v53 = vpop.f32.mrf.mxu1 }
 0x320   :  { %v8390_v29 = vpop.f32.mrf.mxu0  ;;  %v5059_v11 = vadd.f32 %v8354_v53, %v4593_v15 }
 0x321   :  { %v5018_v28 = vpop.f32.mrf.mxu1 }
 0x322   :  { %v10967_v5 = vpop.f32.mrf.mxu0  ;;  %v10969_v51 = vadd.f32 %v5018_v28, %v4591_v24  ;;  %v10971_v10 = vadd.f32 %v8386_v43, %v5059_v11 }
 0x323   :  { %v8355_v48 = vpop.f32.mrf.mxu1 }
 0x324   :  { %v10973_v21 = vadd.f32 %v8355_v48, %v4594_v33  ;;  %v10975_v60 = vpop.f32.mrf.mxu0 }
 0x325   :  { %v5021_v34 = vpop.f32.mrf.mxu1 }
 0x326   :  { %v10977_v35 = vadd.f32 %v5021_v34, %v4592_v26  ;;  %v10979_v25 = vpop.f32.mrf.mxu0 }
 0x32e   :  { %v8442_v12 = vpop.f32.mrf.mxu0 }
 0x330   :  { %v6017_v47 = vpop.f32.mrf.mxu0 }
 0x332   :  { %v8358_v15 = vpop.f32.mrf.mxu1  ;;  %v10981_v44 = vpop.f32.mrf.mxu0 }
 0x333   :  { %v5063_v49 = vadd.f32 %v8358_v15, %v4597_v39 }
 0x334   :  { %v5034_v31 = vpop.f32.mrf.mxu1  ;;  %v6020_v16 = vpop.f32.mrf.mxu0 }
 0x335   :  { %v10983_v24 = vadd.f32 %v5034_v31, %v4595_v6  ;;  %v10985_v50 = vadd.f32 %v8390_v29, %v5063_v49  ;;  %v5371_v49 = vadd.f32 %v10933_v63, %v10941_v23  ;;  %v5375_v63 = vadd.f32 %v10939_v38, %v10955_v27 }
 0x336   :  { %v8359_v33 = vpop.f32.mrf.mxu1  ;;  %v5379_v38 = vadd.f32 %v10953_v2, %v10969_v51 }
 0x337   :  { %11368 = vst [vmem:[#allocation20_spill] sm:$0xff] %v10985_v50  ;;  %v10987_v13 = vadd.f32 %v8359_v33, %v4598_v20 }
 0x338   :  { %v5037_v58 = vpop.f32.mrf.mxu1 }
 0x339   :  { %v10989_v26 = vadd.f32 %v5037_v58, %v4596_v4 }
 0x33a   :  { %v8410_v32 = vpop.f32.mrf.mxu1 }
 0x33c   :  { %v10991_v55 = vpop.f32.mrf.mxu0  ;;  %v5551_v22 = vpop.f32.mrf.mxu1 }
 0x33d   :  { %v5614_v58 = vadd.f32 %v5551_v22, %v5371_v49 }
 0x33e   :  { %v6033_v0 = vpop.f32.mrf.mxu0  ;;  %v8411_v39 = vpop.f32.mrf.mxu1 }
 0x33f   :  { %v6080_v22 = vadd.f32 %v6017_v47, %v5614_v58 }
 0x340   :  { %v10993_v30 = vpop.f32.mrf.mxu0  ;;  %v5554_v59 = vpop.f32.mrf.mxu1 }
 0x342   :  { %v10995_v6 = vpop.f32.mrf.mxu0  ;;  %v8414_v3 = vpop.f32.mrf.mxu1 }
 0x343   :  { %v5620_v27 = vadd.f32 %v8414_v3, %v10957_v40 }
 0x344   :  { %v5567_v46 = vpop.f32.mrf.mxu1 }
 0x345   :  { %v5618_v49 = vadd.f32 %v5567_v46, %v5375_v63 }
 0x346   :  { %v10997_v1 = vpop.f32.mrf.mxu0  ;;  %v8415_v20 = vpop.f32.mrf.mxu1 }
 0x348   :  { %v10999_v36 = vpop.f32.mrf.mxu0  ;;  %v5570_v4 = vpop.f32.mrf.mxu1 }
 0x34a   :  { %v11001_v14 = vpop.f32.mrf.mxu0  ;;  %v11003_v43 = vpop.f32.mrf.mxu1 }
 0x34b   :  { %11369 = vst [vmem:[#allocation10_spill] sm:$0xff] %v11001_v14 }
 0x34c   :  { %v11005_v52 = vpop.f32.mrf.mxu0  ;;  %v5583_v54 = vpop.f32.mrf.mxu1 }
 0x34d   :  { %11370 = vst [vmem:[#allocation11_spill] sm:$0xff] %v11005_v52 }
 0x34e   :  { %v11007_v8 = vpop.f32.mrf.mxu1 }
 0x34f   :  { %v11009_v42 = vpop.f32.mrf.mxu0 }
 0x350   :  { %11371 = vst [vmem:[#allocation19_spill] sm:$0xff] %v11009_v42  ;;  %v11011_v53 = vpop.f32.mrf.mxu1 }
 0x351   :  { %v11013_v29 = vpop.f32.mrf.mxu0 }
 0x352   :  { %11372 = vst [vmem:[#allocation34_spill] sm:$0xff] %v11013_v29  ;;  %v11015_v11 = vpop.f32.mrf.mxu1  ;;  %v5616_v29 = vadd.f32 %v8410_v32, %v10943_v37  ;;  %v5382_v37 = vadd.f32 %v10959_v17, %v10973_v21 }
 0x353   :  { %11373 = vst [vmem:[#allocation12_spill] sm:$0xff] %v11015_v11  ;;  %v11017_v28 = vpop.f32.mrf.mxu0 }
 0x354   :  { %11374 = vst [vmem:[#allocation13_spill] sm:$0xff] %v11017_v28  ;;  %v11019_v48 = vpop.f32.mrf.mxu1  ;;  %v6082_v57 = vadd.f32 %v8442_v12, %v5616_v29 }
 0x355   :  { %v11021_v34 = vpop.f32.mrf.mxu0 }
 0x356   :  { %11375 = vst [vmem:[#allocation15_spill] sm:$0xff] %v11021_v34  ;;  %v11023_v15 = vpop.f32.mrf.mxu1  ;;  %v5374_v34 = vadd.f32 %v10935_v62, %v10947_v19  ;;  %v5378_v62 = vadd.f32 %v10945_v45, %v10961_v7  ;;  %v6084_v7 = vadd.f32 %v6033_v0, %v5618_v49  ;;  %v5383_v0 = vadd.f32 %v10967_v5, %v10983_v24 }
 0x357   :  { %11376 = vst [vmem:[#allocation18_spill] sm:$0xff] %v11023_v15  ;;  %v11029_v33 = vpop.f32.mrf.mxu0  ;;  %v5615_v15 = vadd.f32 %v5554_v59, %v5372_v41  ;;  %v5376_v41 = vadd.f32 %v10949_v9, %v10965_v18 }
 0x358   :  { %v11027_v31 = vpop.f32.mrf.mxu1 }
 0x359   :  { %11377 = vst [vmem:[#allocation23_spill] sm:$0xff] %v11027_v31  ;;  %v11033_v42 = vpop.f32.mrf.mxu0  ;;  %v5617_v31 = vadd.f32 %v8411_v39, %v5374_v34  ;;  %v6081_v50 = vadd.f32 %v6020_v16, %v5615_v15  ;;  %v5619_v32 = vadd.f32 %v5570_v4, %v5376_v41 }
 0x35a   :  { %v6780_v9 = vmul.f32 %v11033_v42, %v11033_v42 }
 0x35b   :  { %v8474_v28 = vpop.f32.mrf.mxu1  ;;  %v11038_v14 = vpop.f32.mrf.mxu0  ;;  %v6083_v47 = vadd.f32 %v10981_v44, %v5617_v31  ;;  %v5621_v44 = vadd.f32 %v8415_v20, %v5378_v62  ;;  %v6782_v20 = vmul.f32 %v11029_v33, %v11029_v33  ;;  %v6085_v15 = vadd.f32 %v10995_v6, %v5619_v32 }
 0x35c   :  { %v11055_v12 = vadd.f32 %v8474_v28, %v6082_v57 }
 0x35d   :  { %v6339_v23 = vpop.f32.mrf.mxu1  ;;  %v11044_v52 = vpop.f32.mrf.mxu0  ;;  %v6087_v63 = vadd.f32 %v10993_v30, %v5621_v44  ;;  %v5626_v44 = vadd.f32 %v11019_v48, %v5383_v0 }
 0x35e   :  { %v11042_v56 = vadd.f32 %v6339_v23, %v6080_v22  ;;  %v6781_v2 = vmul.f32 %v11044_v52, %v11044_v52  ;;  %v6759_v59 = vadd.f32 %v11044_v52, %v11033_v42  ;;  %v6443_v3 = vmul.f32 %v11055_v12, %v11055_v12 }
 0x35f   :  { %v8475_v11 = vpop.f32.mrf.mxu1  ;;  %v11072_v21 = vpop.f32.mrf.mxu0 }
 0x360   :  { %v6441_v17 = vmul.f32 %v11042_v56, %v11042_v56  ;;  %v11066_v18 = vadd.f32 %v8475_v11, %v6083_v47  ;;  %v5622_v11 = vadd.f32 %v5583_v54, %v5379_v38  ;;  %v6796_v5 = vadd.f32 %v6781_v2, %v6780_v9 }
 0x361   :  { %v6342_v19 = vpop.f32.mrf.mxu1  ;;  %v11092_v31 = vpop.f32.mrf.mxu0  ;;  %v5624_v54 = vadd.f32 %v11003_v43, %v10971_v10  ;;  %v6783_v10 = vmul.f32 %v11038_v14, %v11038_v14  ;;  %v5384_v9 = vadd.f32 %v10979_v25, %v10989_v26 }
 0x362   :  { %v11058_v16 = vadd.f32 %v6342_v19, %v6081_v50  ;;  %v5380_v50 = vadd.f32 %v10963_v61, %v10977_v35  ;;  %v6086_v61 = vadd.f32 %v10991_v55, %v5620_v27  ;;  %v6444_v24 = vmul.f32 %v11066_v18, %v11066_v18 }
 0x363   :  { %v8478_v45 = vpop.f32.mrf.mxu1  ;;  %v6760_v55 = vadd.f32 %v11029_v33, %v6759_v59  ;;  %v6797_v43 = vadd.f32 %v6796_v5, %v6782_v20  ;;  %v6088_v30 = vadd.f32 %v10999_v36, %v5622_v11  ;;  %v11114_v32 = vpop.f32.mrf.mxu0  ;;  %v11378_v59 = vld [vmem:[#allocation11_spill] sm:$0xff]  ;;  %v11381_v11 = vld [vmem:[#allocation10_spill] sm:$0xff] }
 0x364   :  { %v6420_v40 = vadd.f32 %v11058_v16, %v11042_v56  ;;  %v6442_v51 = vmul.f32 %v11058_v16, %v11058_v16  ;;  %v11096_v58 = vadd.f32 %v8478_v45, %v6086_v61  ;;  %v5623_v6 = vadd.f32 %v11011_v53, %v5380_v50 }
 0x365   :  { %v6355_v39 = vpop.f32.mrf.mxu1  ;;  %v5625_v45 = vadd.f32 %v11007_v8, %v5382_v37  ;;  %v5386_v53 = vadd.f32 %v10975_v60, %v10987_v13  ;;  %v6761_v36 = vadd.f32 %v11038_v14, %v6760_v55  ;;  %v6090_v8 = vadd.f32 %v10997_v1, %v5624_v54 }
 0x366   :  { %v6421_v46 = vadd.f32 %v6420_v40, %v11055_v12  ;;  %v6457_v4 = vadd.f32 %v6442_v51, %v6441_v17  ;;  %v11083_v29 = vadd.f32 %v6355_v39, %v6084_v7  ;;  %v6447_v2 = vmul.f32 %v11096_v58, %v11096_v58  ;;  %v11134_v39 = vpop.f32.mrf.mxu0 }
 0x367   :  { %v8479_v35 = vpop.f32.mrf.mxu1  ;;  %v6784_v60 = vmul.f32 %v11092_v31, %v11092_v31  ;;  %v6798_v13 = vadd.f32 %v6797_v43, %v6783_v10  ;;  %v6762_v1 = vadd.f32 %v6761_v36, %v11092_v31  ;;  %v6091_v20 = vadd.f32 %v11381_v11, %v5625_v45  ;;  %v11384_v43 = vld [vmem:[#allocation18_spill] sm:$0xff] }
 0x368   :  { %v6458_v28 = vadd.f32 %v6457_v4, %v6443_v3  ;;  %v6422_v34 = vadd.f32 %v6421_v46, %v11066_v18  ;;  %v6445_v49 = vmul.f32 %v11083_v29, %v11083_v29  ;;  %v11109_v19 = vadd.f32 %v8479_v35, %v6087_v63  ;;  %v11379_v46 = vld [vmem:[#allocation20_spill] sm:$0xff] }
 0x369   :  { %v6358_v23 = vpop.f32.mrf.mxu1  ;;  %v6089_v3 = vadd.f32 %v11378_v59, %v5623_v6  ;;  %v11380_v4 = vld [vmem:[#allocation12_spill] sm:$0xff]  ;;  %v6799_v54 = vadd.f32 %v6798_v13, %v6784_v60  ;;  %v6785_v63 = vmul.f32 %v11134_v39, %v11134_v39  ;;  %v6786_v36 = vmul.f32 %v11072_v21, %v11072_v21  ;;  %v11386_v60 = vld [vmem:[#allocation15_spill] sm:$0xff] }
 0x36a   :  { %v6423_v22 = vadd.f32 %v6422_v34, %v11083_v29  ;;  %v6459_v57 = vadd.f32 %v6458_v28, %v6444_v24  ;;  %v11103_v62 = vadd.f32 %v6358_v23, %v6085_v15  ;;  %v6448_v26 = vmul.f32 %v11109_v19, %v11109_v19  ;;  %v11382_v34 = vld [vmem:[#allocation23_spill] sm:$0xff]  ;;  %v11383_v23 = vld [vmem:[#allocation34_spill] sm:$0xff] }
 0x36b   :  { %v8482_v41 = vpop.f32.mrf.mxu1  ;;  %v5628_v48 = vadd.f32 %v11380_v4, %v11379_v46  ;;  %v5627_v15 = vadd.f32 %v11382_v34, %v5384_v9 }
 0x36c   :  { %v6460_v38 = vadd.f32 %v6459_v57, %v6445_v49  ;;  %v6424_v27 = vadd.f32 %v6423_v22, %v11103_v62  ;;  %v6446_v47 = vmul.f32 %v11103_v62, %v11103_v62  ;;  %v11139_v0 = vadd.f32 %v8482_v41, %v6090_v8 }
 0x36d   :  { %v6371_v7 = vpop.f32.mrf.mxu1  ;;  %v6092_v22 = vadd.f32 %v11383_v23, %v5626_v44  ;;  %v5629_v41 = vadd.f32 %v11384_v43, %v5386_v53  ;;  %v6093_v13 = vadd.f32 %v11386_v60, %v5627_v15 }
 0x36e   :  { %v6425_v17 = vadd.f32 %v6424_v27, %v11096_v58  ;;  %v6461_v40 = vadd.f32 %v6460_v38, %v6446_v47  ;;  %v11125_v51 = vadd.f32 %v6371_v7, %v6088_v30  ;;  %v6763_v30 = vadd.f32 %v6762_v1, %v11134_v39 }
 0x36f   :  { %v8483_v25 = vpop.f32.mrf.mxu1  ;;  %v6451_v27 = vmul.f32 %v11139_v0, %v11139_v0  ;;  %v6800_v7 = vadd.f32 %v6799_v54, %v6785_v63  ;;  %v6787_v1 = vmul.f32 %v11114_v32, %v11114_v32 }
 0x370   :  { %v6462_v37 = vadd.f32 %v6461_v40, %v6447_v2  ;;  %v6426_v50 = vadd.f32 %v6425_v17, %v11109_v19  ;;  %v6449_v5 = vmul.f32 %v11125_v51, %v11125_v51  ;;  %v11152_v57 = vadd.f32 %v8483_v25, %v6091_v20  ;;  %v11385_v2 = vld [vmem:[#allocation19_spill] sm:$0xff] }
 0x371   :  { %v6374_v61 = vpop.f32.mrf.mxu1  ;;  %v6094_v17 = vadd.f32 %v11385_v2, %v5628_v48  ;;  %v6764_v25 = vadd.f32 %v11072_v21, %v6763_v30  ;;  %v6801_v11 = vadd.f32 %v6800_v7, %v6786_v36 }
 0x372   :  { %v6427_v35 = vadd.f32 %v6426_v50, %v11125_v51  ;;  %v6463_v24 = vadd.f32 %v6462_v37, %v6448_v26  ;;  %v11146_v28 = vadd.f32 %v6374_v61, %v6089_v3  ;;  %v6452_v53 = vmul.f32 %v11152_v57, %v11152_v57  ;;  %v11387_v37 = vld [vmem:[#allocation13_spill] sm:$0xff] }
 0x373   :  { %v8486_v55 = vpop.f32.mrf.mxu1  ;;  %v6095_v50 = vadd.f32 %v11387_v37, %v5629_v41  ;;  %v6765_v15 = vadd.f32 %v11114_v32, %v6764_v25 }
 0x374   :  { %v6464_v49 = vadd.f32 %v6463_v24, %v6449_v5  ;;  %v6428_v6 = vadd.f32 %v6427_v35, %v11146_v28  ;;  %v6450_v10 = vmul.f32 %v11146_v28, %v11146_v28  ;;  %v11172_v26 = vadd.f32 %v8486_v55, %v6094_v17 }
 0x375   :  { %v6387_v38 = vpop.f32.mrf.mxu1 }
 0x376   :  { %v6429_v47 = vadd.f32 %v6428_v6, %v11139_v0  ;;  %v6465_v45 = vadd.f32 %v6464_v49, %v6450_v10  ;;  %v11162_v9 = vadd.f32 %v6387_v38, %v6092_v22  ;;  %v6455_v54 = vmul.f32 %v11172_v26, %v11172_v26 }
 0x377   :  { %v8487_v40 = vpop.f32.mrf.mxu1  ;;  %v6802_v22 = vadd.f32 %v6801_v11, %v6787_v1 }
 0x378   :  { %v6466_v44 = vadd.f32 %v6465_v45, %v6451_v27  ;;  %v6430_v8 = vadd.f32 %v6429_v47, %v11152_v57  ;;  %v6453_v46 = vmul.f32 %v11162_v9, %v11162_v9  ;;  %v11184_v35 = vadd.f32 %v8487_v40, %v6095_v50 }
 0x379   :  { %v6390_v59 = vpop.f32.mrf.mxu1 }
 0x37a   :  { %v6431_v3 = vadd.f32 %v6430_v8, %v11162_v9  ;;  %v6467_v4 = vadd.f32 %v6466_v44, %v6452_v53  ;;  %v11178_v48 = vadd.f32 %v6390_v59, %v6093_v13  ;;  %v6456_v6 = vmul.f32 %v11184_v35, %v11184_v35 }
 0x37b   :  { %v11182_v20 = vpop.f32.mrf.mxu1 }
 0x37c   :  { %v6468_v61 = vadd.f32 %v6467_v4, %v6453_v46  ;;  %v6432_v5 = vadd.f32 %v6431_v3, %v11178_v48  ;;  %v6454_v24 = vmul.f32 %v11178_v48, %v11178_v48  ;;  %v6790_v7 = vmul.f32 %v11182_v20, %v11182_v20 }
 0x37d   :  { %v11189_v34 = vpop.f32.mrf.mxu1 }
 0x37e   :  { %v6433_v63 = vadd.f32 %v6432_v5, %v11172_v26  ;;  %v6469_v55 = vadd.f32 %v6468_v61, %v6454_v24  ;;  %v6788_v23 = vmul.f32 %v11189_v34, %v11189_v34  ;;  %v6766_v41 = vadd.f32 %v6765_v15, %v11189_v34 }
 0x37f   :  { %v11197_v49 = vpop.f32.mrf.mxu1 }
 0x380   :  { %v6434_v10 = vadd.f32 %v6433_v63, %v11184_v35  ;;  %v6470_v43 = vadd.f32 %v6469_v55, %v6455_v54  ;;  %v6803_v30 = vadd.f32 %v6802_v22, %v6788_v23  ;;  %v6791_v8 = vmul.f32 %v11197_v49, %v11197_v49 }
 0x381   :  { %v11203_v38 = vpop.f32.mrf.mxu1 }
 0x382   :  { %v6435_v27 = vrot.slane %v6434_v10, 4  ;;  %v6471_v47 = vadd.f32 %v6470_v43, %v6456_v6  ;;  %v6767_v45 = vadd.f32 %v6766_v41, %v11203_v38  ;;  %v6789_v36 = vmul.f32 %v11203_v38, %v11203_v38 }
 0x383   :  { %v11210_v2 = vpop.f32.mrf.mxu1 }
 0x384   :  { %v6436_v17 = vadd.f32 %v6435_v27, %v6434_v10  ;;  %v6472_v40 = vrot.slane %v6471_v47, 4  ;;  %v6768_v53 = vadd.f32 %v11182_v20, %v6767_v45  ;;  %v6804_v44 = vadd.f32 %v6803_v30, %v6789_v36 }
 0x385   :  { %v11215_v60 = vpop.f32.mrf.mxu1  ;;  %v6794_v6 = vmul.f32 %v11210_v2, %v11210_v2 }
 0x386   :  { %v6437_v13 = vrot.slane %v6436_v17, 2  ;;  %v6473_v25 = vadd.f32 %v6472_v40, %v6471_v47  ;;  %v6805_v37 = vadd.f32 %v6804_v44, %v6790_v7  ;;  %v6769_v50 = vadd.f32 %v11197_v49, %v6768_v53 }
 0x387   :  { %v6792_v59 = vmul.f32 %v11215_v60, %v11215_v60  ;;  %v11220_v3 = vpop.f32.mrf.mxu1 }
 0x388   :  { %v6438_v46 = vadd.f32 %v6437_v13, %v6436_v17  ;;  %v6474_v4 = vrot.slane %v6473_v25, 2  ;;  %v6770_v1 = vadd.f32 %v6769_v50, %v11215_v60  ;;  %v6806_v11 = vadd.f32 %v6805_v37, %v6791_v8 }
 0x389   :  { %v11223_v61 = vpop.f32.mrf.mxu1  ;;  %v6795_v27 = vmul.f32 %v11220_v3, %v11220_v3 }
 0x38a   :  { %v6439_v5 = vrot.slane %v6438_v46, 1  ;;  %v6475_v24 = vadd.f32 %v6474_v4, %v6473_v25  ;;  %v6807_v15 = vadd.f32 %v6806_v11, %v6792_v59  ;;  %v6771_v54 = vadd.f32 %v6770_v1, %v11223_v61 }
 0x38b   :  { %v6793_v63 = vmul.f32 %v11223_v61, %v11223_v61 }
 0x38c   :  { %v6440_v55 = vadd.f32 %v6439_v5, %v6438_v46  ;;  %v6476_v23 = vrot.slane %v6475_v24, 1  ;;  %v6772_v22 = vadd.f32 %v11210_v2, %v6771_v54 }
 0x38d   :  { %v6808_v10 = vadd.f32 %v6807_v15, %v6793_v63 }
 0x38e   :  { %v6477_v43 = vadd.f32 %v6476_v23, %v6475_v24  ;;  %v6478_v41 = vmul.f32 0.0078125, %v6440_v55  ;;  %v6773_v30 = vadd.f32 %v11220_v3, %v6772_v22  ;;  %v6418_v55 = vld [vmem:[%s11290_s5] sm:$0x1] }
 0x38f   :  { %v6809_v47 = vadd.f32 %v6808_v10, %v6794_v6 }
 0x390   :  { %v6479_v45 = vmul.f32 0.0078125, %v6477_v43  ;;  %v6480_v36 = vmul.f32 %v6478_v41, %v6478_v41  ;;  %v6774_v7 = vrot.slane %v6773_v30, 4  ;;  %v6419_v43 = vld [vmem:[%s11291_s6] sm:$0x1] }
 0x391   :  { %v6810_v17 = vadd.f32 %v6809_v47, %v6795_v27  ;;  %v11388_v27 = vld [vmem:[#allocation24_spill] sm:$0xff] }
 0x392   :  { %v6481_v40 = vsub.f32 %v6479_v45, %v6480_v36  ;;  %v6775_v53 = vadd.f32 %v6774_v7, %v6773_v30 }
 0x393   :  { %v6811_v44 = vrot.slane %v6810_v17, 4 }
 0x394   :  { %v6482_v8 = vmax.f32 %v6481_v40, 0.0  ;;  %v6776_v13 = vrot.slane %v6775_v53, 2 }
 0x395   :  { %v6812_v25 = vadd.f32 %v6811_v44, %v6810_v17 }
 0x396   :  { %v6483_v37 = vadd.f32 1e-05, %v6482_v8  ;;  %v6777_v50 = vadd.f32 %v6776_v13, %v6775_v53 }
 0x397   :  { %v6813_v59 = vrot.slane %v6812_v25, 2 }
 0x398   :  { %8777 = vrsqrt.f32 %v6483_v37  ;;  %v6778_v46 = vrot.slane %v6777_v50, 1 }
 0x399   :  { %v6814_v4 = vadd.f32 %v6813_v59, %v6812_v25 }
 0x39a   :  { %v6779_v1 = vadd.f32 %v6778_v46, %v6777_v50 }
 0x39b   :  { %v6815_v11 = vrot.slane %v6814_v4, 1 }
 0x39c   :  { %v6817_v5 = vmul.f32 0.0078125, %v6779_v1 }
 0x39d   :  { %v6816_v24 = vadd.f32 %v6815_v11, %v6814_v4 }
 0x39e   :  { %v6819_v15 = vmul.f32 %v6817_v5, %v6817_v5 }
 0x39f   :  { %v6818_v54 = vmul.f32 0.0078125, %v6816_v24 }
 0x3a1   :  { %v6820_v63 = vsub.f32 %v6818_v54, %v6819_v15 }
 0x3a3   :  { %v6821_v23 = vmax.f32 %v6820_v63, 0.0  ;;  %v6758_v63 = vld [vmem:[%s11294_s9] sm:$0x1] }
 0x3a5   :  { %v8778_v22 = vpop.eup %8777  ;;  %v6822_v6 = vadd.f32 1e-05, %v6821_v23 }
 0x3a6   :  { %v6485_v10 = vmul.f32 %v8778_v22, %v6418_v55 }
 0x3a7   :  { %8779 = vrsqrt.f32 %v6822_v6 }
 0x3a8   :  { %v6486_v30 = vmul.f32 %v6485_v10, %v6478_v41  ;;  %v6492_v47 = vrot.slane %v6485_v10, %v11388_v27 }
 0x3aa   :  { %v6487_v45 = vsub.f32 %v6419_v43, %v6486_v30  ;;  %v6507_v36 = vmul.f32 %v6492_v47, %v11178_v48  ;;  %v6494_v7 = vmul.f32 %v6492_v47, %v11042_v56  ;;  %v6495_v17 = vmul.f32 %v6492_v47, %v11058_v16 }
 0x3ab   :  { %v6496_v40 = vmul.f32 %v6492_v47, %v11055_v12  ;;  %v6497_v53 = vmul.f32 %v6492_v47, %v11066_v18  ;;  %v6498_v44 = vmul.f32 %v6492_v47, %v11083_v29  ;;  %v6499_v8 = vmul.f32 %v6492_v47, %v11103_v62 }
 0x3ac   :  { %v6514_v13 = vrot.slane %v6487_v45, %v11388_v27  ;;  %v6500_v41 = vmul.f32 %v6492_v47, %v11096_v58  ;;  %v6501_v25 = vmul.f32 %v6492_v47, %v11109_v19  ;;  %v6502_v48 = vmul.f32 %v6492_v47, %v11125_v51 }
 0x3ad   :  { %v6503_v56 = vmul.f32 %v6492_v47, %v11146_v28  ;;  %v6504_v16 = vmul.f32 %v6492_v47, %v11139_v0  ;;  %v6505_v12 = vmul.f32 %v6492_v47, %v11152_v57  ;;  %v6506_v18 = vmul.f32 %v6492_v47, %v11162_v9  ;;  %v6757_v9 = vld [vmem:[%s11293_s8] sm:$0x1]  ;;  %s8829_s8 = smov [#allocation6]  }
 0x3ae   :  { %v6529_v37 = vadd.f32 %v6514_v13, %v6507_v36  ;;  %v6508_v29 = vmul.f32 %v6492_v47, %v11172_v26  ;;  %v6509_v62 = vmul.f32 %v6492_v47, %v11184_v35  ;;  %v6516_v50 = vadd.f32 %v6514_v13, %v6494_v7  ;;  %s6924_s9 = sshll.u32 %s8829_s8, 4  ;;  %s6925_s9 = int_to_ptr.vmem [resolvable:$true] %s6924_s9 }
 0x3af   :  { %v6517_v59 = vadd.f32 %v6514_v13, %v6495_v17  ;;  %v6518_v58 = vadd.f32 %v6514_v13, %v6496_v40  ;;  %v6519_v46 = vadd.f32 %v6514_v13, %v6497_v53  ;;  %v6520_v19 = vadd.f32 %v6514_v13, %v6498_v44  ;;  %s8801_s21 = scalar_lea.vmem %s6925_s9, 2048  ;;  %p8806_p6 = scmp.lt.s32.totalorder %s6925_s9, %s6925_s9 }
 0x3b0   :  { %v6521_v4 = vadd.f32 %v6514_v13, %v6499_v8  ;;  %v6522_v51 = vadd.f32 %v6514_v13, %v6500_v41  ;;  %v6523_v1 = vadd.f32 %v6514_v13, %v6501_v25  ;;  %v6524_v28 = vadd.f32 %v6514_v13, %v6502_v48  ;;  %p8802_p5 = scmp.ne.s32.totalorder %s6925_s9, %s8801_s21  ;;  %p8807_p7 = scmp.lt.s32.totalorder %s8801_s21, %s8801_s21 }
 0x3b1   :  { %v6525_v11 = vadd.f32 %v6514_v13, %v6503_v56  ;;  %v6526_v0 = vadd.f32 %v6514_v13, %v6504_v16  ;;  %v6527_v24 = vadd.f32 %v6514_v13, %v6505_v12  ;;  %v6528_v57 = vadd.f32 %v6514_v13, %v6506_v18 }
 0x3b2   :  { %v6530_v26 = vadd.f32 %v6514_v13, %v6508_v29  ;;  %v6531_v15 = vadd.f32 %v6514_v13, %v6509_v62  ;;  %p8808_p8 = por %p8807_p7, %p8806_p6 }
 0x3b4   :  { %v8780_v35 = vpop.eup %8779  ;;  %p8809_p9 = pnand %p8808_p8, %p8802_p5 }
 0x3b5   :  { %v6824_v54 = vmul.f32 %v8780_v35, %v6757_v9 }
 0x3b7   :  { %v6825_v55 = vmul.f32 %v6824_v54, %v6817_v5  ;;  %v6831_v23 = vrot.slane %v6824_v54, %v11388_v27 }
 0x3b9   :  { %v6826_v22 = vsub.f32 %v6758_v63, %v6825_v55  ;;  %v6846_v6 = vmul.f32 %v6831_v23, %v11223_v61  ;;  %v6833_v10 = vmul.f32 %v6831_v23, %v11033_v42  ;;  %v6834_v43 = vmul.f32 %v6831_v23, %v11044_v52 }
 0x3ba   :  { %v6835_v30 = vmul.f32 %v11029_v33, %v6831_v23  ;;  %v6836_v47 = vmul.f32 %v11038_v14, %v6831_v23  ;;  %v6837_v45 = vmul.f32 %v6831_v23, %v11092_v31  ;;  %v6838_v36 = vmul.f32 %v6831_v23, %v11134_v39 }
 0x3bb   :  { %v6853_v7 = vrot.slane %v6826_v22, %v11388_v27  ;;  %v6839_v5 = vmul.f32 %v11072_v21, %v6831_v23  ;;  %v6840_v17 = vmul.f32 %v11114_v32, %v6831_v23  ;;  %v6841_v61 = vmul.f32 %v6831_v23, %v11189_v34 }
 0x3bc   :  { %v6842_v42 = vmul.f32 %v6831_v23, %v11203_v38  ;;  %v6843_v52 = vmul.f32 %v11182_v20, %v6831_v23  ;;  %v6844_v33 = vmul.f32 %v11197_v49, %v6831_v23  ;;  %v6845_v14 = vmul.f32 %v6831_v23, %v11215_v60 }
 0x3bd   :  { %v6868_v40 = vadd.f32 %v6853_v7, %v6846_v6  ;;  %v6847_v31 = vmul.f32 %v11210_v2, %v6831_v23  ;;  %v6848_v39 = vmul.f32 %v11220_v3, %v6831_v23  ;;  %v6855_v27 = vadd.f32 %v6853_v7, %v6833_v10 }
 0x3be   :  { %v6856_v53 = vadd.f32 %v6853_v7, %v6834_v43  ;;  %v6857_v21 = vadd.f32 %v6853_v7, %v6835_v30  ;;  %v6858_v44 = vadd.f32 %v6853_v7, %v6836_v47  ;;  %v6859_v32 = vadd.f32 %v6853_v7, %v6837_v45 }
 0x3bf   :  { %v6884_v8 = vadd.f32 %v6868_v40, %v6529_v37  ;;  %v6860_v34 = vadd.f32 %v6853_v7, %v6838_v36  ;;  %v6861_v13 = vadd.f32 %v6853_v7, %v6839_v5  ;;  %v6862_v38 = vadd.f32 %v6853_v7, %v6840_v17 }
 0x3c0   :  { %v6863_v41 = vadd.f32 %v6853_v7, %v6841_v61  ;;  %v6864_v20 = vadd.f32 %v6853_v7, %v6842_v42  ;;  %v6865_v25 = vadd.f32 %v6853_v7, %v6843_v52  ;;  %v6866_v49 = vadd.f32 %v6853_v7, %v6844_v33 }
 0x3c1   :  { %v6900_v48 = vmax.f32 %v6884_v8, 0.0  ;;  %v6867_v60 = vadd.f32 %v6853_v7, %v6845_v14  ;;  %v6869_v56 = vadd.f32 %v6853_v7, %v6847_v31  ;;  %v6870_v16 = vadd.f32 %v6853_v7, %v6848_v39 }
 0x3c2   :  { %v6871_v2 = vadd.f32 %v6855_v27, %v6516_v50  ;;  %v6872_v12 = vadd.f32 %v6856_v53, %v6517_v59  ;;  %v6873_v3 = vadd.f32 %v6857_v21, %v6518_v58  ;;  %v6874_v18 = vadd.f32 %v6858_v44, %v6519_v46 }
 0x3c3   :  { %6916 = vst [vmem:[#allocation6 + $0x68] sm:$0xff] %v6900_v48  ;;  %v6875_v29 = vadd.f32 %v6859_v32, %v6520_v19  ;;  %v6876_v62 = vadd.f32 %v6860_v34, %v6521_v4  ;;  %v6877_v9 = vadd.f32 %v6861_v13, %v6522_v51  ;;  %v6878_v37 = vadd.f32 %v6862_v38, %v6523_v1 }
 0x3c4   :  { %v6879_v35 = vadd.f32 %v6863_v41, %v6524_v28  ;;  %v6880_v54 = vadd.f32 %v6864_v20, %v6525_v11  ;;  %v6881_v63 = vadd.f32 %v6865_v25, %v6526_v0  ;;  %v6882_v55 = vadd.f32 %v6866_v49, %v6527_v24 }
 0x3c5   :  { %v6883_v23 = vadd.f32 %v6867_v60, %v6528_v57  ;;  %v6885_v22 = vadd.f32 %v6869_v56, %v6530_v26  ;;  %v6886_v6 = vadd.f32 %v6870_v16, %v6531_v15  ;;  %v6887_v10 = vmax.f32 %v6871_v2, 0.0 }
 0x3c6   :  { %v6888_v43 = vmax.f32 %v6872_v12, 0.0  ;;  %v6889_v30 = vmax.f32 %v6873_v3, 0.0  ;;  %v6890_v47 = vmax.f32 %v6874_v18, 0.0  ;;  %v6891_v50 = vmax.f32 %v6875_v29, 0.0 }
 0x3c7   :  { %v6892_v59 = vmax.f32 %v6876_v62, 0.0  ;;  %v6893_v58 = vmax.f32 %v6877_v9, 0.0  ;;  %v6894_v46 = vmax.f32 %v6878_v37, 0.0  ;;  %v6895_v19 = vmax.f32 %v6879_v35, 0.0  ;;  %6903 = vst [vmem:[#allocation6] sm:$0xff] %v6887_v10 }
 0x3c8   :  { %v6896_v4 = vmax.f32 %v6880_v54, 0.0  ;;  %v6897_v51 = vmax.f32 %v6881_v63, 0.0  ;;  %v6898_v1 = vmax.f32 %v6882_v55, 0.0  ;;  %v6899_v28 = vmax.f32 %v6883_v23, 0.0  ;;  %6904 = vst [vmem:[#allocation6 + $0x8] sm:$0xff] %v6888_v43  ;;  %6905 = vst [vmem:[#allocation6 + $0x10] sm:$0xff] %v6889_v30 }
 0x3c9   :  { %6906 = vst [vmem:[#allocation6 + $0x18] sm:$0xff] %v6890_v47  ;;  %6907 = vst [vmem:[#allocation6 + $0x20] sm:$0xff] %v6891_v50  ;;  %v6901_v11 = vmax.f32 %v6885_v22, 0.0  ;;  %v6902_v0 = vmax.f32 %v6886_v6, 0.0 }
 0x3ca   :  { %6908 = vst [vmem:[#allocation6 + $0x28] sm:$0xff] %v6892_v59  ;;  %6909 = vst [vmem:[#allocation6 + $0x30] sm:$0xff] %v6893_v58 }
 0x3cb   :  { %6910 = vst [vmem:[#allocation6 + $0x38] sm:$0xff] %v6894_v46  ;;  %6911 = vst [vmem:[#allocation6 + $0x40] sm:$0xff] %v6895_v19 }
 0x3cc   :  { %6912 = vst [vmem:[#allocation6 + $0x48] sm:$0xff] %v6896_v4  ;;  %6913 = vst [vmem:[#allocation6 + $0x50] sm:$0xff] %v6897_v51 }
 0x3cd   :  { %6914 = vst [vmem:[#allocation6 + $0x58] sm:$0xff] %v6898_v1  ;;  %6915 = vst [vmem:[#allocation6 + $0x60] sm:$0xff] %v6899_v28 }
 0x3ce   :  { %6917 = vst [vmem:[#allocation6 + $0x70] sm:$0xff] %v6901_v11  ;;  %6918 = vst [vmem:[#allocation6 + $0x78] sm:$0xff] %v6902_v0 }
 0x3cf   :  { %8812 = shalt.err (!%p8809_p9)
}
 0x3d0   :  { %s8830_s22 = smov 128   ;;  %s8831_s23 = smov 8  }
 0x3d1   :  { %6930 = dma.vmem_to_hbm [thread:$0]  %s6925_s9, 2048, %s11295_s10, [#allocation5], %s8830_s22, %s8830_s22, %s8831_s23  }
 0x3d2   :  { %8823 = dma.done.wait [#allocation5], 2048  }
 0x3d3   :  { %8824 = vsyncadd [#allocation5], 4294965248 }
 0x3d4   :  { %6934 = vsyncpa [#allocation4], 1 }
 0x3d5   :  { %6935 = vsyncpa [#allocation5], 1 }

</bundles_post_ra>
